<compile_context>
chip_gen: v5e
topology: v5e:2x2
jax: 0.10.0
libtpu: 0.0.40
codegen_flags: <defaults>
</compile_context>

<pallas_src>
from functools import partial

import jax
import jax.numpy as jnp
from jax.experimental import pallas as pl
from jax.experimental.pallas import tpu as pltpu


# ----------------------------------------------------------------------------
# Kernel 1: direct conv3x3 + bias + ReLU, one image per grid step.
#   The (H*W, Cin) tap block is built in VMEM from static slices of the padded
#   NHWC input; each of the 9 taps contributes one bf16 matmul into an f32 acc.
#   (K per tap is tiny for a 3-channel first conv; later/larger layers would
#   fuse taps into a single larger-K dot.)
# ----------------------------------------------------------------------------
def _conv_relu_kernel(xpad_ref, w_ref, b_ref, out_ref, *, H, W, KH, KW):
    # xpad: (1, H+KH-1, W+KW-1, Cin) f32
    # w   : (KH*KW, Cin, Cout) bf16
    # b   : (1, Cout) f32
    # out : (H*W, Cout) bf16   (NHWC-flat rows: h*W + w)
    acc = jnp.zeros(out_ref.shape, jnp.float32)
    t = 0
    for i in range(KH):
        for j in range(KW):
            tap = xpad_ref[0, i:i + H, j:j + W, :]          # (H, W, Cin) f32
            tap = tap.reshape(H * W, tap.shape[-1])          # (H*W, Cin)
            acc = acc + jnp.dot(tap.astype(jnp.bfloat16), w_ref[t],
                                preferred_element_type=jnp.float32)
            t += 1
    out_ref[...] = jnp.maximum(acc + b_ref[...], 0.0).astype(out_ref.dtype)


def conv2d_relu(xpad, w_taps, b_conv, *, out_h, out_w):
    """3x3 'same' conv + ReLU. xpad: (B, H+2, W+2, Cin) f32 (already padded)."""
    B, Hp, Wp, C = xpad.shape
    KHW, Cin, Cout = w_taps.shape
    KH = KW = int(round(KHW ** 0.5))
    assert KH * KW == KHW and Cin == C
    assert Hp == out_h + KH - 1 and Wp == out_w + KW - 1
    assert (out_h * out_w) % 8 == 0 and Cout % 128 == 0   # lane/sublane dense

    kernel = partial(_conv_relu_kernel, H=out_h, W=out_w, KH=KH, KW=KW)
    return pl.pallas_call(
        kernel,
        out_shape=jax.ShapeDtypeStruct((B * out_h * out_w, Cout), jnp.bfloat16),
        grid_spec=pltpu.PrefetchScalarGridSpec(
            num_scalar_prefetch=0,
            grid=(B,),
            in_specs=[
                pl.BlockSpec((1, Hp, Wp, C), lambda b: (b, 0, 0, 0)),
                pl.BlockSpec((KHW, Cin, Cout), lambda b: (0, 0, 0)),
                pl.BlockSpec((1, Cout), lambda b: (0, 0)),
            ],
            out_specs=pl.BlockSpec((out_h * out_w, Cout), lambda b: (b, 0)),
        ),
        compiler_params=pltpu.CompilerParams(
            dimension_semantics=("parallel",)),   # batch -> v7x megacore
    )(xpad, w_taps, b_conv)


# ----------------------------------------------------------------------------
# Kernel 2: fused head, gridded over the Dflat reduction axis.
#   classifier fc (accumulated over k) -> [last step] +bias, ReLU, l2norm,
#   fc(embed), l2norm, (abs).  Output stays resident in VMEM across the grid.
# ----------------------------------------------------------------------------
def _head_kernel(x_ref, wc_ref, bc_ref, wf_ref, bf_ref, out_ref, acc_ref,
                 *, use_abs, no_imgnorm):
    k = pl.program_id(0)

    @pl.when(k == 0)
    def _():
        acc_ref[...] = jnp.zeros_like(acc_ref)

    # partial product of the "classifier" fc: (B, tk)bf16 @ (tk, F)bf16 -> f32
    acc_ref[...] += jnp.dot(x_ref[...], wc_ref[...],
                            preferred_element_type=jnp.float32)

    @pl.when(k == pl.num_programs(0) - 1)
    def _():
        feat = jnp.maximum(acc_ref[...] + bc_ref[...], 0.0)        # fc + ReLU (f32)
        # l2norm over dim=1 (no epsilon, same as torch: div by sqrt(sum x^2))
        feat = feat * jax.lax.rsqrt(jnp.sum(feat * feat, axis=1, keepdims=True))
        emb = jnp.dot(feat.astype(jnp.bfloat16), wf_ref[...],
                      preferred_element_type=jnp.float32) + bf_ref[...]
        if not no_imgnorm:
            emb = emb * jax.lax.rsqrt(jnp.sum(emb * emb, axis=1, keepdims=True))
        if use_abs:
            emb = jnp.abs(emb)
        out_ref[...] = emb


def encoder_head(x, wc, bc, wf, bf, *, tk=2048, use_abs=False, no_imgnorm=False):
    # x: (B, Dflat) bf16; wc: (Dflat, F) bf16; wf: (F, Epad) bf16; biases f32.
    B, Dflat = x.shape
    F = wc.shape[1]
    Epad = wf.shape[1]
    tk = min(tk, Dflat)
    assert Dflat % tk == 0 and tk % 128 == 0
    assert F % 128 == 0 and Epad % 128 == 0
    nk = Dflat // tk

    kernel = partial(_head_kernel, use_abs=use_abs, no_imgnorm=no_imgnorm)
    return pl.pallas_call(
        kernel,
        out_shape=jax.ShapeDtypeStruct((B, Epad), jnp.float32),
        grid_spec=pltpu.PrefetchScalarGridSpec(
            num_scalar_prefetch=0,
            grid=(nk,),
            in_specs=[
                pl.BlockSpec((B, tk), lambda k: (0, k)),
                pl.BlockSpec((tk, F), lambda k: (k, 0)),
                pl.BlockSpec((1, F), lambda k: (0, 0)),
                pl.BlockSpec((F, Epad), lambda k: (0, 0)),
                pl.BlockSpec((1, Epad), lambda k: (0, 0)),
            ],
            out_specs=pl.BlockSpec((B, Epad), lambda k: (0, 0)),
            scratch_shapes=[pltpu.VMEM((B, F), jnp.float32)],
        ),
        compiler_params=pltpu.CompilerParams(
            dimension_semantics=("arbitrary",)),   # reduction axis
    )(x, wc, bc, wf, bf)


# ----------------------------------------------------------------------------
# Full EncoderImageFull forward
# ----------------------------------------------------------------------------
def encoder_image_full(images, kparams, *, embed_size, use_abs=False,
                       no_imgnorm=False, tk=2048):
    B, C, H, W = images.shape
    KHW = kparams["conv_w_taps"].shape[0]
    pad = int(round(KHW ** 0.5)) // 2

    # Host glue: NCHW -> NHWC + 'same' spatial padding for the 3x3 conv.
    x_nhwc = jnp.transpose(images, (0, 2, 3, 1))
    xpad = jnp.pad(x_nhwc, ((0, 0), (pad, pad), (pad, pad), (0, 0)))

    fm = conv2d_relu(xpad, kparams["conv_w_taps"], kparams["conv_b"],
                     out_h=H, out_w=W)                       # (B*H*W, Cmid) bf16
    c_mid = kparams["conv_w_taps"].shape[-1]
    flat = fm.reshape(B, H * W * c_mid)                      # NHWC-flat, no transpose

    emb = encoder_head(flat, kparams["cls_w_t"], kparams["cls_b"],
                       kparams["fc_w_t"], kparams["fc_b"],
                       tk=tk, use_abs=use_abs, no_imgnorm=no_imgnorm)
    return emb[:, :embed_size]                               # strip lane padding


# ----------------------------------------------------------------------------
# Parameter init (PyTorch layouts) + one-time host-side conversion to the
# kernel layouts/dtypes.
# ----------------------------------------------------------------------------
def init_params(key, *, c_in=3, c_mid=128, h=16, w=16, feat_dim=256,
                embed_size=32):
    k = jax.random.split(key, 3)
    # Stand-in "pretrained" conv + penultimate classifier fc (deterministic).
    conv_w = 0.1 * jax.random.normal(k[0], (c_mid, c_in, 3, 3), jnp.float32)
    conv_b = jnp.zeros((c_mid,), jnp.float32)
    d_flat = h * w * c_mid                      # NHWC-flat order (h, w, c)
    cls_w = 0.02 * jax.random.normal(k[1], (feat_dim, d_flat), jnp.float32)
    cls_b = jnp.zeros((feat_dim,), jnp.float32)
    # fc: Xavier-uniform exactly like EncoderImageFull.init_weights()
    r = jnp.sqrt(6.0) / jnp.sqrt(feat_dim + embed_size)
    fc_w = jax.random.uniform(k[2], (embed_size, feat_dim), jnp.float32,
                              minval=-r, maxval=r)
    fc_b = jnp.zeros((embed_size,), jnp.float32)
    return dict(conv_w=conv_w, conv_b=conv_b, cls_w=cls_w, cls_b=cls_b,
                fc_w=fc_w, fc_b=fc_b)


def prepare_kernel_params(params):
    """One-time layout/dtype conversion (host); forward passes reuse these."""
    conv_w = params["conv_w"]                                 # (O, I, KH, KW)
    Cout, Cin, KH, KW = conv_w.shape
    # tap-major (KH*KW, Cin, Cout) bf16 so w_taps[t] pairs with the t-th shifted tap
    conv_w_taps = jnp.transpose(conv_w, (2, 3, 1, 0)).reshape(
        KH * KW, Cin, Cout).astype(jnp.bfloat16)
    conv_b = params["conv_b"].reshape(1, Cout).astype(jnp.float32)

    # classifier fc: (F, Dflat) torch -> (Dflat, F) bf16; Dflat already indexed
    # in NHWC-flat (h, w, c) order, matching the conv kernel's flat output.
    cls_w_t = params["cls_w"].T.astype(jnp.bfloat16)
    F = params["cls_w"].shape[0]
    cls_b = params["cls_b"].reshape(1, F).astype(jnp.float32)

    # embedding fc: pad output dim to a multiple of 128 with zero columns so
    # the kernel's stores are lane-dense; padded outputs are exact zeros and
    # do not change the l2norm.
    E = params["fc_w"].shape[0]
    Epad = max(128, ((E + 127) // 128) * 128)
    fc_w_t = jnp.pad(params["fc_w"].T, ((0, 0), (0, Epad - E))).astype(jnp.bfloat16)
    fc_b = jnp.pad(params["fc_b"], (0, Epad - E)).reshape(1, Epad).astype(jnp.float32)

    return dict(conv_w_taps=conv_w_taps, conv_b=conv_b,
                cls_w_t=cls_w_t, cls_b=cls_b, fc_w_t=fc_w_t, fc_b=fc_b)


if __name__ == "__main__":
    key = jax.random.PRNGKey(0)
    k_param, k_img = jax.random.split(key)

    B, C, H, W = 2, 3, 16, 16
    c_mid, feat_dim, embed_size = 128, 256, 32

    params = init_params(k_param, c_in=C, c_mid=c_mid, h=H, w=W,
                         feat_dim=feat_dim, embed_size=embed_size)
    kparams = prepare_kernel_params(params)
    images = jax.random.normal(k_img, (B, C, H, W), jnp.float32)

    fwd = jax.jit(partial(encoder_image_full, embed_size=embed_size,
                          use_abs=False, no_imgnorm=False))
    out = jax.block_until_ready(fwd(images, kparams))        # (B, embed_size)

    assert out.shape == (B, embed_size)
    # rows should be unit-L2-normalized (no_imgnorm=False)
    row_norms = jnp.sqrt(jnp.sum(out.astype(jnp.float32) ** 2, axis=1))
    assert jnp.allclose(row_norms, 1.0, atol=1e-4)
    print("KERNEL_OK")
</pallas_src>

<mosaic_0001>
module attributes {stable_mosaic.version = 11 : i64} {
  func.func @_conv_relu_kernel(%arg0: i32, %arg1: memref<1x18x18x3xf32, #tpu.memory_space<vmem>>, %arg2: memref<9x3x128xbf16, #tpu.memory_space<vmem>>, %arg3: memref<1x128xf32, #tpu.memory_space<vmem>>, %arg4: memref<256x128xbf16, #tpu.memory_space<vmem>>) attributes {dimension_semantics = [#tpu.dimension_semantics<parallel>], iteration_bounds = array<i64: 2>, scalar_prefetch = 0 : i64, scratch_operands = 0 : i64, tpu.core_type = #tpu.core_type<tc>, window_params = [{transform_indices = @transform_0, window_bounds = array<i64: 1, 18, 18, 3>}, {pipeline_mode = #tpu.pipeline_mode<synchronous>, transform_indices = @transform_1, window_bounds = array<i64: 9, 3, 128>}, {pipeline_mode = #tpu.pipeline_mode<synchronous>, transform_indices = @transform_2, window_bounds = array<i64: 1, 128>}, {transform_indices = @transform_3, window_bounds = array<i64: 256, 128>}]} {
    %cst = arith.constant 0.000000e+00 : f32
    %0 = vector.broadcast %cst : f32 to vector<256x128xf32>
    %c0 = arith.constant 0 : index
    %c0_0 = arith.constant 0 : index
    %c0_1 = arith.constant 0 : index
    %c0_2 = arith.constant 0 : index
    %1 = vector.load %arg1[%c0, %c0_0, %c0_1, %c0_2] : memref<1x18x18x3xf32, #tpu.memory_space<vmem>>, vector<1x16x16x3xf32>
    %2 = vector.shape_cast %1 : vector<1x16x16x3xf32> to vector<16x16x3xf32>
    %3 = vector.shape_cast %2 : vector<16x16x3xf32> to vector<256x3xf32>
    %4 = arith.truncf %3 : vector<256x3xf32> to vector<256x3xbf16>
    %c0_3 = arith.constant 0 : index
    %c0_4 = arith.constant 0 : index
    %c0_5 = arith.constant 0 : index
    %5 = vector.load %arg2[%c0_3, %c0_4, %c0_5] : memref<9x3x128xbf16, #tpu.memory_space<vmem>>, vector<1x3x128xbf16>
    %6 = vector.shape_cast %5 : vector<1x3x128xbf16> to vector<3x128xbf16>
    %cst_6 = arith.constant dense<0.000000e+00> : vector<256x128xf32>
    %7 = tpu.matmul %4, %6, %cst_6 {dimension_numbers = #tpu.dot_dimension_numbers<[1], [0], [0], [1], [0, 0, 1, 1], [], []>} : vector<256x3xbf16>, vector<3x128xbf16>, vector<256x128xf32> -> vector<256x128xf32>
    %8 = arith.addf %0, %7 : vector<256x128xf32>
    %c0_7 = arith.constant 0 : index
    %c0_8 = arith.constant 0 : index
    %c1 = arith.constant 1 : index
    %c0_9 = arith.constant 0 : index
    %9 = vector.load %arg1[%c0_7, %c0_8, %c1, %c0_9] : memref<1x18x18x3xf32, #tpu.memory_space<vmem>>, vector<1x16x16x3xf32>
    %10 = vector.shape_cast %9 : vector<1x16x16x3xf32> to vector<16x16x3xf32>
    %11 = vector.shape_cast %10 : vector<16x16x3xf32> to vector<256x3xf32>
    %12 = arith.truncf %11 : vector<256x3xf32> to vector<256x3xbf16>
    %c1_10 = arith.constant 1 : index
    %c0_11 = arith.constant 0 : index
    %c0_12 = arith.constant 0 : index
    %13 = vector.load %arg2[%c1_10, %c0_11, %c0_12] : memref<9x3x128xbf16, #tpu.memory_space<vmem>>, vector<1x3x128xbf16>
    %14 = vector.shape_cast %13 : vector<1x3x128xbf16> to vector<3x128xbf16>
    %cst_13 = arith.constant dense<0.000000e+00> : vector<256x128xf32>
    %15 = tpu.matmul %12, %14, %cst_13 {dimension_numbers = #tpu.dot_dimension_numbers<[1], [0], [0], [1], [0, 0, 1, 1], [], []>} : vector<256x3xbf16>, vector<3x128xbf16>, vector<256x128xf32> -> vector<256x128xf32>
    %16 = arith.addf %8, %15 : vector<256x128xf32>
    %c0_14 = arith.constant 0 : index
    %c0_15 = arith.constant 0 : index
    %c2 = arith.constant 2 : index
    %c0_16 = arith.constant 0 : index
    %17 = vector.load %arg1[%c0_14, %c0_15, %c2, %c0_16] : memref<1x18x18x3xf32, #tpu.memory_space<vmem>>, vector<1x16x16x3xf32>
    %18 = vector.shape_cast %17 : vector<1x16x16x3xf32> to vector<16x16x3xf32>
    %19 = vector.shape_cast %18 : vector<16x16x3xf32> to vector<256x3xf32>
    %20 = arith.truncf %19 : vector<256x3xf32> to vector<256x3xbf16>
    %c2_17 = arith.constant 2 : index
    %c0_18 = arith.constant 0 : index
    %c0_19 = arith.constant 0 : index
    %21 = vector.load %arg2[%c2_17, %c0_18, %c0_19] : memref<9x3x128xbf16, #tpu.memory_space<vmem>>, vector<1x3x128xbf16>
    %22 = vector.shape_cast %21 : vector<1x3x128xbf16> to vector<3x128xbf16>
    %cst_20 = arith.constant dense<0.000000e+00> : vector<256x128xf32>
    %23 = tpu.matmul %20, %22, %cst_20 {dimension_numbers = #tpu.dot_dimension_numbers<[1], [0], [0], [1], [0, 0, 1, 1], [], []>} : vector<256x3xbf16>, vector<3x128xbf16>, vector<256x128xf32> -> vector<256x128xf32>
    %24 = arith.addf %16, %23 : vector<256x128xf32>
    %c0_21 = arith.constant 0 : index
    %c1_22 = arith.constant 1 : index
    %c0_23 = arith.constant 0 : index
    %c0_24 = arith.constant 0 : index
    %25 = vector.load %arg1[%c0_21, %c1_22, %c0_23, %c0_24] : memref<1x18x18x3xf32, #tpu.memory_space<vmem>>, vector<1x16x16x3xf32>
    %26 = vector.shape_cast %25 : vector<1x16x16x3xf32> to vector<16x16x3xf32>
    %27 = vector.shape_cast %26 : vector<16x16x3xf32> to vector<256x3xf32>
    %28 = arith.truncf %27 : vector<256x3xf32> to vector<256x3xbf16>
    %c3 = arith.constant 3 : index
    %c0_25 = arith.constant 0 : index
    %c0_26 = arith.constant 0 : index
    %29 = vector.load %arg2[%c3, %c0_25, %c0_26] : memref<9x3x128xbf16, #tpu.memory_space<vmem>>, vector<1x3x128xbf16>
    %30 = vector.shape_cast %29 : vector<1x3x128xbf16> to vector<3x128xbf16>
    %cst_27 = arith.constant dense<0.000000e+00> : vector<256x128xf32>
    %31 = tpu.matmul %28, %30, %cst_27 {dimension_numbers = #tpu.dot_dimension_numbers<[1], [0], [0], [1], [0, 0, 1, 1], [], []>} : vector<256x3xbf16>, vector<3x128xbf16>, vector<256x128xf32> -> vector<256x128xf32>
    %32 = arith.addf %24, %31 : vector<256x128xf32>
    %c0_28 = arith.constant 0 : index
    %c1_29 = arith.constant 1 : index
    %c1_30 = arith.constant 1 : index
    %c0_31 = arith.constant 0 : index
    %33 = vector.load %arg1[%c0_28, %c1_29, %c1_30, %c0_31] : memref<1x18x18x3xf32, #tpu.memory_space<vmem>>, vector<1x16x16x3xf32>
    %34 = vector.shape_cast %33 : vector<1x16x16x3xf32> to vector<16x16x3xf32>
    %35 = vector.shape_cast %34 : vector<16x16x3xf32> to vector<256x3xf32>
    %36 = arith.truncf %35 : vector<256x3xf32> to vector<256x3xbf16>
    %c4 = arith.constant 4 : index
    %c0_32 = arith.constant 0 : index
    %c0_33 = arith.constant 0 : index
    %37 = vector.load %arg2[%c4, %c0_32, %c0_33] : memref<9x3x128xbf16, #tpu.memory_space<vmem>>, vector<1x3x128xbf16>
    %38 = vector.shape_cast %37 : vector<1x3x128xbf16> to vector<3x128xbf16>
    %cst_34 = arith.constant dense<0.000000e+00> : vector<256x128xf32>
    %39 = tpu.matmul %36, %38, %cst_34 {dimension_numbers = #tpu.dot_dimension_numbers<[1], [0], [0], [1], [0, 0, 1, 1], [], []>} : vector<256x3xbf16>, vector<3x128xbf16>, vector<256x128xf32> -> vector<256x128xf32>
    %40 = arith.addf %32, %39 : vector<256x128xf32>
    %c0_35 = arith.constant 0 : index
    %c1_36 = arith.constant 1 : index
    %c2_37 = arith.constant 2 : index
    %c0_38 = arith.constant 0 : index
    %41 = vector.load %arg1[%c0_35, %c1_36, %c2_37, %c0_38] : memref<1x18x18x3xf32, #tpu.memory_space<vmem>>, vector<1x16x16x3xf32>
    %42 = vector.shape_cast %41 : vector<1x16x16x3xf32> to vector<16x16x3xf32>
    %43 = vector.shape_cast %42 : vector<16x16x3xf32> to vector<256x3xf32>
    %44 = arith.truncf %43 : vector<256x3xf32> to vector<256x3xbf16>
    %c5 = arith.constant 5 : index
    %c0_39 = arith.constant 0 : index
    %c0_40 = arith.constant 0 : index
    %45 = vector.load %arg2[%c5, %c0_39, %c0_40] : memref<9x3x128xbf16, #tpu.memory_space<vmem>>, vector<1x3x128xbf16>
    %46 = vector.shape_cast %45 : vector<1x3x128xbf16> to vector<3x128xbf16>
    %cst_41 = arith.constant dense<0.000000e+00> : vector<256x128xf32>
    %47 = tpu.matmul %44, %46, %cst_41 {dimension_numbers = #tpu.dot_dimension_numbers<[1], [0], [0], [1], [0, 0, 1, 1], [], []>} : vector<256x3xbf16>, vector<3x128xbf16>, vector<256x128xf32> -> vector<256x128xf32>
    %48 = arith.addf %40, %47 : vector<256x128xf32>
    %c0_42 = arith.constant 0 : index
    %c2_43 = arith.constant 2 : index
    %c0_44 = arith.constant 0 : index
    %c0_45 = arith.constant 0 : index
    %49 = vector.load %arg1[%c0_42, %c2_43, %c0_44, %c0_45] : memref<1x18x18x3xf32, #tpu.memory_space<vmem>>, vector<1x16x16x3xf32>
    %50 = vector.shape_cast %49 : vector<1x16x16x3xf32> to vector<16x16x3xf32>
    %51 = vector.shape_cast %50 : vector<16x16x3xf32> to vector<256x3xf32>
    %52 = arith.truncf %51 : vector<256x3xf32> to vector<256x3xbf16>
    %c6 = arith.constant 6 : index
    %c0_46 = arith.constant 0 : index
    %c0_47 = arith.constant 0 : index
    %53 = vector.load %arg2[%c6, %c0_46, %c0_47] : memref<9x3x128xbf16, #tpu.memory_space<vmem>>, vector<1x3x128xbf16>
    %54 = vector.shape_cast %53 : vector<1x3x128xbf16> to vector<3x128xbf16>
    %cst_48 = arith.constant dense<0.000000e+00> : vector<256x128xf32>
    %55 = tpu.matmul %52, %54, %cst_48 {dimension_numbers = #tpu.dot_dimension_numbers<[1], [0], [0], [1], [0, 0, 1, 1], [], []>} : vector<256x3xbf16>, vector<3x128xbf16>, vector<256x128xf32> -> vector<256x128xf32>
    %56 = arith.addf %48, %55 : vector<256x128xf32>
    %c0_49 = arith.constant 0 : index
    %c2_50 = arith.constant 2 : index
    %c1_51 = arith.constant 1 : index
    %c0_52 = arith.constant 0 : index
    %57 = vector.load %arg1[%c0_49, %c2_50, %c1_51, %c0_52] : memref<1x18x18x3xf32, #tpu.memory_space<vmem>>, vector<1x16x16x3xf32>
    %58 = vector.shape_cast %57 : vector<1x16x16x3xf32> to vector<16x16x3xf32>
    %59 = vector.shape_cast %58 : vector<16x16x3xf32> to vector<256x3xf32>
    %60 = arith.truncf %59 : vector<256x3xf32> to vector<256x3xbf16>
    %c7 = arith.constant 7 : index
    %c0_53 = arith.constant 0 : index
    %c0_54 = arith.constant 0 : index
    %61 = vector.load %arg2[%c7, %c0_53, %c0_54] : memref<9x3x128xbf16, #tpu.memory_space<vmem>>, vector<1x3x128xbf16>
    %62 = vector.shape_cast %61 : vector<1x3x128xbf16> to vector<3x128xbf16>
    %cst_55 = arith.constant dense<0.000000e+00> : vector<256x128xf32>
    %63 = tpu.matmul %60, %62, %cst_55 {dimension_numbers = #tpu.dot_dimension_numbers<[1], [0], [0], [1], [0, 0, 1, 1], [], []>} : vector<256x3xbf16>, vector<3x128xbf16>, vector<256x128xf32> -> vector<256x128xf32>
    %64 = arith.addf %56, %63 : vector<256x128xf32>
    %c0_56 = arith.constant 0 : index
    %c2_57 = arith.constant 2 : index
    %c2_58 = arith.constant 2 : index
    %c0_59 = arith.constant 0 : index
    %65 = vector.load %arg1[%c0_56, %c2_57, %c2_58, %c0_59] : memref<1x18x18x3xf32, #tpu.memory_space<vmem>>, vector<1x16x16x3xf32>
    %66 = vector.shape_cast %65 : vector<1x16x16x3xf32> to vector<16x16x3xf32>
    %67 = vector.shape_cast %66 : vector<16x16x3xf32> to vector<256x3xf32>
    %68 = arith.truncf %67 : vector<256x3xf32> to vector<256x3xbf16>
    %c8 = arith.constant 8 : index
    %c0_60 = arith.constant 0 : index
    %c0_61 = arith.constant 0 : index
    %69 = vector.load %arg2[%c8, %c0_60, %c0_61] : memref<9x3x128xbf16, #tpu.memory_space<vmem>>, vector<1x3x128xbf16>
    %70 = vector.shape_cast %69 : vector<1x3x128xbf16> to vector<3x128xbf16>
    %cst_62 = arith.constant dense<0.000000e+00> : vector<256x128xf32>
    %71 = tpu.matmul %68, %70, %cst_62 {dimension_numbers = #tpu.dot_dimension_numbers<[1], [0], [0], [1], [0, 0, 1, 1], [], []>} : vector<256x3xbf16>, vector<3x128xbf16>, vector<256x128xf32> -> vector<256x128xf32>
    %72 = arith.addf %64, %71 : vector<256x128xf32>
    %c0_63 = arith.constant 0 : index
    %c0_64 = arith.constant 0 : index
    %73 = vector.load %arg3[%c0_63, %c0_64] : memref<1x128xf32, #tpu.memory_space<vmem>>, vector<1x128xf32>
    %74 = vector.broadcast %73 : vector<1x128xf32> to vector<256x128xf32>
    %75 = arith.addf %72, %74 : vector<256x128xf32>
    %cst_65 = arith.constant 0.000000e+00 : f32
    %76 = vector.broadcast %cst_65 : f32 to vector<256x128xf32>
    %77 = arith.maximumf %75, %76 : vector<256x128xf32>
    %78 = arith.truncf %77 : vector<256x128xf32> to vector<256x128xbf16>
    %c0_66 = arith.constant 0 : index
    %c0_67 = arith.constant 0 : index
    %79 = vector.load %arg4[%c0_66, %c0_67] : memref<256x128xbf16, #tpu.memory_space<vmem>>, vector<256x128xbf16>
    tpu.vector_store %arg4[%c0_66, %c0_67], %78 {strides = array<i32>} : memref<256x128xbf16, #tpu.memory_space<vmem>>, vector<256x128xbf16>,
    return
  }
  func.func @transform_0(%arg0: i32) -> (i32, i32, i32, i32) {
    %c0_i32 = arith.constant 0 : i32
    %c0_i32_0 = arith.constant 0 : i32
    %c0_i32_1 = arith.constant 0 : i32
    %c0_i32_2 = arith.constant 0 : i32
    return %arg0, %c0_i32, %c0_i32_0, %c0_i32_1 : i32, i32, i32, i32
  }
  func.func @transform_1(%arg0: i32) -> (i32, i32, i32) {
    %c0_i32 = arith.constant 0 : i32
    %c0_i32_0 = arith.constant 0 : i32
    %c0_i32_1 = arith.constant 0 : i32
    %c0_i32_2 = arith.constant 0 : i32
    return %c0_i32, %c0_i32_0, %c0_i32_1 : i32, i32, i32
  }
  func.func @transform_2(%arg0: i32) -> (i32, i32) {
    %c0_i32 = arith.constant 0 : i32
    %c0_i32_0 = arith.constant 0 : i32
    %c0_i32_1 = arith.constant 0 : i32
    return %c0_i32, %c0_i32_0 : i32, i32
  }
  func.func @transform_3(%arg0: i32) -> (i32, i32) {
    %c0_i32 = arith.constant 0 : i32
    %c0_i32_0 = arith.constant 0 : i32
    return %arg0, %c0_i32 : i32, i32
  }
}

module attributes {stable_mosaic.version = 11 : i64} {
  func.func @_head_kernel(%arg0: i32, %arg1: memref<2x2048xbf16, #tpu.memory_space<vmem>>, %arg2: memref<2048x256xbf16, #tpu.memory_space<vmem>>, %arg3: memref<1x256xf32, #tpu.memory_space<vmem>>, %arg4: memref<256x128xbf16, #tpu.memory_space<vmem>>, %arg5: memref<1x128xf32, #tpu.memory_space<vmem>>, %arg6: memref<2x128xf32, #tpu.memory_space<vmem>>, %arg7: memref<2x256xf32, #tpu.memory_space<vmem>>) attributes {dimension_semantics = [#tpu.dimension_semantics<arbitrary>], iteration_bounds = array<i64: 16>, scalar_prefetch = 0 : i64, scratch_operands = 1 : i64, tpu.core_type = #tpu.core_type<tc>, window_params = [{transform_indices = @transform_0, window_bounds = array<i64: 2, 2048>}, {transform_indices = @transform_1, window_bounds = array<i64: 2048, 256>}, {pipeline_mode = #tpu.pipeline_mode<synchronous>, transform_indices = @transform_2, window_bounds = array<i64: 1, 256>}, {pipeline_mode = #tpu.pipeline_mode<synchronous>, transform_indices = @transform_3, window_bounds = array<i64: 256, 128>}, {pipeline_mode = #tpu.pipeline_mode<synchronous>, transform_indices = @transform_4, window_bounds = array<i64: 1, 128>}, {pipeline_mode = #tpu.pipeline_mode<synchronous>, transform_indices = @transform_5, window_bounds = array<i64: 2, 128>}]} {
    %c0_i32 = arith.constant 0 : i32
    %0 = arith.cmpi eq, %arg0, %c0_i32 : i32
    %1 = arith.extui %0 : i1 to i32
    %c0_i32_0 = arith.constant 0 : i32
    %2 = arith.cmpi ne, %1, %c0_i32_0 : i32
    scf.if %2 {
      %cst_9 = arith.constant 0.000000e+00 : f32
      %12 = vector.broadcast %cst_9 : f32 to vector<2x256xf32>
      %c0_10 = arith.constant 0 : index
      %c0_11 = arith.constant 0 : index
      %13 = vector.load %arg7[%c0_10, %c0_11] : memref<2x256xf32, #tpu.memory_space<vmem>>, vector<2x256xf32>
      tpu.vector_store %arg7[%c0_10, %c0_11], %12 {strides = array<i32>} : memref<2x256xf32, #tpu.memory_space<vmem>>, vector<2x256xf32>,
    } else {
    }
    %c0 = arith.constant 0 : index
    %c0_1 = arith.constant 0 : index
    %3 = vector.load %arg7[%c0, %c0_1] : memref<2x256xf32, #tpu.memory_space<vmem>>, vector<2x256xf32>
    %c0_2 = arith.constant 0 : index
    %c0_3 = arith.constant 0 : index
    %4 = vector.load %arg1[%c0_2, %c0_3] : memref<2x2048xbf16, #tpu.memory_space<vmem>>, vector<2x2048xbf16>
    %c0_4 = arith.constant 0 : index
    %c0_5 = arith.constant 0 : index
    %5 = vector.load %arg2[%c0_4, %c0_5] : memref<2048x256xbf16, #tpu.memory_space<vmem>>, vector<2048x256xbf16>
    %cst = arith.constant dense<0.000000e+00> : vector<2x256xf32>
    %6 = tpu.matmul %4, %5, %cst {dimension_numbers = #tpu.dot_dimension_numbers<[1], [0], [0], [1], [0, 0, 1, 1], [], []>} : vector<2x2048xbf16>, vector<2048x256xbf16>, vector<2x256xf32> -> vector<2x256xf32>
    %7 = arith.addf %3, %6 : vector<2x256xf32>
    %c0_6 = arith.constant 0 : index
    %c0_7 = arith.constant 0 : index
    %8 = vector.load %arg7[%c0_6, %c0_7] : memref<2x256xf32, #tpu.memory_space<vmem>>, vector<2x256xf32>
    tpu.vector_store %arg7[%c0_6, %c0_7], %7 {strides = array<i32>} : memref<2x256xf32, #tpu.memory_space<vmem>>, vector<2x256xf32>,
    %c15_i32 = arith.constant 15 : i32
    %9 = arith.cmpi eq, %arg0, %c15_i32 : i32
    %10 = arith.extui %9 : i1 to i32
    %c0_i32_8 = arith.constant 0 : i32
    %11 = arith.cmpi ne, %10, %c0_i32_8 : i32
    scf.if %11 {
      %c0_9 = arith.constant 0 : index
      %c0_10 = arith.constant 0 : index
      %12 = vector.load %arg7[%c0_9, %c0_10] : memref<2x256xf32, #tpu.memory_space<vmem>>, vector<2x256xf32>
      %c0_11 = arith.constant 0 : index
      %c0_12 = arith.constant 0 : index
      %13 = vector.load %arg3[%c0_11, %c0_12] : memref<1x256xf32, #tpu.memory_space<vmem>>, vector<1x256xf32>
      %14 = vector.broadcast %13 : vector<1x256xf32> to vector<2x256xf32>
      %15 = arith.addf %12, %14 : vector<2x256xf32>
      %cst_13 = arith.constant 0.000000e+00 : f32
      %16 = vector.broadcast %cst_13 : f32 to vector<2x256xf32>
      %17 = arith.maximumf %15, %16 : vector<2x256xf32>
      %18 = arith.mulf %17, %17 : vector<2x256xf32>
      %cst_14 = arith.constant dense<0.000000e+00> : vector<2xf32>
      %19 = vector.multi_reduction <add>, %18, %cst_14 [1] : vector<2x256xf32> to vector<2xf32>
      %20 = vector.shape_cast %19 : vector<2xf32> to vector<2x1xf32>
      %21 = math.rsqrt %20 : vector<2x1xf32>
      %22 = vector.broadcast %21 : vector<2x1xf32> to vector<2x256xf32>
      %23 = arith.mulf %17, %22 : vector<2x256xf32>
      %24 = arith.truncf %23 : vector<2x256xf32> to vector<2x256xbf16>
      %c0_15 = arith.constant 0 : index
      %c0_16 = arith.constant 0 : index
      %25 = vector.load %arg4[%c0_15, %c0_16] : memref<256x128xbf16, #tpu.memory_space<vmem>>, vector<256x128xbf16>
      %cst_17 = arith.constant dense<0.000000e+00> : vector<2x128xf32>
      %26 = tpu.matmul %24, %25, %cst_17 {dimension_numbers = #tpu.dot_dimension_numbers<[1], [0], [0], [1], [0, 0, 1, 1], [], []>} : vector<2x256xbf16>, vector<256x128xbf16>, vector<2x128xf32> -> vector<2x128xf32>
      %c0_18 = arith.constant 0 : index
      %c0_19 = arith.constant 0 : index
      %27 = vector.load %arg5[%c0_18, %c0_19] : memref<1x128xf32, #tpu.memory_space<vmem>>, vector<1x128xf32>
      %28 = vector.broadcast %27 : vector<1x128xf32> to vector<2x128xf32>
      %29 = arith.addf %26, %28 : vector<2x128xf32>
      %30 = arith.mulf %29, %29 : vector<2x128xf32>
      %cst_20 = arith.constant dense<0.000000e+00> : vector<2xf32>
      %31 = vector.multi_reduction <add>, %30, %cst_20 [1] : vector<2x128xf32> to vector<2xf32>
      %32 = vector.shape_cast %31 : vector<2xf32> to vector<2x1xf32>
      %33 = math.rsqrt %32 : vector<2x1xf32>
      %34 = vector.broadcast %33 : vector<2x1xf32> to vector<2x128xf32>
      %35 = arith.mulf %29, %34 : vector<2x128xf32>
      %c0_21 = arith.constant 0 : index
      %c0_22 = arith.constant 0 : index
      %36 = vector.load %arg6[%c0_21, %c0_22] : memref<2x128xf32, #tpu.memory_space<vmem>>, vector<2x128xf32>
      tpu.vector_store %arg6[%c0_21, %c0_22], %35 {strides = array<i32>} : memref<2x128xf32, #tpu.memory_space<vmem>>, vector<2x128xf32>,
    } else {
    }
    return
  }
  func.func @transform_0(%arg0: i32) -> (i32, i32) {
    %c0_i32 = arith.constant 0 : i32
    %c0_i32_0 = arith.constant 0 : i32
    return %c0_i32, %arg0 : i32, i32
  }
  func.func @transform_1(%arg0: i32) -> (i32, i32) {
    %c0_i32 = arith.constant 0 : i32
    %c0_i32_0 = arith.constant 0 : i32
    return %arg0, %c0_i32 : i32, i32
  }
  func.func @transform_2(%arg0: i32) -> (i32, i32) {
    %c0_i32 = arith.constant 0 : i32
    %c0_i32_0 = arith.constant 0 : i32
    %c0_i32_1 = arith.constant 0 : i32
    return %c0_i32, %c0_i32_0 : i32, i32
  }
  func.func @transform_3(%arg0: i32) -> (i32, i32) {
    %c0_i32 = arith.constant 0 : i32
    %c0_i32_0 = arith.constant 0 : i32
    %c0_i32_1 = arith.constant 0 : i32
    return %c0_i32, %c0_i32_0 : i32, i32
  }
  func.func @transform_4(%arg0: i32) -> (i32, i32) {
    %c0_i32 = arith.constant 0 : i32
    %c0_i32_0 = arith.constant 0 : i32
    %c0_i32_1 = arith.constant 0 : i32
    return %c0_i32, %c0_i32_0 : i32, i32
  }
  func.func @transform_5(%arg0: i32) -> (i32, i32) {
    %c0_i32 = arith.constant 0 : i32
    %c0_i32_0 = arith.constant 0 : i32
    %c0_i32_1 = arith.constant 0 : i32
    return %c0_i32, %c0_i32_0 : i32, i32
  }
}

</mosaic_0001>

<bundles_post_ra>
// kernel: encoder_image_full.2
= control target key start
LH: loop header
LB: loop body
LE: loop exit
PB: predicated region body
PF: predicated region fallthrough
CT: control target
= control target key end

     0   :  { %8 = vsyncpa [#allocation3], 0  ;;  %s3725_s0 = inlined_call_operand.vmem [shape: f32[2,18,18,3], index: 0, kind: input, shape index: {}]   ;;  %s3726_s1 = inlined_call_operand.hbm [shape: bf16[9,3,128], index: 1, kind: input, shape index: {}]   ;;  %s3727_s2 = inlined_call_operand.hbm [shape: f32[1,128], index: 2, kind: input, shape index: {}]   ;;  %s3728_s3 = inlined_call_operand.vmem [shape: bf16[512,128], index: 3, kind: output, shape index: {}]  }
   0x1   :  { %9 = vsyncpa [#allocation5], 0  ;;  %s2938_s12 = smov 0  }
   0x2 LB: > { %s125_s15 = sshll.u32 %s3726_s1, 4  ;;  %s2947_s16 = sadd.s32 4294967295, %s2911_s12   ;;  %s2911_s12 = sphi %s2938_s12, %s15_s12   ;;  %s126_s15 = int_to_ptr.hbm [resolvable:$true] %s125_s15 }
   0x3   : > { %p2357_p0 = scmp.ge.s32.totalorder %s2911_s12, 1  ;;  %p114_p1 = scmp.lt.s32.totalorder %s2911_s12, 3 }
   0x4   : > { %p2819_p2 = scmp.eq.s32.totalorder %s2947_s16, 0  ;;  %s2913_s18 = smov [#allocation2]  }
   0x5   : > { %p2952_p3 = pnand %p2357_p0, %p114_p1  ;;  %s127_s19 = sshll.u32 %s2913_s18, 4  ;;  %s128_s19 = int_to_ptr.vmem [resolvable:$true] %s127_s19 }
   0x6   : > { %s140_s22 = sshll.u32 %s3727_s2, 4  ;;  %s2914_s23 = smov [#allocation4]   ;;  %s141_s22 = int_to_ptr.hbm [resolvable:$true] %s140_s22 }
   0x7   : > { %p2812_p4 = pneg %p2952_p3  ;;  %s142_s24 = sshll.u32 %s2914_s23, 4  ;;  %s143_s24 = int_to_ptr.vmem [resolvable:$true] %s142_s24 }
   0x8   : > { %s2915_s25 = smov 32   ;;  %s2916_s26 = smov 2  }
   0x9   : > { %p2813_p5 = pnand %p2819_p2, %p2812_p4  ;;  %163 = sbr.rel (%p2952_p3) target bundleno = 741 (0x2e5), region = 32 }
   0xb   : > { %2815 = dma.hbm_to_vmem [thread:$0]  (!%p2813_p5), %s126_s15, 288, %s128_s19, [#allocation3], %s2915_s25, %s2915_s25, %s2916_s26  }
   0xc   : > { %2818 = dma.hbm_to_vmem [thread:$0]  (!%p2813_p5), %s141_s22, 16, %s143_s24, [#allocation5]  }
   0xe   : > { %2902 = dma.done.wait (%p2819_p2), [#allocation3], 288  }
   0xf   : > { %2904 = vsyncadd (%p2819_p2), [#allocation3], 4294967008 }
  0x10   : > { %2906 = dma.done.wait (%p2819_p2), [#allocation5], 16  }
  0x11   : > { %2908 = vsyncadd (%p2819_p2), [#allocation5], 4294967280  ;;  %vm353_vm0 = vcmask 1040384   ;;  %p193_p6 = scmp.lt.s32.totalorder %s2947_s16, 1  ;;  %vm354_vm1 = vcmask 1041408   ;;  %v2917_v0 = vmov 65535  }
  0x12   : > { %v355_v1 = vsel %vm353_vm0, 4294967295, %v2917_v0  ;;  %v303_v3 = vld [vmem:[#allocation2 + $0x2] sm:$0x3]  ;;  %v638_v13 = vld [vmem:[#allocation2 + $0x4] sm:$0x3]  ;;  %vm304_vm2 = vcmask 23552  }
  0x13   : > { %s194_s27 = scalar_select %p193_p6, %s2947_s16, 1  ;;  %v2975_v2 = vsel %vm354_vm1, %v355_v1, 0  ;;  %v861_v18 = vld [vmem:[#allocation2 + $0x6] sm:$0x3]  ;;  %v253_v19 = vld [vmem:[#allocation2] sm:$0x3] }
  0x14   : > { %v358_v6 = vand.u32 %v2975_v2, %v303_v3  ;;  %v688_v16 = vand.u32 %v638_v13, %v2975_v2  ;;  %v911_v21 = vand.u32 %v861_v18, %v2975_v2  ;;  %v498_v22 = vand.u32 %v2975_v2, %v253_v19  ;;  %v1083_v23 = vld [vmem:[#allocation2 + $0x8] sm:$0x3]  ;;  %v1528_v49 = vld [vmem:[#allocation2 + $0xc] sm:$0x3]  ;;  %v1750_v50 = vld [vmem:[#allocation2 + $0xe] sm:$0x3] }
  0x15   : > { %s2803_s28 = smul.u32 432, %s194_s27  ;;  %v1133_v24 = vand.u32 %v1083_v23, %v2975_v2  ;;  %v1305_v51 = vld [vmem:[#allocation2 + $0xa] sm:$0x3]  ;;  %v1578_v52 = vand.u32 %v1528_v49, %v2975_v2  ;;  %v1800_v53 = vand.u32 %v1750_v50, %v2975_v2  ;;  %v1972_v55 = vld [vmem:[#allocation2 + $0x10] sm:$0x3]  ;;  %s2365_s5 = sshll.u32 %s2947_s16, 5 }
  0x16   : > { %2800 = vmatpush.bf16.msra.mxu1 %v358_v6  ;;  %2801 = vmatpush.bf16.msra.mxu2 %v358_v6  ;;  %v1355_v54 = vand.u32 %v1305_v51, %v2975_v2  ;;  %v2022_v56 = vand.u32 %v1972_v55, %v2975_v2  ;;  %p199_p7 = scmp.lt.s32.totalorder %s2365_s5, 63 }
  0x17   : > { %s2980_s4 = scalar_lea.vmem %s3725_s0, %s2803_s28  ;;  %2802 = vmatpush.bf16.msra.mxu3 %v358_v6  ;;  %367 = vmatpush.bf16.msra.mxu0 %v358_v6 }
  0x18   : > { %v262_v4 = vld [vmem:[%s2980_s4 + $0x61] sm:$0xff]  ;;  %v263_v5 = vld [vmem:[%s2980_s4 + $0x69] sm:$0xff]  ;;  %v264_v25 = vld [vmem:[%s2980_s4 + $0x79] sm:$0xff]  ;;  %s3773_s5 = smov (!%p199_p7, %s2365_s5), 63 }
  0x19   : > { %v270_v7 = vld [vmem:[%s2980_s4 + $0xc1] sm:$0xff]  ;;  %v271_v8 = vld [vmem:[%s2980_s4 + $0xc9] sm:$0xff]  ;;  %v2988_v10 = vpack.c.bf16 %v263_v5, %v262_v4  ;;  %v272_v27 = vld [vmem:[%s2980_s4 + $0xd9] sm:$0xff]  ;;  %s2366_s6 = sshll.u32 %s3773_s5, 2 }
  0x1a   : > { %v278_v9 = vld [vmem:[%s2980_s4 + $0x121] sm:$0xff]  ;;  %v2990_v11 = vpack.c.bf16 %v271_v8, %v270_v7  ;;  %v279_v12 = vld [vmem:[%s2980_s4 + $0x129] sm:$0xff]  ;;  %697 = vmatpush.bf16.msrb.mxu2 %v688_v16  ;;  %507 = vmatpush.bf16.msrb.mxu1 %v498_v22  ;;  %v280_v29 = vld [vmem:[%s2980_s4 + $0x139] sm:$0xff]  ;;  %s3587_s9 = scalar_lea.vmem %s3728_s3, %s2366_s6 }
  0x1b   : > { %v254_v14 = vld [vmem:[%s2980_s4 + $0x1] sm:$0xff]  ;;  %v2994_v15 = vpack.c.bf16 %v279_v12, %v278_v9  ;;  %v255_v17 = vld [vmem:[%s2980_s4 + $0x9] sm:$0xff]  ;;  %2371 = vmatmul.msk.bf16.vlgmr.msra.gmra.mxu1 %vm304_vm2, %v2988_v10  ;;  %920 = vmatpush.bf16.msrb.mxu3 %v911_v21  ;;  %v256_v31 = vld [vmem:[%s2980_s4 + $0x19] sm:$0xff] }
  0x1c   : > { %v286_v20 = vpack.c.bf16 %v255_v17, %v254_v14  ;;  %2375 = vmatmul.msk.bf16.vlgmr.msra.gmra.mxu2 %vm304_vm2, %v2990_v11  ;;  %1142 = vmatpush.bf16.msrb.mxu0 %v1133_v24  ;;  %v265_v26 = vld [vmem:[%s2980_s4 + $0x81] sm:$0xff]  ;;  %v266_v37 = vld [vmem:[%s2980_s4 + $0x91] sm:$0xff]  ;;  %v267_v38 = vld [vmem:[%s2980_s4 + $0x99] sm:$0xff] }
  0x1d   : > { %2379 = vmatmul.msk.bf16.vlgmr.msra.gmra.mxu3 %vm304_vm2, %v2994_v15  ;;  %v273_v28 = vld [vmem:[%s2980_s4 + $0xe1] sm:$0xff]  ;;  %v3016_v33 = vpack.c.bf16 %v265_v26, %v264_v25  ;;  %v274_v39 = vld [vmem:[%s2980_s4 + $0xf1] sm:$0xff]  ;;  %v275_v40 = vld [vmem:[%s2980_s4 + $0xf9] sm:$0xff]  ;;  %v3037_v45 = vpack.c.bf16 %v267_v38, %v266_v37 }
  0x1e   : > { %2367 = vmatmul.msk.bf16.vlgmr.msra.gmra.mxu0 %vm304_vm2, %v286_v20  ;;  %v281_v30 = vld [vmem:[%s2980_s4 + $0x141] sm:$0xff]  ;;  %v3018_v34 = vpack.c.bf16 %v273_v28, %v272_v27  ;;  %v282_v41 = vld [vmem:[%s2980_s4 + $0x151] sm:$0xff]  ;;  %v283_v42 = vld [vmem:[%s2980_s4 + $0x159] sm:$0xff]  ;;  %v3039_v46 = vpack.c.bf16 %v275_v40, %v274_v39  ;;  %1587 = vmatpush.bf16.msra.mxu2 %v1578_v52 }
  0x1f   : > { %v257_v32 = vld [vmem:[%s2980_s4 + $0x21] sm:$0xff]  ;;  %v3020_v35 = vpack.c.bf16 %v281_v30, %v280_v29  ;;  %v258_v43 = vld [vmem:[%s2980_s4 + $0x31] sm:$0xff]  ;;  %v259_v44 = vld [vmem:[%s2980_s4 + $0x39] sm:$0xff]  ;;  %v3041_v47 = vpack.c.bf16 %v283_v42, %v282_v41  ;;  %1809 = vmatpush.bf16.msra.mxu3 %v1800_v53  ;;  %1364 = vmatpush.bf16.msra.mxu1 %v1355_v54 }
  0x20   : > { %v287_v36 = vpack.c.bf16 %v257_v32, %v256_v31  ;;  %v3043_v48 = vpack.c.bf16 %v259_v44, %v258_v43  ;;  %2031 = vmatpush.bf16.msra.mxu0 %v2022_v56  ;;  %v268_v57 = vld [vmem:[%s2980_s4 + $0xa9] sm:$0xff]  ;;  %v269_v58 = vld [vmem:[%s2980_s4 + $0xb1] sm:$0xff]  ;;  %v205_v5 = vld [vmem:[%s2980_s4] sm:$0xff] }
  0x21   : > { %v276_v59 = vld [vmem:[%s2980_s4 + $0x109] sm:$0xff]  ;;  %v277_v60 = vld [vmem:[%s2980_s4 + $0x111] sm:$0xff]  ;;  %v3065_v1 = vpack.c.bf16 %v269_v58, %v268_v57  ;;  %v2416_v12 = vld [vmem:[%s2980_s4 + $0x20] sm:$0xff] }
  0x22   : > { %v284_v61 = vld [vmem:[%s2980_s4 + $0x169] sm:$0xff]  ;;  %v285_v62 = vld [vmem:[%s2980_s4 + $0x171] sm:$0xff]  ;;  %v3067_v2 = vpack.c.bf16 %v277_v60, %v276_v59  ;;  %v591_v17 = vld [vmem:[%s2980_s4 + $0x1a] sm:$0xff] }
  0x23   : > { %v260_v63 = vld [vmem:[%s2980_s4 + $0x49] sm:$0xff]  ;;  %v261_v0 = vld [vmem:[%s2980_s4 + $0x51] sm:$0xff]  ;;  %v3069_v3 = vpack.c.bf16 %v285_v62, %v284_v61  ;;  %v594_v24 = vld [vmem:[%s2980_s4 + $0x3a] sm:$0xff] }
  0x24   : > { %v3071_v4 = vpack.c.bf16 %v261_v0, %v260_v63  ;;  %v206_v6 = vld [vmem:[%s2980_s4 + $0x8] sm:$0xff]  ;;  %v2415_v9 = vld [vmem:[%s2980_s4 + $0x18] sm:$0xff]  ;;  %v2417_v19 = vld [vmem:[%s2980_s4 + $0x30] sm:$0xff] }
  0x25   : > { %v589_v7 = vld [vmem:[%s2980_s4 + $0x2] sm:$0xff]  ;;  %v590_v8 = vld [vmem:[%s2980_s4 + $0xa] sm:$0xff]  ;;  %v237_v13 = vpack.c.bf16 %v206_v6, %v205_v5  ;;  %v844_v16 = vpack.c.bf16 %v2416_v12, %v2415_v9  ;;  %v2418_v20 = vld [vmem:[%s2980_s4 + $0x38] sm:$0xff] }
  0x26   : > { %v621_v14 = vpack.c.bf16 %v590_v8, %v589_v7  ;;  %v592_v18 = vld [vmem:[%s2980_s4 + $0x22] sm:$0xff]  ;;  %v3097_v22 = vpack.c.bf16 %v2418_v20, %v2417_v19  ;;  %v593_v23 = vld [vmem:[%s2980_s4 + $0x32] sm:$0xff]  ;;  %v595_v29 = vld [vmem:[%s2980_s4 + $0x4a] sm:$0xff] }
  0x27   : > { %v3095_v21 = vpack.c.bf16 %v592_v18, %v591_v17  ;;  %v2419_v25 = vld [vmem:[%s2980_s4 + $0x48] sm:$0xff]  ;;  %v2420_v26 = vld [vmem:[%s2980_s4 + $0x50] sm:$0xff]  ;;  %v3110_v27 = vpack.c.bf16 %v594_v24, %v593_v23  ;;  %v2421_v31 = vld [vmem:[%s2980_s4 + $0x60] sm:$0xff] }
  0x28   : > { %v3112_v28 = vpack.c.bf16 %v2420_v26, %v2419_v25  ;;  %v596_v30 = vld [vmem:[%s2980_s4 + $0x52] sm:$0xff]  ;;  %v2422_v32 = vld [vmem:[%s2980_s4 + $0x68] sm:$0xff]  ;;  %v2424_v41 = vld [vmem:[%s2980_s4 + $0x80] sm:$0xff] }
  0x29   : > { %v3128_v37 = vpack.c.bf16 %v2422_v32, %v2421_v31  ;;  %v597_v38 = vld [vmem:[%s2980_s4 + $0x62] sm:$0xff]  ;;  %v598_v39 = vld [vmem:[%s2980_s4 + $0x6a] sm:$0xff]  ;;  %v2423_v40 = vld [vmem:[%s2980_s4 + $0x78] sm:$0xff] }
  0x2a   : > { %v3142_v42 = vpack.c.bf16 %v598_v39, %v597_v38  ;;  %v3146_v44 = vpack.c.bf16 %v2424_v41, %v2423_v40  ;;  %v599_v53 = vld [vmem:[%s2980_s4 + $0x7a] sm:$0xff]  ;;  %v600_v54 = vld [vmem:[%s2980_s4 + $0x82] sm:$0xff]  ;;  %v2425_v55 = vld [vmem:[%s2980_s4 + $0x90] sm:$0xff] }
  0x2b   : > { %2372 = vmatmul.msk.bf16.gmra.mxu1 %vm304_vm2, %v3016_v33  ;;  %v2426_v56 = vld [vmem:[%s2980_s4 + $0x98] sm:$0xff]  ;;  %v2427_v8 = vld [vmem:[%s2980_s4 + $0xa8] sm:$0xff]  ;;  %v2428_v9 = vld [vmem:[%s2980_s4 + $0xb0] sm:$0xff] }
  0x2c   : > { %2376 = vmatmul.msk.bf16.gmra.mxu2 %vm304_vm2, %v3018_v34  ;;  %v3178_v60 = vpack.c.bf16 %v2426_v56, %v2425_v55  ;;  %v601_v6 = vld [vmem:[%s2980_s4 + $0x92] sm:$0xff]  ;;  %v602_v7 = vld [vmem:[%s2980_s4 + $0x9a] sm:$0xff]  ;;  %v603_v24 = vld [vmem:[%s2980_s4 + $0xaa] sm:$0xff] }
  0x2d   : > { %2380 = vmatmul.msk.bf16.gmra.mxu3 %vm304_vm2, %v3020_v35  ;;  %v604_v25 = vld [vmem:[%s2980_s4 + $0xb2] sm:$0xff]  ;;  %v2429_v26 = vld [vmem:[%s2980_s4 + $0xc0] sm:$0xff]  ;;  %v606_v56 = vld [vmem:[%s2980_s4 + $0xca] sm:$0xff] }
  0x2e   : > { %2368 = vmatmul.msk.bf16.gmra.mxu0 %vm304_vm2, %v287_v36  ;;  %v605_v55 = vld [vmem:[%s2980_s4 + $0xc2] sm:$0xff] }
  0x3b   : > { %2373 = vmatmul.msk.bf16.gmra.mxu1 %vm304_vm2, %v3037_v45 }
  0x3c   : > { %2377 = vmatmul.msk.bf16.gmra.mxu2 %vm304_vm2, %v3039_v46 }
  0x3d   : > { %2381 = vmatmul.msk.bf16.gmra.mxu3 %vm304_vm2, %v3041_v47 }
  0x3e   : > { %2369 = vmatmul.msk.bf16.gmra.mxu0 %vm304_vm2, %v3043_v48 }
  0x4b   : > { %2374 = vmatmul.msk.bf16.gmra.mxu1 %vm304_vm2, %v3065_v1 }
  0x4c   : > { %2378 = vmatmul.msk.bf16.gmra.mxu2 %vm304_vm2, %v3067_v2 }
  0x4d   : > { %2382 = vmatmul.msk.bf16.gmra.mxu3 %vm304_vm2, %v3069_v3 }
  0x4e   : > { %2370 = vmatmul.msk.bf16.gmra.mxu0 %vm304_vm2, %v3071_v4 }
  0x5b   : > { %2383 = vmatmul.msk.bf16.vlgmr.msrb.gmra.mxu1 %vm304_vm2, %v237_v13 }
  0x5c   : > { %2399 = vmatmul.msk.bf16.vlgmr.msrb.gmra.mxu2 %vm304_vm2, %v621_v14 }
  0x5d   : > { %2447 = vmatmul.msk.bf16.vlgmr.msrb.gmra.mxu3 %vm304_vm2, %v844_v16 }
  0x5e   : > { %2495 = vmatmul.msk.bf16.vlgmr.msrb.gmra.mxu0 %vm304_vm2, %v287_v36  ;;  %v3126_v36 = vpack.c.bf16 %v596_v30, %v595_v29  ;;  %v2430_v29 = vld [vmem:[%s2980_s4 + $0xc8] sm:$0xff] }
  0x5f   : > { %v3242_v38 = vpack.c.bf16 %v2430_v29, %v2429_v26 }
  0x61   : > { %3743 = vst [vmem:[#allocation15_spill] sm:$0xff] %v3242_v38 }
  0x6b   : > { %2384 = vmatmul.msk.bf16.gmra.mxu1 %vm304_vm2, %v844_v16  ;;  %v3210_v16 = vpack.c.bf16 %v2428_v9, %v2427_v8 }
  0x6c   : > { %2400 = vmatmul.msk.bf16.gmra.mxu2 %vm304_vm2, %v3095_v21 }
  0x6d   : > { %2448 = vmatmul.msk.bf16.gmra.mxu3 %vm304_vm2, %v3097_v22  ;;  %3739 = vst [vmem:[#allocation11_spill] sm:$0xff] %v3210_v16 }
  0x6e   : > { %2496 = vmatmul.msk.bf16.gmra.mxu0 %vm304_vm2, %v3043_v48 }
  0x7b   : > { %2385 = vmatmul.msk.bf16.gmra.mxu1 %vm304_vm2, %v3097_v22 }
  0x7c   : > { %2401 = vmatmul.msk.bf16.gmra.mxu2 %vm304_vm2, %v3110_v27 }
  0x7d   : > { %2449 = vmatmul.msk.bf16.gmra.mxu3 %vm304_vm2, %v3112_v28 }
  0x7e   : > { %2497 = vmatmul.msk.bf16.gmra.mxu0 %vm304_vm2, %v3071_v4 }
  0x8b   : > { %2386 = vmatmul.msk.bf16.gmra.mxu1 %vm304_vm2, %v3112_v28 }
  0x8c   : > { %2402 = vmatmul.msk.bf16.gmra.mxu2 %vm304_vm2, %v3126_v36 }
  0x8d   : > { %2450 = vmatmul.msk.bf16.gmra.mxu3 %vm304_vm2, %v3128_v37 }
  0x8e   : > { %2498 = vmatmul.msk.bf16.gmra.mxu0 %vm304_vm2, %v2988_v10 }
  0x98   : > { %v3144_v43 = vpop.f32.mrf.mxu1 }
  0x9b   : > { %v3148_v49 = vpop.f32.mrf.mxu0  ;;  %2387 = vmatmul.msk.bf16.gmra.mxu1 %vm304_vm2, %v3128_v37 }
  0x9c   : > { %2403 = vmatmul.msk.bf16.gmra.mxu2 %vm304_vm2, %v3142_v42 }
  0x9d   : > { %2451 = vmatmul.msk.bf16.gmra.mxu3 %vm304_vm2, %v3146_v44 }
  0x9e   : > { %2499 = vmatmul.msk.bf16.gmra.mxu0 %vm304_vm2, %v3016_v33  ;;  %v3174_v33 = vpack.c.bf16 %v600_v54, %v599_v53 }
  0x9f   : > { %v3158_v10 = vpop.f32.mrf.mxu2 }
  0xa0   : > { %v3160_v50 = vpop.f32.mrf.mxu3  ;;  %v3162_v51 = vpop.f32.mrf.mxu1 }
  0xa3   : > { %v3164_v52 = vpop.f32.mrf.mxu0 }
  0xa7   : > { %v3170_v57 = vpop.f32.mrf.mxu2 }
  0xa8   : > { %v3172_v58 = vpop.f32.mrf.mxu3  ;;  %v3176_v59 = vpop.f32.mrf.mxu1 }
  0xa9   : > { %3736 = vst [vmem:[#allocation8_spill] sm:$0xff] %v3172_v58 }
  0xab   : > { %v3180_v61 = vpop.f32.mrf.mxu0  ;;  %2388 = vmatmul.msk.bf16.gmra.mxu1 %vm304_vm2, %v3146_v44 }
  0xac   : > { %2404 = vmatmul.msk.bf16.gmra.mxu2 %vm304_vm2, %v3174_v33 }
  0xad   : > { %2452 = vmatmul.msk.bf16.gmra.mxu3 %vm304_vm2, %v3178_v60 }
  0xae   : > { %2500 = vmatmul.msk.bf16.gmra.mxu0 %vm304_vm2, %v3037_v45  ;;  %v3206_v45 = vpack.c.bf16 %v602_v7, %v601_v6  ;;  %v2431_v6 = vld [vmem:[%s2980_s4 + $0xd8] sm:$0xff]  ;;  %v2432_v7 = vld [vmem:[%s2980_s4 + $0xe0] sm:$0xff] }
  0xaf   : > { %v3190_v62 = vpop.f32.mrf.mxu2 }
  0xb0   : > { %v3192_v63 = vpop.f32.mrf.mxu3  ;;  %v3194_v0 = vpop.f32.mrf.mxu1 }
  0xb1   : > { %3737 = vst [vmem:[#allocation9_spill] sm:$0xff] %v3192_v63 }
  0xb3   : > { %v3196_v5 = vpop.f32.mrf.mxu0 }
  0xb7   : > { %v3202_v12 = vpop.f32.mrf.mxu2 }
  0xb8   : > { %v3204_v13 = vpop.f32.mrf.mxu3  ;;  %v3208_v14 = vpop.f32.mrf.mxu1 }
  0xb9   : > { %3738 = vst [vmem:[#allocation10_spill] sm:$0xff] %v3204_v13 }
  0xbb   : > { %v3212_v17 = vpop.f32.mrf.mxu0  ;;  %2389 = vmatmul.msk.bf16.gmra.mxu1 %vm304_vm2, %v3178_v60 }
  0xbc   : > { %2405 = vmatmul.msk.bf16.gmra.mxu2 %vm304_vm2, %v3206_v45 }
  0xbd   : > { %2453 = vmatmul.msk.bf16.gmra.mxu3 %vm304_vm2, %v3210_v16 }
  0xbe   : > { %2501 = vmatmul.msk.bf16.gmra.mxu0 %vm304_vm2, %v3065_v1  ;;  %v3238_v1 = vpack.c.bf16 %v604_v25, %v603_v24  ;;  %v3270_v24 = vpack.c.bf16 %v606_v56, %v605_v55 }
  0xbf   : > { %v3222_v18 = vpop.f32.mrf.mxu2 }
  0xc0   : > { %v3224_v19 = vpop.f32.mrf.mxu3  ;;  %v3226_v20 = vpop.f32.mrf.mxu1  ;;  %3742 = vst [vmem:[#allocation14_spill] sm:$0xff] %v3238_v1 }
  0xc1   : > { %3740 = vst [vmem:[#allocation12_spill] sm:$0xff] %v3224_v19  ;;  %v608_v19 = vld [vmem:[%s2980_s4 + $0xe2] sm:$0xff] }
  0xc2   : > { %3746 = vst [vmem:[#allocation18_spill] sm:$0xff] %v3270_v24 }
  0xc3   : > { %v3228_v23 = vpop.f32.mrf.mxu0 }
  0xc7   : > { %v3234_v30 = vpop.f32.mrf.mxu2 }
  0xc8   : > { %v3236_v31 = vpop.f32.mrf.mxu3  ;;  %v3240_v32 = vpop.f32.mrf.mxu1 }
  0xc9   : > { %3741 = vst [vmem:[#allocation13_spill] sm:$0xff] %v3236_v31  ;;  %v607_v31 = vld [vmem:[%s2980_s4 + $0xda] sm:$0xff] }
  0xcb   : > { %v3244_v39 = vpop.f32.mrf.mxu0  ;;  %2390 = vmatmul.msk.bf16.gmra.mxu1 %vm304_vm2, %v3210_v16  ;;  %v3290_v16 = vpack.c.bf16 %v608_v19, %v607_v31 }
  0xcc   : > { %2406 = vmatmul.msk.bf16.gmra.mxu2 %vm304_vm2, %v3238_v1 }
  0xcd   : > { %2454 = vmatmul.msk.bf16.gmra.mxu3 %vm304_vm2, %v3242_v38 }
  0xce   : > { %2502 = vmatmul.msk.bf16.gmra.mxu0 %vm304_vm2, %v2990_v11  ;;  %v3272_v11 = vpack.c.bf16 %v2432_v7, %v2431_v6 }
  0xcf   : > { %v3254_v40 = vpop.f32.mrf.mxu2 }
  0xd0   : > { %v3256_v41 = vpop.f32.mrf.mxu3  ;;  %v3258_v53 = vpop.f32.mrf.mxu1 }
  0xd1   : > { %3744 = vst [vmem:[#allocation16_spill] sm:$0xff] %v3256_v41 }
  0xd3   : > { %v3260_v54 = vpop.f32.mrf.mxu0 }
  0xd7   : > { %v3266_v8 = vpop.f32.mrf.mxu2 }
  0xd8   : > { %v3268_v9 = vpop.f32.mrf.mxu3  ;;  %v509_v25 = vpop.f32.mrf.mxu1 }
  0xd9   : > { %3745 = vst [vmem:[#allocation17_spill] sm:$0xff] %v3268_v9  ;;  %v510_v26 = vadd.f32 %v509_v25, %v3148_v49 }
  0xdb   : > { %v1144_v29 = vpop.f32.mrf.mxu0  ;;  %2391 = vmatmul.msk.bf16.gmra.mxu1 %vm304_vm2, %v3242_v38  ;;  %v2433_v38 = vld [vmem:[%s2980_s4 + $0xf0] sm:$0xff] }
  0xdc   : > { %2407 = vmatmul.msk.bf16.gmra.mxu2 %vm304_vm2, %v3270_v24  ;;  %v2434_v24 = vld [vmem:[%s2980_s4 + $0xf8] sm:$0xff] }
  0xdd   : > { %2455 = vmatmul.msk.bf16.gmra.mxu3 %vm304_vm2, %v3272_v11  ;;  %v3292_v58 = vpack.c.bf16 %v2434_v24, %v2433_v38 }
  0xde   : > { %2503 = vmatmul.msk.bf16.gmra.mxu0 %vm304_vm2, %v3018_v34 }
  0xdf   : > { %v699_v55 = vpop.f32.mrf.mxu2 }
  0xe0   : > { %v779_v56 = vadd.f32 %v699_v55, %v510_v26  ;;  %v922_v6 = vpop.f32.mrf.mxu3  ;;  %v511_v7 = vpop.f32.mrf.mxu1 }
  0xe1   : > { %v512_v25 = vadd.f32 %v511_v7, %v3164_v52  ;;  %v2436_v7 = vld [vmem:[%s2980_s4 + $0x110] sm:$0xff] }
  0xe2   : > { %v1002_v49 = vadd.f32 %v922_v6, %v779_v56  ;;  %v609_v56 = vld [vmem:[%s2980_s4 + $0xf2] sm:$0xff]  ;;  %v610_v6 = vld [vmem:[%s2980_s4 + $0xfa] sm:$0xff] }
  0xe3   : > { %v1146_v9 = vpop.f32.mrf.mxu0 }
  0xe4   : > { %v3284_v41 = vadd.f32 %v1144_v29, %v1002_v49 }
  0xe7   : > { %v701_v13 = vpop.f32.mrf.mxu2 }
  0xe8   : > { %v780_v63 = vadd.f32 %v701_v13, %v512_v25  ;;  %v924_v1 = vpop.f32.mrf.mxu3  ;;  %v514_v34 = vpop.f32.mrf.mxu1 }
  0xe9   : > { %v515_v55 = vadd.f32 %v514_v34, %v3180_v61 }
  0xea   : > { %v1003_v26 = vadd.f32 %v924_v1, %v780_v63 }
  0xeb   : > { %v1149_v52 = vpop.f32.mrf.mxu0  ;;  %2392 = vmatmul.msk.bf16.gmra.mxu1 %vm304_vm2, %v3272_v11 }
  0xec   : > { %2408 = vmatmul.msk.bf16.gmra.mxu2 %vm304_vm2, %v3290_v16  ;;  %v3299_v13 = vadd.f32 %v1146_v9, %v1003_v26  ;;  %v2435_v9 = vld [vmem:[%s2980_s4 + $0x108] sm:$0xff]  ;;  %v3312_v26 = vpack.c.bf16 %v610_v6, %v609_v56 }
  0xed   : > { %2456 = vmatmul.msk.bf16.gmra.mxu3 %vm304_vm2, %v3292_v58 }
  0xee   : > { %3747 = vst [vmem:[#allocation19_spill] sm:$0xff] %v3299_v13  ;;  %2504 = vmatmul.msk.bf16.gmra.mxu0 %vm304_vm2, %v3039_v46  ;;  %v3314_v13 = vpack.c.bf16 %v2436_v7, %v2435_v9  ;;  %v611_v9 = vld [vmem:[%s2980_s4 + $0x10a] sm:$0xff]  ;;  %v612_v7 = vld [vmem:[%s2980_s4 + $0x112] sm:$0xff] }
  0xef   : > { %v704_v63 = vpop.f32.mrf.mxu2 }
  0xf0   : > { %v781_v61 = vadd.f32 %v704_v63, %v515_v55  ;;  %v927_v19 = vpop.f32.mrf.mxu3  ;;  %v516_v31 = vpop.f32.mrf.mxu1 }
  0xf1   : > { %v517_v38 = vadd.f32 %v516_v31, %v3196_v5 }
  0xf2   : > { %v1004_v1 = vadd.f32 %v927_v19, %v781_v61 }
  0xf3   : > { %v1151_v24 = vpop.f32.mrf.mxu0 }
  0xf4   : > { %v3306_v29 = vadd.f32 %v1149_v52, %v1004_v1 }
  0xf7   : > { %v706_v49 = vpop.f32.mrf.mxu2 }
  0xf8   : > { %v782_v25 = vadd.f32 %v706_v49, %v517_v38  ;;  %v929_v34 = vpop.f32.mrf.mxu3  ;;  %v519_v46 = vpop.f32.mrf.mxu1  ;;  %v2438_v49 = vld [vmem:[%s2980_s4 + $0x128] sm:$0xff] }
  0xf9   : > { %v520_v63 = vadd.f32 %v519_v46, %v3212_v17 }
  0xfa   : > { %v1005_v55 = vadd.f32 %v929_v34, %v782_v25 }
  0xfb   : > { %v1154_v5 = vpop.f32.mrf.mxu0  ;;  %2393 = vmatmul.msk.bf16.gmra.mxu1 %vm304_vm2, %v3292_v58 }
  0xfc   : > { %2409 = vmatmul.msk.bf16.gmra.mxu2 %vm304_vm2, %v3312_v26  ;;  %v3321_v52 = vadd.f32 %v1151_v24, %v1005_v55  ;;  %v2437_v24 = vld [vmem:[%s2980_s4 + $0x120] sm:$0xff]  ;;  %v3334_v55 = vpack.c.bf16 %v612_v7, %v611_v9 }
  0xfd   : > { %2457 = vmatmul.msk.bf16.gmra.mxu3 %vm304_vm2, %v3314_v13 }
  0xfe   : > { %3748 = vst [vmem:[#allocation20_spill] sm:$0xff] %v3321_v52  ;;  %2505 = vmatmul.msk.bf16.gmra.mxu0 %vm304_vm2, %v3067_v2  ;;  %v3336_v52 = vpack.c.bf16 %v2438_v49, %v2437_v24  ;;  %v613_v24 = vld [vmem:[%s2980_s4 + $0x122] sm:$0xff]  ;;  %v614_v49 = vld [vmem:[%s2980_s4 + $0x12a] sm:$0xff] }
  0xff   : > { %v709_v61 = vpop.f32.mrf.mxu2 }
 0x100   : > { %v783_v17 = vadd.f32 %v709_v61, %v520_v63  ;;  %v932_v19 = vpop.f32.mrf.mxu3  ;;  %v521_v31 = vpop.f32.mrf.mxu1 }
 0x101   : > { %v522_v38 = vadd.f32 %v521_v31, %v3228_v23 }
 0x102   : > { %v1006_v1 = vadd.f32 %v932_v19, %v783_v17 }
 0x103   : > { %v1156_v56 = vpop.f32.mrf.mxu0 }
 0x104   : > { %v3328_v6 = vadd.f32 %v1154_v5, %v1006_v1 }
 0x107   : > { %v711_v25 = vpop.f32.mrf.mxu2 }
 0x108   : > { %v784_v34 = vadd.f32 %v711_v25, %v522_v38  ;;  %v934_v46 = vpop.f32.mrf.mxu3  ;;  %v524_v2 = vpop.f32.mrf.mxu1  ;;  %v2440_v25 = vld [vmem:[%s2980_s4 + $0x140] sm:$0xff] }
 0x109   : > { %v525_v61 = vadd.f32 %v524_v2, %v3244_v39 }
 0x10a   : > { %v1007_v63 = vadd.f32 %v934_v46, %v784_v34 }
 0x10b   : > { %v1159_v23 = vpop.f32.mrf.mxu0  ;;  %2394 = vmatmul.msk.bf16.gmra.mxu1 %vm304_vm2, %v3314_v13 }
 0x10c   : > { %2410 = vmatmul.msk.bf16.gmra.mxu2 %vm304_vm2, %v3334_v55  ;;  %v3343_v5 = vadd.f32 %v1156_v56, %v1007_v63  ;;  %v2439_v56 = vld [vmem:[%s2980_s4 + $0x138] sm:$0xff]  ;;  %v3356_v63 = vpack.c.bf16 %v614_v49, %v613_v24 }
 0x10d   : > { %2458 = vmatmul.msk.bf16.gmra.mxu3 %vm304_vm2, %v3336_v52 }
 0x10e   : > { %3749 = vst [vmem:[#allocation21_spill] sm:$0xff] %v3343_v5  ;;  %2506 = vmatmul.msk.bf16.gmra.mxu0 %vm304_vm2, %v2994_v15  ;;  %v3358_v5 = vpack.c.bf16 %v2440_v25, %v2439_v56  ;;  %v615_v56 = vld [vmem:[%s2980_s4 + $0x13a] sm:$0xff]  ;;  %v616_v25 = vld [vmem:[%s2980_s4 + $0x142] sm:$0xff] }
 0x10f   : > { %v714_v17 = vpop.f32.mrf.mxu2 }
 0x110   : > { %v785_v39 = vadd.f32 %v714_v17, %v525_v61  ;;  %v937_v19 = vpop.f32.mrf.mxu3  ;;  %v526_v31 = vpop.f32.mrf.mxu1 }
 0x111   : > { %v527_v38 = vadd.f32 %v526_v31, %v3260_v54 }
 0x112   : > { %v1008_v1 = vadd.f32 %v937_v19, %v785_v39 }
 0x113   : > { %v1161_v9 = vpop.f32.mrf.mxu0 }
 0x114   : > { %v3350_v7 = vadd.f32 %v1159_v23, %v1008_v1 }
 0x117   : > { %v716_v34 = vpop.f32.mrf.mxu2 }
 0x118   : > { %v786_v46 = vadd.f32 %v716_v34, %v527_v38  ;;  %v939_v2 = vpop.f32.mrf.mxu3  ;;  %v529_v15 = vpop.f32.mrf.mxu1  ;;  %v2441_v34 = vld [vmem:[%s2980_s4 + $0x150] sm:$0xff] }
 0x119   : > { %v530_v23 = vadd.f32 %v529_v15, %v3144_v43 }
 0x11a   : > { %v1009_v61 = vadd.f32 %v939_v2, %v786_v46  ;;  %v2442_v46 = vld [vmem:[%s2980_s4 + $0x158] sm:$0xff] }
 0x11b   : > { %v1164_v17 = vpop.f32.mrf.mxu0  ;;  %2395 = vmatmul.msk.bf16.gmra.mxu1 %vm304_vm2, %v3336_v52  ;;  %v3380_v15 = vpack.c.bf16 %v2442_v46, %v2441_v34  ;;  %v618_v34 = vld [vmem:[%s2980_s4 + $0x15a] sm:$0xff]  ;;  %v2443_v46 = vld [vmem:[%s2980_s4 + $0x168] sm:$0xff] }
 0x11c   : > { %2411 = vmatmul.msk.bf16.gmra.mxu2 %vm304_vm2, %v3356_v63  ;;  %v3364_v54 = vadd.f32 %v1161_v9, %v1009_v61 }
 0x11d   : > { %2459 = vmatmul.msk.bf16.gmra.mxu3 %vm304_vm2, %v3358_v5 }
 0x11e   : > { %3750 = vst [vmem:[#allocation22_spill] sm:$0xff] %v3364_v54  ;;  %2507 = vmatmul.msk.bf16.gmra.mxu0 %vm304_vm2, %v3020_v35  ;;  %v3378_v35 = vpack.c.bf16 %v616_v25, %v615_v56 }
 0x11f   : > { %v719_v39 = vpop.f32.mrf.mxu2 }
 0x120   : > { %v787_v19 = vadd.f32 %v719_v39, %v530_v23  ;;  %v942_v31 = vpop.f32.mrf.mxu3  ;;  %v531_v1 = vpop.f32.mrf.mxu1 }
 0x121   : > { %v532_v9 = vadd.f32 %v531_v1, %v3162_v51 }
 0x122   : > { %v1010_v38 = vadd.f32 %v942_v31, %v787_v19 }
 0x123   : > { %v1166_v24 = vpop.f32.mrf.mxu0 }
 0x124   : > { %v3371_v49 = vadd.f32 %v1164_v17, %v1010_v38 }
 0x127   : > { %v721_v2 = vpop.f32.mrf.mxu2 }
 0x128   : > { %v788_v61 = vadd.f32 %v721_v2, %v532_v9  ;;  %v944_v54 = vpop.f32.mrf.mxu3  ;;  %v534_v43 = vpop.f32.mrf.mxu1  ;;  %v617_v9 = vld [vmem:[%s2980_s4 + $0x152] sm:$0xff] }
 0x129   : > { %v535_v17 = vadd.f32 %v534_v43, %v3176_v59  ;;  %v2444_v2 = vld [vmem:[%s2980_s4 + $0x170] sm:$0xff] }
 0x12a   : > { %v1011_v23 = vadd.f32 %v944_v54, %v788_v61  ;;  %v3402_v43 = vpack.c.bf16 %v2444_v2, %v2443_v46  ;;  %v2445_v46 = vld [vmem:[%s2980_s4 + $0x180] sm:$0xff] }
 0x12b   : > { %v1169_v39 = vpop.f32.mrf.mxu0  ;;  %2396 = vmatmul.msk.bf16.gmra.mxu1 %vm304_vm2, %v3358_v5 }
 0x12c   : > { %2412 = vmatmul.msk.bf16.gmra.mxu2 %vm304_vm2, %v3378_v35  ;;  %v3386_v51 = vadd.f32 %v1166_v24, %v1011_v23 }
 0x12d   : > { %2460 = vmatmul.msk.bf16.gmra.mxu3 %vm304_vm2, %v3380_v15 }
 0x12e   : > { %3751 = vst [vmem:[#allocation23_spill] sm:$0xff] %v3386_v51  ;;  %2508 = vmatmul.msk.bf16.gmra.mxu0 %vm304_vm2, %v3041_v47  ;;  %v3400_v47 = vpack.c.bf16 %v618_v34, %v617_v9 }
 0x12f   : > { %v724_v54 = vpop.f32.mrf.mxu2 }
 0x130   : > { %v789_v19 = vadd.f32 %v724_v54, %v535_v17  ;;  %v947_v31 = vpop.f32.mrf.mxu3  ;;  %v536_v1 = vpop.f32.mrf.mxu1 }
 0x131   : > { %v537_v24 = vadd.f32 %v536_v1, %v3194_v0 }
 0x132   : > { %v1012_v38 = vadd.f32 %v947_v31, %v789_v19 }
 0x133   : > { %v1171_v56 = vpop.f32.mrf.mxu0 }
 0x134   : > { %v3393_v25 = vadd.f32 %v1169_v39, %v1012_v38 }
 0x136   : > { %3752 = vst [vmem:[#allocation24_spill] sm:$0xff] %v3393_v25 }
 0x137   : > { %v726_v61 = vpop.f32.mrf.mxu2 }
 0x138   : > { %v790_v23 = vadd.f32 %v726_v61, %v537_v24  ;;  %v949_v51 = vpop.f32.mrf.mxu3  ;;  %v539_v59 = vpop.f32.mrf.mxu1  ;;  %v620_v24 = vld [vmem:[%s2980_s4 + $0x172] sm:$0xff]  ;;  %v2446_v61 = vld [vmem:[%s2980_s4 + $0x188] sm:$0xff] }
 0x139   : > { %v540_v39 = vadd.f32 %v539_v59, %v3208_v14 }
 0x13a   : > { %v1013_v17 = vadd.f32 %v949_v51, %v790_v23  ;;  %v2493_v23 = vld [vmem:[%s2980_s4 + $0x181] sm:$0xff] }
 0x13b   : > { %v1174_v54 = vpop.f32.mrf.mxu0  ;;  %2397 = vmatmul.msk.bf16.gmra.mxu1 %vm304_vm2, %v3380_v15 }
 0x13c   : > { %2413 = vmatmul.msk.bf16.gmra.mxu2 %vm304_vm2, %v3400_v47  ;;  %v3408_v0 = vadd.f32 %v1171_v56, %v1013_v17  ;;  %v619_v56 = vld [vmem:[%s2980_s4 + $0x16a] sm:$0xff] }
 0x13d   : > { %2461 = vmatmul.msk.bf16.gmra.mxu3 %vm304_vm2, %v3402_v43  ;;  %v2494_v17 = vld [vmem:[%s2980_s4 + $0x189] sm:$0xff]  ;;  %v3424_v14 = vpack.c.bf16 %v620_v24, %v619_v56 }
 0x13e   : > { %3753 = vst [vmem:[#allocation25_spill] sm:$0xff] %v3408_v0  ;;  %2509 = vmatmul.msk.bf16.gmra.mxu0 %vm304_vm2, %v3069_v3 }
 0x13f   : > { %v729_v51 = vpop.f32.mrf.mxu2 }
 0x140   : > { %v791_v19 = vadd.f32 %v729_v51, %v540_v39  ;;  %v952_v31 = vpop.f32.mrf.mxu3  ;;  %v541_v1 = vpop.f32.mrf.mxu1  ;;  %v859_v39 = vpack.c.bf16 %v2446_v61, %v2445_v46  ;;  %v1081_v51 = vpack.c.bf16 %v2494_v17, %v2493_v23 }
 0x141   : > { %v542_v2 = vadd.f32 %v541_v1, %v3226_v20 }
 0x142   : > { %v1014_v38 = vadd.f32 %v952_v31, %v791_v19 }
 0x143   : > { %v1176_v9 = vpop.f32.mrf.mxu0 }
 0x144   : > { %v3415_v34 = vadd.f32 %v1174_v54, %v1014_v38 }
 0x147   : > { %v731_v0 = vpop.f32.mrf.mxu2 }
 0x148   : > { %v792_v3 = vadd.f32 %v731_v0, %v542_v2  ;;  %v954_v25 = vpop.f32.mrf.mxu3  ;;  %v544_v59 = vpop.f32.mrf.mxu1 }
 0x149   : > { %v545_v54 = vadd.f32 %v544_v59, %v3240_v32 }
 0x14a   : > { %v1015_v19 = vadd.f32 %v954_v25, %v792_v3 }
 0x14b   : > { %v1179_v31 = vpop.f32.mrf.mxu0  ;;  %2398 = vmatmul.msk.bf16.gmra.mxu1 %vm304_vm2, %v3402_v43 }
 0x14c   : > { %2414 = vmatmul.msk.bf16.gmra.mxu2 %vm304_vm2, %v3424_v14  ;;  %v3430_v20 = vadd.f32 %v1176_v9, %v1015_v19 }
 0x14d   : > { %2462 = vmatmul.msk.bf16.gmra.mxu3 %vm304_vm2, %v859_v39 }
 0x14e   : > { %2510 = vmatmul.msk.bf16.gmra.mxu0 %vm304_vm2, %v1081_v51 }
 0x14f   : > { %v734_v0 = vpop.f32.mrf.mxu2 }
 0x150   : > { %v793_v1 = vadd.f32 %v734_v0, %v545_v54  ;;  %v957_v38 = vpop.f32.mrf.mxu3  ;;  %v546_v56 = vpop.f32.mrf.mxu1 }
 0x151   : > { %v547_v2 = vadd.f32 %v546_v56, %v3258_v53 }
 0x152   : > { %v1016_v25 = vadd.f32 %v957_v38, %v793_v1 }
 0x153   : > { %v1181_v24 = vpop.f32.mrf.mxu0 }
 0x154   : > { %v3435_v46 = vadd.f32 %v1179_v31, %v1016_v25 }
 0x157   : > { %v736_v61 = vpop.f32.mrf.mxu2 }
 0x158   : > { %v794_v23 = vadd.f32 %v736_v61, %v547_v2  ;;  %v959_v9 = vpop.f32.mrf.mxu3  ;;  %v549_v17 = vpop.f32.mrf.mxu1 }
 0x159   : > { %v550_v53 = vadd.f32 %v549_v17, %v3158_v10 }
 0x15a   : > { %v1017_v3 = vadd.f32 %v959_v9, %v794_v23 }
 0x15b   : > { %v1184_v39 = vpop.f32.mrf.mxu0  ;;  %2543 = vmatmul.msk.bf16.vlgmr.msra.gmra.mxu1 %vm304_vm2, %v3095_v21 }
 0x15c   : > { %2591 = vmatmul.msk.bf16.vlgmr.msra.gmra.mxu2 %vm304_vm2, %v3097_v22  ;;  %v3442_v32 = vadd.f32 %v1181_v24, %v1017_v3 }
 0x15d   : > { %2639 = vmatmul.msk.bf16.vlgmr.msra.gmra.mxu3 %vm304_vm2, %v3043_v48 }
 0x15e   : > { %2687 = vmatmul.msk.bf16.vlgmr.msra.gmra.mxu0 %vm304_vm2, %v3110_v27 }
 0x15f   : > { %v739_v59 = vpop.f32.mrf.mxu2 }
 0x160   : > { %v795_v51 = vadd.f32 %v739_v59, %v550_v53  ;;  %v962_v19 = vpop.f32.mrf.mxu3  ;;  %v551_v31 = vpop.f32.mrf.mxu1  ;;  %v2612_v53 = vld [vmem:[%s2980_s4 + $0x69] sm:$0xff] }
 0x161   : > { %v552_v22 = vadd.f32 %v551_v31, %v3170_v57 }
 0x162   : > { %v1018_v54 = vadd.f32 %v962_v19, %v795_v51 }
 0x163   : > { %v1186_v0 = vpop.f32.mrf.mxu0 }
 0x164   : > { %v3449_v21 = vadd.f32 %v1184_v39, %v1018_v54  ;;  %v2611_v39 = vld [vmem:[%s2980_s4 + $0x61] sm:$0xff] }
 0x165   : > { %v1735_v31 = vpack.c.bf16 %v2612_v53, %v2611_v39 }
 0x167   : > { %v741_v1 = vpop.f32.mrf.mxu2 }
 0x168   : > { %v796_v38 = vadd.f32 %v741_v1, %v552_v22  ;;  %v964_v56 = vpop.f32.mrf.mxu3  ;;  %v554_v25 = vpop.f32.mrf.mxu1 }
 0x169   : > { %v555_v57 = vadd.f32 %v554_v25, %v3190_v62 }
 0x16a   : > { %v1019_v48 = vadd.f32 %v964_v56, %v796_v38 }
 0x16b   : > { %v1189_v24 = vpop.f32.mrf.mxu0  ;;  %2544 = vmatmul.msk.bf16.gmra.mxu1 %vm304_vm2, %v3110_v27 }
 0x16c   : > { %2592 = vmatmul.msk.bf16.gmra.mxu2 %vm304_vm2, %v3112_v28  ;;  %v3456_v10 = vadd.f32 %v1186_v0, %v1019_v48 }
 0x16d   : > { %2640 = vmatmul.msk.bf16.gmra.mxu3 %vm304_vm2, %v3071_v4 }
 0x16e   : > { %2688 = vmatmul.msk.bf16.gmra.mxu0 %vm304_vm2, %v3126_v36 }
 0x16f   : > { %v744_v2 = vpop.f32.mrf.mxu2 }
 0x170   : > { %v797_v61 = vadd.f32 %v744_v2, %v555_v57  ;;  %v967_v23 = vpop.f32.mrf.mxu3  ;;  %v556_v9 = vpop.f32.mrf.mxu1  ;;  %v2614_v57 = vld [vmem:[%s2980_s4 + $0x81] sm:$0xff] }
 0x171   : > { %v557_v28 = vadd.f32 %v556_v9, %v3202_v12 }
 0x172   : > { %v1020_v17 = vadd.f32 %v967_v23, %v797_v61 }
 0x173   : > { %v1191_v3 = vpop.f32.mrf.mxu0 }
 0x174   : > { %v3463_v27 = vadd.f32 %v1189_v24, %v1020_v17 }
 0x177   : > { %v746_v59 = vpop.f32.mrf.mxu2 }
 0x178   : > { %v798_v51 = vadd.f32 %v746_v59, %v557_v28  ;;  %v969_v4 = vpop.f32.mrf.mxu3  ;;  %v559_v19 = vpop.f32.mrf.mxu1 }
 0x179   : > { %v560_v12 = vadd.f32 %v559_v19, %v3222_v18 }
 0x17a   : > { %v1021_v54 = vadd.f32 %v969_v4, %v798_v51 }
 0x17b   : > { %v1194_v62 = vpop.f32.mrf.mxu0  ;;  %2545 = vmatmul.msk.bf16.gmra.mxu1 %vm304_vm2, %v3126_v36 }
 0x17c   : > { %2593 = vmatmul.msk.bf16.gmra.mxu2 %vm304_vm2, %v3128_v37  ;;  %v3472_v0 = vadd.f32 %v1191_v3, %v1021_v54  ;;  %v2613_v37 = vld [vmem:[%s2980_s4 + $0x79] sm:$0xff] }
 0x17d   : > { %2641 = vmatmul.msk.bf16.gmra.mxu3 %vm304_vm2, %v1735_v31  ;;  %v1736_v17 = vpack.c.bf16 %v2614_v57, %v2613_v37  ;;  %v2616_v54 = vld [vmem:[%s2980_s4 + $0x99] sm:$0xff] }
 0x17e   : > { %2689 = vmatmul.msk.bf16.gmra.mxu0 %vm304_vm2, %v3142_v42 }
 0x17f   : > { %v749_v22 = vpop.f32.mrf.mxu2 }
 0x180   : > { %v799_v1 = vadd.f32 %v749_v22, %v560_v12  ;;  %v972_v38 = vpop.f32.mrf.mxu3  ;;  %v561_v56 = vpop.f32.mrf.mxu1 }
 0x181   : > { %v562_v36 = vadd.f32 %v561_v56, %v3234_v30 }
 0x182   : > { %v1022_v25 = vadd.f32 %v972_v38, %v799_v1 }
 0x183   : > { %v1196_v48 = vpop.f32.mrf.mxu0 }
 0x184   : > { %v3478_v24 = vadd.f32 %v1194_v62, %v1022_v25 }
 0x187   : > { %v751_v2 = vpop.f32.mrf.mxu2 }
 0x188   : > { %v800_v61 = vadd.f32 %v751_v2, %v562_v36  ;;  %v974_v23 = vpop.f32.mrf.mxu3  ;;  %v564_v9 = vpop.f32.mrf.mxu1 }
 0x189   : > { %v565_v30 = vadd.f32 %v564_v9, %v3254_v40 }
 0x18a   : > { %v1023_v3 = vadd.f32 %v974_v23, %v800_v61 }
 0x18b   : > { %v1199_v18 = vpop.f32.mrf.mxu0  ;;  %2546 = vmatmul.msk.bf16.gmra.mxu1 %vm304_vm2, %v3142_v42 }
 0x18c   : > { %2594 = vmatmul.msk.bf16.gmra.mxu2 %vm304_vm2, %v3146_v44  ;;  %v3487_v28 = vadd.f32 %v1196_v48, %v1023_v3  ;;  %v2615_v44 = vld [vmem:[%s2980_s4 + $0x91] sm:$0xff] }
 0x18d   : > { %2642 = vmatmul.msk.bf16.gmra.mxu3 %vm304_vm2, %v1736_v17  ;;  %v1737_v38 = vpack.c.bf16 %v2616_v54, %v2615_v44  ;;  %v2618_v17 = vld [vmem:[%s2980_s4 + $0xb1] sm:$0xff] }
 0x18e   : > { %2690 = vmatmul.msk.bf16.gmra.mxu0 %vm304_vm2, %v3174_v33 }
 0x18f   : > { %v754_v39 = vpop.f32.mrf.mxu2 }
 0x190   : > { %v801_v53 = vadd.f32 %v754_v39, %v565_v30  ;;  %v977_v59 = vpop.f32.mrf.mxu3  ;;  %v566_v51 = vpop.f32.mrf.mxu1 }
 0x191   : > { %v567_v42 = vadd.f32 %v566_v51, %v3266_v8  ;;  %v3755_v51 = vld [vmem:[#allocation11_spill] sm:$0xff] }
 0x192   : > { %v1024_v4 = vadd.f32 %v977_v59, %v801_v53 }
 0x193   : > { %v1201_v19 = vpop.f32.mrf.mxu0 }
 0x194   : > { %v3493_v31 = vadd.f32 %v1199_v18, %v1024_v4 }
 0x197   : > { %v756_v62 = vpop.f32.mrf.mxu2 }
 0x198   : > { %v802_v12 = vadd.f32 %v756_v62, %v567_v42  ;;  %v979_v22 = vpop.f32.mrf.mxu3  ;;  %v569_v1 = vpop.f32.mrf.mxu1  ;;  %v3757_v42 = vld [vmem:[#allocation9_spill] sm:$0xff] }
 0x199   : > { %v570_v8 = vadd.f32 %v569_v1, %v3160_v50 }
 0x19a   : > { %v1025_v56 = vadd.f32 %v979_v22, %v802_v12 }
 0x19b   : > { %v1204_v40 = vpop.f32.mrf.mxu0  ;;  %2547 = vmatmul.msk.bf16.gmra.mxu1 %vm304_vm2, %v3174_v33  ;;  %v3754_v33 = vld [vmem:[#allocation8_spill] sm:$0xff] }
 0x19c   : > { %2595 = vmatmul.msk.bf16.gmra.mxu2 %vm304_vm2, %v3178_v60  ;;  %v3502_v25 = vadd.f32 %v1201_v19, %v1025_v56  ;;  %v2617_v60 = vld [vmem:[%s2980_s4 + $0xa9] sm:$0xff] }
 0x19d   : > { %2643 = vmatmul.msk.bf16.gmra.mxu3 %vm304_vm2, %v1737_v38  ;;  %v1738_v53 = vpack.c.bf16 %v2618_v17, %v2617_v60  ;;  %v3756_v19 = vld [vmem:[#allocation14_spill] sm:$0xff]  ;;  %v3759_v60 = vld [vmem:[#allocation15_spill] sm:$0xff] }
 0x19e   : > { %2691 = vmatmul.msk.bf16.gmra.mxu0 %vm304_vm2, %v3206_v45 }
 0x19f   : > { %v759_v48 = vpop.f32.mrf.mxu2 }
 0x1a0   : > { %v803_v36 = vadd.f32 %v759_v48, %v570_v8  ;;  %v982_v37 = vpop.f32.mrf.mxu3  ;;  %v571_v57 = vpop.f32.mrf.mxu1  ;;  %v2619_v8 = vld [vmem:[%s2980_s4 + $0xc1] sm:$0xff]  ;;  %v2620_v48 = vld [vmem:[%s2980_s4 + $0xc9] sm:$0xff] }
 0x1a1   : > { %v572_v9 = vadd.f32 %v571_v57, %v3754_v33 }
 0x1a2   : > { %v1026_v2 = vadd.f32 %v982_v37, %v803_v36 }
 0x1a3   : > { %v1206_v61 = vpop.f32.mrf.mxu0 }
 0x1a4   : > { %v3508_v23 = vadd.f32 %v1204_v40, %v1026_v2 }
 0x1a7   : > { %v761_v3 = vpop.f32.mrf.mxu2 }
 0x1a8   : > { %v804_v18 = vadd.f32 %v761_v3, %v572_v9  ;;  %v984_v30 = vpop.f32.mrf.mxu3  ;;  %v574_v39 = vpop.f32.mrf.mxu1  ;;  %v3760_v3 = vld [vmem:[#allocation18_spill] sm:$0xff] }
 0x1a9   : > { %v575_v44 = vadd.f32 %v574_v39, %v3757_v42 }
 0x1aa   : > { %v1027_v59 = vadd.f32 %v984_v30, %v804_v18  ;;  %v3761_v18 = vld [vmem:[#allocation12_spill] sm:$0xff] }
 0x1ab   : > { %v1209_v50 = vpop.f32.mrf.mxu0  ;;  %2548 = vmatmul.msk.bf16.gmra.mxu1 %vm304_vm2, %v3206_v45  ;;  %v3758_v45 = vld [vmem:[#allocation10_spill] sm:$0xff] }
 0x1ac   : > { %2596 = vmatmul.msk.bf16.gmra.mxu2 %vm304_vm2, %v3755_v51  ;;  %v3517_v4 = vadd.f32 %v1206_v61, %v1027_v59  ;;  %v1739_v61 = vpack.c.bf16 %v2620_v48, %v2619_v8 }
 0x1ad   : > { %2644 = vmatmul.msk.bf16.gmra.mxu3 %vm304_vm2, %v1738_v53 }
 0x1ae   : > { %2692 = vmatmul.msk.bf16.gmra.mxu0 %vm304_vm2, %v3756_v19 }
 0x1af   : > { %v764_v54 = vpop.f32.mrf.mxu2 }
 0x1b0   : > { %v805_v62 = vadd.f32 %v764_v54, %v575_v44  ;;  %v987_v12 = vpop.f32.mrf.mxu3  ;;  %v576_v22 = vpop.f32.mrf.mxu1 }
 0x1b1   : > { %v577_v40 = vadd.f32 %v576_v22, %v3758_v45 }
 0x1b2   : > { %v1028_v1 = vadd.f32 %v987_v12, %v805_v62  ;;  %v2621_v62 = vld [vmem:[%s2980_s4 + $0xd9] sm:$0xff]  ;;  %v2622_v12 = vld [vmem:[%s2980_s4 + $0xe1] sm:$0xff] }
 0x1b3   : > { %v1211_v38 = vpop.f32.mrf.mxu0 }
 0x1b4   : > { %v3523_v56 = vadd.f32 %v1209_v50, %v1028_v1 }
 0x1b7   : > { %v766_v36 = vpop.f32.mrf.mxu2 }
 0x1b8   : > { %v806_v37 = vadd.f32 %v766_v36, %v577_v40  ;;  %v989_v57 = vpop.f32.mrf.mxu3  ;;  %v579_v2 = vpop.f32.mrf.mxu1  ;;  %v1740_v40 = vpack.c.bf16 %v2622_v12, %v2621_v62 }
 0x1b9   : > { %v580_v30 = vadd.f32 %v579_v2, %v3761_v18 }
 0x1ba   : > { %v1029_v33 = vadd.f32 %v989_v57, %v806_v37  ;;  %v3763_v37 = vld [vmem:[#allocation16_spill] sm:$0xff] }
 0x1bb   : > { %v1214_v9 = vpop.f32.mrf.mxu0  ;;  %2549 = vmatmul.msk.bf16.gmra.mxu1 %vm304_vm2, %v3756_v19  ;;  %v3762_v19 = vld [vmem:[#allocation13_spill] sm:$0xff] }
 0x1bc   : > { %2597 = vmatmul.msk.bf16.gmra.mxu2 %vm304_vm2, %v3759_v60  ;;  %v3532_v17 = vadd.f32 %v1211_v38, %v1029_v33 }
 0x1bd   : > { %2645 = vmatmul.msk.bf16.gmra.mxu3 %vm304_vm2, %v1739_v61 }
 0x1be   : > { %2693 = vmatmul.msk.bf16.gmra.mxu0 %vm304_vm2, %v3760_v3 }
 0x1bf   : > { %v769_v39 = vpop.f32.mrf.mxu2 }
 0x1c0   : > { %v807_v53 = vadd.f32 %v769_v39, %v580_v30  ;;  %v992_v59 = vpop.f32.mrf.mxu3  ;;  %v581_v50 = vpop.f32.mrf.mxu1 }
 0x1c1   : > { %v582_v54 = vadd.f32 %v581_v50, %v3762_v19 }
 0x1c2   : > { %v1030_v51 = vadd.f32 %v992_v59, %v807_v53  ;;  %v2624_v53 = vld [vmem:[%s2980_s4 + $0xf9] sm:$0xff] }
 0x1c3   : > { %v1216_v42 = vpop.f32.mrf.mxu0 }
 0x1c4   : > { %v3538_v44 = vadd.f32 %v1214_v9, %v1030_v51 }
 0x1c7   : > { %v771_v22 = vpop.f32.mrf.mxu2 }
 0x1c8   : > { %v808_v1 = vadd.f32 %v771_v22, %v582_v54  ;;  %v994_v38 = vpop.f32.mrf.mxu3  ;;  %v584_v45 = vpop.f32.mrf.mxu1 }
 0x1c9   : > { %v585_v57 = vadd.f32 %v584_v45, %v3763_v37 }
 0x1ca   : > { %v1031_v8 = vadd.f32 %v994_v38, %v808_v1 }
 0x1cb   : > { %v1219_v48 = vpop.f32.mrf.mxu0  ;;  %2550 = vmatmul.msk.bf16.gmra.mxu1 %vm304_vm2, %v3760_v3  ;;  %v3764_v3 = vld [vmem:[#allocation17_spill] sm:$0xff] }
 0x1cc   : > { %2598 = vmatmul.msk.bf16.gmra.mxu2 %vm304_vm2, %v3272_v11  ;;  %v3547_v36 = vadd.f32 %v1216_v42, %v1031_v8  ;;  %v2623_v11 = vld [vmem:[%s2980_s4 + $0xf1] sm:$0xff] }
 0x1cd   : > { %2646 = vmatmul.msk.bf16.gmra.mxu3 %vm304_vm2, %v1740_v40  ;;  %v1741_v19 = vpack.c.bf16 %v2624_v53, %v2623_v11 }
 0x1ce   : > { %2694 = vmatmul.msk.bf16.gmra.mxu0 %vm304_vm2, %v3290_v16 }
 0x1cf   : > { %v774_v2 = vpop.f32.mrf.mxu2 }
 0x1d0   : > { %v809_v61 = vadd.f32 %v774_v2, %v585_v57  ;;  %v997_v33 = vpop.f32.mrf.mxu3  ;;  %v586_v9 = vpop.f32.mrf.mxu1  ;;  %v2626_v57 = vld [vmem:[%s2980_s4 + $0x111] sm:$0xff] }
 0x1d1   : > { %v587_v39 = vadd.f32 %v586_v9, %v3764_v3 }
 0x1d2   : > { %v1032_v60 = vadd.f32 %v997_v33, %v809_v61  ;;  %v3572_v33 = vld [vmem:[#allocation4] ss:$0 sm:$0xff] }
 0x1d3   : > { %v1221_v18 = vpop.f32.mrf.mxu0 }
 0x1d4   : > { %v3553_v30 = vadd.f32 %v1219_v48, %v1032_v60  ;;  %v3765_v48 = vld [vmem:[#allocation19_spill] sm:$0xff] }
 0x1d7   : > { %v776_v59 = vpop.f32.mrf.mxu2 }
 0x1d8   : > { %v810_v50 = vadd.f32 %v776_v59, %v587_v39  ;;  %v999_v51 = vpop.f32.mrf.mxu3  ;;  %v1366_v42 = vpop.f32.mrf.mxu1 }
 0x1d9   : > { %v1446_v22 = vadd.f32 %v1366_v42, %v3284_v41 }
 0x1da   : > { %v1033_v54 = vadd.f32 %v999_v51, %v810_v50 }
 0x1db   : > { %v2033_v62 = vpop.f32.mrf.mxu0  ;;  %2551 = vmatmul.msk.bf16.gmra.mxu1 %vm304_vm2, %v3290_v16 }
 0x1dc   : > { %2599 = vmatmul.msk.bf16.gmra.mxu2 %vm304_vm2, %v3292_v58  ;;  %v3562_v12 = vadd.f32 %v1221_v18, %v1033_v54  ;;  %v2625_v58 = vld [vmem:[%s2980_s4 + $0x109] sm:$0xff] }
 0x1dd   : > { %2647 = vmatmul.msk.bf16.gmra.mxu3 %vm304_vm2, %v1741_v19  ;;  %v1742_v41 = vpack.c.bf16 %v2626_v57, %v2625_v58 }
 0x1de   : > { %2695 = vmatmul.msk.bf16.gmra.mxu0 %vm304_vm2, %v3312_v26 }
 0x1df   : > { %v1589_v1 = vpop.f32.mrf.mxu2 }
 0x1e0   : > { %v1669_v38 = vadd.f32 %v1589_v1, %v1446_v22  ;;  %v1811_v45 = vpop.f32.mrf.mxu3  ;;  %v1368_v40 = vpop.f32.mrf.mxu1 }
 0x1e1   : > { %v1447_v37 = vadd.f32 %v1368_v40, %v3765_v48  ;;  %v2627_v40 = vld [vmem:[%s2980_s4 + $0x121] sm:$0xff] }
 0x1e2   : > { %v1891_v16 = vadd.f32 %v1811_v45, %v1669_v38  ;;  %v3766_v38 = vld [vmem:[#allocation20_spill] sm:$0xff] }
 0x1e3   : > { %v2035_v8 = vpop.f32.mrf.mxu0 }
 0x1e4   : > { %v2113_v61 = vadd.f32 %v2033_v62, %v1891_v16 }
 0x1e6   : > { %v2149_v11 = vadd.f32 %v3572_v33, %v2113_v61 }
 0x1e7   : > { %v1591_v2 = vpop.f32.mrf.mxu2 }
 0x1e8   : > { %v1670_v9 = vadd.f32 %v1591_v2, %v1447_v37  ;;  %v1813_v60 = vpop.f32.mrf.mxu3  ;;  %v1371_v18 = vpop.f32.mrf.mxu1  ;;  %v2181_v42 = vmax.f32 %v2149_v11, 0.0 }
 0x1e9   : > { %v1448_v50 = vadd.f32 %v1371_v18, %v3306_v29  ;;  %v2628_v29 = vld [vmem:[%s2980_s4 + $0x129] sm:$0xff] }
 0x1ea   : > { %v1892_v3 = vadd.f32 %v1813_v60, %v1670_v9  ;;  %v1743_v57 = vpack.c.bf16 %v2628_v29, %v2627_v40 }
 0x1eb   : > { %v2038_v39 = vpop.f32.mrf.mxu0  ;;  %2552 = vmatmul.msk.bf16.gmra.mxu1 %vm304_vm2, %v3312_v26 }
 0x1ec   : > { %v2114_v53 = vadd.f32 %v2035_v8, %v1892_v3  ;;  %2600 = vmatmul.msk.bf16.gmra.mxu2 %vm304_vm2, %v3314_v13 }
 0x1ed   : > { %2648 = vmatmul.msk.bf16.gmra.mxu3 %vm304_vm2, %v1742_v41 }
 0x1ee   : > { %2696 = vmatmul.msk.bf16.gmra.mxu0 %vm304_vm2, %v3334_v55  ;;  %v2150_v59 = vadd.f32 %v3572_v33, %v2114_v53 }
 0x1ef   : > { %v1594_v51 = vpop.f32.mrf.mxu2 }
 0x1f0   : > { %v2182_v19 = vmax.f32 %v2150_v59, 0.0  ;;  %v1671_v54 = vadd.f32 %v1594_v51, %v1448_v50  ;;  %v1816_v26 = vpop.f32.mrf.mxu3  ;;  %v1373_v13 = vpop.f32.mrf.mxu1 }
 0x1f1   : > { %v1449_v45 = vadd.f32 %v1373_v13, %v3766_v38 }
 0x1f2   : > { %v2708_v62 = vpack.c.bf16 %v2182_v19, %v2181_v42  ;;  %v1893_v1 = vadd.f32 %v1816_v26, %v1671_v54  ;;  %v3767_v42 = vld [vmem:[#allocation21_spill] sm:$0xff] }
 0x1f3   : > { %v2040_v22 = vpop.f32.mrf.mxu0  ;;  %v2629_v54 = vld [vmem:[%s2980_s4 + $0x139] sm:$0xff]  ;;  %v2630_v26 = vld [vmem:[%s2980_s4 + $0x141] sm:$0xff] }
 0x1f4   : > { %2709 = vst [vmem:[%s3587_s9] sm:$0xff] %v2708_v62   ;;  %v2115_v16 = vadd.f32 %v2038_v39, %v1893_v1 }
 0x1f6   : > { %v2151_v9 = vadd.f32 %v3572_v33, %v2115_v16 }
 0x1f7   : > { %v1596_v8 = vpop.f32.mrf.mxu2 }
 0x1f8   : > { %v1672_v48 = vadd.f32 %v1596_v8, %v1449_v45  ;;  %v1818_v37 = vpop.f32.mrf.mxu3  ;;  %v1376_v58 = vpop.f32.mrf.mxu1  ;;  %v2183_v39 = vmax.f32 %v2151_v9, 0.0 }
 0x1f9   : > { %v1450_v41 = vadd.f32 %v1376_v58, %v3328_v6  ;;  %v1744_v6 = vpack.c.bf16 %v2630_v26, %v2629_v54 }
 0x1fa   : > { %v1894_v2 = vadd.f32 %v1818_v37, %v1672_v48 }
 0x1fb   : > { %v2043_v61 = vpop.f32.mrf.mxu0  ;;  %2553 = vmatmul.msk.bf16.gmra.mxu1 %vm304_vm2, %v3334_v55 }
 0x1fc   : > { %v2116_v60 = vadd.f32 %v2040_v22, %v1894_v2  ;;  %2601 = vmatmul.msk.bf16.gmra.mxu2 %vm304_vm2, %v3336_v52 }
 0x1fd   : > { %2649 = vmatmul.msk.bf16.gmra.mxu3 %vm304_vm2, %v1743_v57 }
 0x1fe   : > { %2697 = vmatmul.msk.bf16.gmra.mxu0 %vm304_vm2, %v3356_v63  ;;  %v2152_v18 = vadd.f32 %v3572_v33, %v2116_v60 }
 0x1ff   : > { %v1599_v3 = vpop.f32.mrf.mxu2 }
 0x200   : > { %v2184_v11 = vmax.f32 %v2152_v18, 0.0  ;;  %v1673_v53 = vadd.f32 %v1599_v3, %v1450_v41  ;;  %v1821_v59 = vpop.f32.mrf.mxu3  ;;  %v1378_v55 = vpop.f32.mrf.mxu1  ;;  %v3768_v18 = vld [vmem:[#allocation22_spill] sm:$0xff]  ;;  %v2631_v3 = vld [vmem:[%s2980_s4 + $0x151] sm:$0xff] }
 0x201   : > { %v1451_v19 = vadd.f32 %v1378_v55, %v3767_v42 }
 0x202   : > { %v2713_v50 = vpack.c.bf16 %v2184_v11, %v2183_v39  ;;  %v1895_v52 = vadd.f32 %v1821_v59, %v1673_v53  ;;  %v2632_v39 = vld [vmem:[%s2980_s4 + $0x159] sm:$0xff] }
 0x203   : > { %v2045_v51 = vpop.f32.mrf.mxu0 }
 0x204   : > { %2785 = vst [vmem:[%s3587_s9 + $0x8] sm:$0xff] %v2713_v50   ;;  %v2117_v62 = vadd.f32 %v2043_v61, %v1895_v52 }
 0x206   : > { %v2153_v29 = vadd.f32 %v3572_v33, %v2117_v62 }
 0x207   : > { %v1601_v13 = vpop.f32.mrf.mxu2 }
 0x208   : > { %v1674_v22 = vadd.f32 %v1601_v13, %v1451_v19  ;;  %v1823_v1 = vpop.f32.mrf.mxu3  ;;  %v1381_v38 = vpop.f32.mrf.mxu1  ;;  %v2185_v58 = vmax.f32 %v2153_v29, 0.0 }
 0x209   : > { %v1452_v48 = vadd.f32 %v1381_v38, %v3350_v7  ;;  %v1745_v7 = vpack.c.bf16 %v2632_v39, %v2631_v3 }
 0x20a   : > { %v1896_v45 = vadd.f32 %v1823_v1, %v1674_v22 }
 0x20b   : > { %v2048_v40 = vpop.f32.mrf.mxu0  ;;  %2554 = vmatmul.msk.bf16.gmra.mxu1 %vm304_vm2, %v3356_v63 }
 0x20c   : > { %v2118_v8 = vadd.f32 %v2045_v51, %v1896_v45  ;;  %2602 = vmatmul.msk.bf16.gmra.mxu2 %vm304_vm2, %v3358_v5 }
 0x20d   : > { %2650 = vmatmul.msk.bf16.gmra.mxu3 %vm304_vm2, %v1744_v6 }
 0x20e   : > { %2698 = vmatmul.msk.bf16.gmra.mxu0 %vm304_vm2, %v3378_v35  ;;  %v2154_v16 = vadd.f32 %v3572_v33, %v2118_v8  ;;  %v2633_v8 = vld [vmem:[%s2980_s4 + $0x169] sm:$0xff] }
 0x20f   : > { %v1604_v37 = vpop.f32.mrf.mxu2 }
 0x210   : > { %v2186_v57 = vmax.f32 %v2154_v16, 0.0  ;;  %v1675_v2 = vadd.f32 %v1604_v37, %v1452_v48  ;;  %v1826_v61 = vpop.f32.mrf.mxu3  ;;  %v1383_v63 = vpop.f32.mrf.mxu1  ;;  %v2634_v16 = vld [vmem:[%s2980_s4 + $0x171] sm:$0xff] }
 0x211   : > { %v1453_v41 = vadd.f32 %v1383_v63, %v3768_v18  ;;  %v3770_v18 = vld [vmem:[#allocation24_spill] sm:$0xff] }
 0x212   : > { %v2718_v9 = vpack.c.bf16 %v2186_v57, %v2185_v58  ;;  %v1897_v5 = vadd.f32 %v1826_v61, %v1675_v2 }
 0x213   : > { %v2050_v60 = vpop.f32.mrf.mxu0 }
 0x214   : > { %2786 = vst [vmem:[%s3587_s9 + $0x10] sm:$0xff] %v2718_v9   ;;  %v2119_v53 = vadd.f32 %v2048_v40, %v1897_v5  ;;  %v3769_v40 = vld [vmem:[#allocation23_spill] sm:$0xff] }
 0x216   : > { %v2155_v42 = vadd.f32 %v3572_v33, %v2119_v53 }
 0x217   : > { %v1606_v11 = vpop.f32.mrf.mxu2 }
 0x218   : > { %v1676_v59 = vadd.f32 %v1606_v11, %v1453_v41  ;;  %v1828_v55 = vpop.f32.mrf.mxu3  ;;  %v1386_v50 = vpop.f32.mrf.mxu1  ;;  %v2187_v62 = vmax.f32 %v2155_v42, 0.0  ;;  %v2635_v42 = vld [vmem:[%s2980_s4 + $0x181] sm:$0xff] }
 0x219   : > { %v1454_v26 = vadd.f32 %v1386_v50, %v3371_v49  ;;  %v1746_v49 = vpack.c.bf16 %v2634_v16, %v2633_v8 }
 0x21a   : > { %v1898_v51 = vadd.f32 %v1828_v55, %v1676_v59 }
 0x21b   : > { %v2053_v52 = vpop.f32.mrf.mxu0  ;;  %2555 = vmatmul.msk.bf16.gmra.mxu1 %vm304_vm2, %v3378_v35 }
 0x21c   : > { %v2120_v19 = vadd.f32 %v2050_v60, %v1898_v51  ;;  %2603 = vmatmul.msk.bf16.gmra.mxu2 %vm304_vm2, %v3380_v15  ;;  %v2587_v51 = vld [vmem:[%s2980_s4 + $0x180] sm:$0xff] }
 0x21d   : > { %2651 = vmatmul.msk.bf16.gmra.mxu3 %vm304_vm2, %v1745_v7  ;;  %v2540_v7 = vld [vmem:[%s2980_s4 + $0x172] sm:$0xff] }
 0x21e   : > { %2699 = vmatmul.msk.bf16.gmra.mxu0 %vm304_vm2, %v3400_v47  ;;  %v2156_v54 = vadd.f32 %v3572_v33, %v2120_v19  ;;  %v3771_v19 = vld [vmem:[#allocation25_spill] sm:$0xff] }
 0x21f   : > { %v1609_v13 = vpop.f32.mrf.mxu2 }
 0x220   : > { %v2188_v22 = vmax.f32 %v2156_v54, 0.0  ;;  %v1677_v1 = vadd.f32 %v1609_v13, %v1454_v26  ;;  %v1831_v38 = vpop.f32.mrf.mxu3  ;;  %v1388_v35 = vpop.f32.mrf.mxu1  ;;  %v2636_v26 = vld [vmem:[%s2980_s4 + $0x189] sm:$0xff] }
 0x221   : > { %v1455_v29 = vadd.f32 %v1388_v35, %v3769_v40  ;;  %v2683_v13 = vld [vmem:[%s2980_s4 + $0x182] sm:$0xff]  ;;  %v1747_v40 = vpack.c.bf16 %v2636_v26, %v2635_v42 }
 0x222   : > { %v2723_v6 = vpack.c.bf16 %v2188_v22, %v2187_v62  ;;  %v1899_v15 = vadd.f32 %v1831_v38, %v1677_v1  ;;  %v2684_v62 = vld [vmem:[%s2980_s4 + $0x18a] sm:$0xff] }
 0x223   : > { %v2055_v45 = vpop.f32.mrf.mxu0 }
 0x224   : > { %2787 = vst [vmem:[%s3587_s9 + $0x18] sm:$0xff] %v2723_v6   ;;  %v2121_v37 = vadd.f32 %v2053_v52, %v1899_v15  ;;  %v2588_v52 = vld [vmem:[%s2980_s4 + $0x188] sm:$0xff] }
 0x226   : > { %v2157_v9 = vadd.f32 %v3572_v33, %v2121_v37 }
 0x227   : > { %v1611_v48 = vpop.f32.mrf.mxu2 }
 0x228   : > { %v1678_v58 = vadd.f32 %v1611_v48, %v1455_v29  ;;  %v1833_v57 = vpop.f32.mrf.mxu3  ;;  %v1391_v2 = vpop.f32.mrf.mxu1  ;;  %v1969_v29 = vpack.c.bf16 %v2684_v62, %v2683_v13 }
 0x229   : > { %v1456_v41 = vadd.f32 %v1391_v2, %v3770_v18 }
 0x22a   : > { %v1900_v61 = vadd.f32 %v1833_v57, %v1678_v58 }
 0x22b   : > { %v2058_v63 = vpop.f32.mrf.mxu0  ;;  %2556 = vmatmul.msk.bf16.gmra.mxu1 %vm304_vm2, %v3400_v47  ;;  %v2189_v47 = vmax.f32 %v2157_v9, 0.0 }
 0x22c   : > { %v2122_v60 = vadd.f32 %v2055_v45, %v1900_v61  ;;  %2604 = vmatmul.msk.bf16.gmra.mxu2 %vm304_vm2, %v3402_v43  ;;  %v1525_v45 = vpack.c.bf16 %v2588_v52, %v2587_v51 }
 0x22d   : > { %2652 = vmatmul.msk.bf16.gmra.mxu3 %vm304_vm2, %v1746_v49 }
 0x22e   : > { %2700 = vmatmul.msk.bf16.gmra.mxu0 %vm304_vm2, %v3424_v14  ;;  %v2158_v5 = vadd.f32 %v3572_v33, %v2122_v60  ;;  %v2539_v14 = vld [vmem:[%s2980_s4 + $0x16a] sm:$0xff] }
 0x22f   : > { %v1614_v3 = vpop.f32.mrf.mxu2  ;;  %v1302_v6 = vpack.c.bf16 %v2540_v7, %v2539_v14 }
 0x230   : > { %v2190_v39 = vmax.f32 %v2158_v5, 0.0  ;;  %v1679_v43 = vadd.f32 %v1614_v3, %v1456_v41  ;;  %v1836_v11 = vpop.f32.mrf.mxu3  ;;  %v1393_v53 = vpop.f32.mrf.mxu1  ;;  %v2589_v3 = vld [vmem:[%s2980_s4 + $0x198] sm:$0xff] }
 0x231   : > { %v1457_v54 = vadd.f32 %v1393_v53, %v3771_v19  ;;  %v2685_v53 = vld [vmem:[%s2980_s4 + $0x19a] sm:$0xff] }
 0x232   : > { %v2728_v59 = vpack.c.bf16 %v2190_v39, %v2189_v47  ;;  %v1901_v50 = vadd.f32 %v1836_v11, %v1679_v43  ;;  %v2590_v47 = vld [vmem:[%s2980_s4 + $0x1a0] sm:$0xff] }
 0x233   : > { %v2060_v55 = vpop.f32.mrf.mxu0  ;;  %v2637_v39 = vld [vmem:[%s2980_s4 + $0x199] sm:$0xff]  ;;  %v2638_v11 = vld [vmem:[%s2980_s4 + $0x1a1] sm:$0xff]  ;;  %v1526_v7 = vpack.c.bf16 %v2590_v47, %v2589_v3 }
 0x234   : > { %2788 = vst [vmem:[%s3587_s9 + $0x20] sm:$0xff] %v2728_v59   ;;  %v2123_v1 = vadd.f32 %v2058_v63, %v1901_v50  ;;  %v1748_v52 = vpack.c.bf16 %v2638_v11, %v2637_v39 }
 0x236   : > { %v2159_v48 = vadd.f32 %v3572_v33, %v2123_v1 }
 0x237   : > { %v1616_v22 = vpop.f32.mrf.mxu2 }
 0x238   : > { %v1680_v38 = vadd.f32 %v1616_v22, %v1457_v54  ;;  %v1838_v35 = vpop.f32.mrf.mxu3  ;;  %v1396_v15 = vpop.f32.mrf.mxu1  ;;  %v2191_v49 = vmax.f32 %v2159_v48, 0.0 }
 0x239   : > { %v1458_v57 = vadd.f32 %v1396_v15, %v3415_v34  ;;  %v2686_v34 = vld [vmem:[%s2980_s4 + $0x1a2] sm:$0xff] }
 0x23a   : > { %v1902_v8 = vadd.f32 %v1838_v35, %v1680_v38  ;;  %v1970_v42 = vpack.c.bf16 %v2686_v34, %v2685_v53 }
 0x23b   : > { %v2063_v16 = vpop.f32.mrf.mxu0  ;;  %2557 = vmatmul.msk.bf16.gmra.mxu1 %vm304_vm2, %v1302_v6 }
 0x23c   : > { %v2124_v37 = vadd.f32 %v2060_v55, %v1902_v8  ;;  %2605 = vmatmul.msk.bf16.gmra.mxu2 %vm304_vm2, %v1525_v45 }
 0x23d   : > { %2653 = vmatmul.msk.bf16.gmra.mxu3 %vm304_vm2, %v1747_v40 }
 0x23e   : > { %2701 = vmatmul.msk.bf16.gmra.mxu0 %vm304_vm2, %v1969_v29  ;;  %v2160_v58 = vadd.f32 %v3572_v33, %v2124_v37 }
 0x23f   : > { %v1619_v2 = vpop.f32.mrf.mxu2 }
 0x240   : > { %v2192_v61 = vmax.f32 %v2160_v58, 0.0  ;;  %v1681_v63 = vadd.f32 %v1619_v2, %v1458_v57  ;;  %v1841_v9 = vpop.f32.mrf.mxu3  ;;  %v1398_v60 = vpop.f32.mrf.mxu1 }
 0x241   : > { %v1459_v43 = vadd.f32 %v1398_v60, %v3430_v20 }
 0x242   : > { %v2733_v5 = vpack.c.bf16 %v2192_v61, %v2191_v49  ;;  %v1903_v41 = vadd.f32 %v1841_v9, %v1681_v63 }
 0x243   : > { %v2065_v18 = vpop.f32.mrf.mxu0 }
 0x244   : > { %2789 = vst [vmem:[%s3587_s9 + $0x28] sm:$0xff] %v2733_v5   ;;  %v2125_v55 = vadd.f32 %v2063_v16, %v1903_v41 }
 0x246   : > { %v2161_v26 = vadd.f32 %v3572_v33, %v2125_v55 }
 0x247   : > { %v1621_v59 = vpop.f32.mrf.mxu2 }
 0x248   : > { %v1682_v50 = vadd.f32 %v1621_v59, %v1459_v43  ;;  %v1843_v14 = vpop.f32.mrf.mxu3  ;;  %v1401_v51 = vpop.f32.mrf.mxu1  ;;  %v2193_v1 = vmax.f32 %v2161_v26, 0.0 }
 0x249   : > { %v1460_v62 = vadd.f32 %v1401_v51, %v3435_v46 }
 0x24a   : > { %v1904_v19 = vadd.f32 %v1843_v14, %v1682_v50 }
 0x24b   : > { %v2068_v54 = vpop.f32.mrf.mxu0  ;;  %2558 = vmatmul.msk.bf16.gmra.mxu1 %vm304_vm2, %v1969_v29 }
 0x24c   : > { %v2126_v13 = vadd.f32 %v2065_v18, %v1904_v19  ;;  %2606 = vmatmul.msk.bf16.gmra.mxu2 %vm304_vm2, %v1526_v7 }
 0x24d   : > { %2654 = vmatmul.msk.bf16.gmra.mxu3 %vm304_vm2, %v1748_v52 }
 0x24e   : > { %2702 = vmatmul.msk.bf16.gmra.mxu0 %vm304_vm2, %v1970_v42  ;;  %v2162_v20 = vadd.f32 %v3572_v33, %v2126_v13 }
 0x24f   : > { %v1624_v22 = vpop.f32.mrf.mxu2 }
 0x250   : > { %v2194_v38 = vmax.f32 %v2162_v20, 0.0  ;;  %v1683_v35 = vadd.f32 %v1624_v22, %v1460_v62  ;;  %v1846_v6 = vpop.f32.mrf.mxu3  ;;  %v1403_v45 = vpop.f32.mrf.mxu1 }
 0x251   : > { %v1461_v8 = vadd.f32 %v1403_v45, %v3442_v32 }
 0x252   : > { %v2738_v15 = vpack.c.bf16 %v2194_v38, %v2193_v1  ;;  %v1905_v29 = vadd.f32 %v1846_v6, %v1683_v35 }
 0x253   : > { %v2070_v40 = vpop.f32.mrf.mxu0 }
 0x254   : > { %2790 = vst [vmem:[%s3587_s9 + $0x30] sm:$0xff] %v2738_v15   ;;  %v2127_v48 = vadd.f32 %v2068_v54, %v1905_v29 }
 0x256   : > { %v2163_v49 = vadd.f32 %v3572_v33, %v2127_v48 }
 0x257   : > { %v1626_v16 = vpop.f32.mrf.mxu2 }
 0x258   : > { %v1684_v37 = vadd.f32 %v1626_v16, %v1461_v8  ;;  %v1848_v58 = vpop.f32.mrf.mxu3  ;;  %v1406_v57 = vpop.f32.mrf.mxu1  ;;  %v2195_v5 = vmax.f32 %v2163_v49, 0.0 }
 0x259   : > { %v1462_v9 = vadd.f32 %v1406_v57, %v3449_v21 }
 0x25a   : > { %v1906_v2 = vadd.f32 %v1848_v58, %v1684_v37 }
 0x25b   : > { %v2073_v46 = vpop.f32.mrf.mxu0 }
 0x25c   : > { %v2128_v61 = vadd.f32 %v2070_v40, %v1906_v2 }
 0x25e   : > { %v2164_v63 = vadd.f32 %v3572_v33, %v2128_v61 }
 0x25f   : > { %v1629_v60 = vpop.f32.mrf.mxu2 }
 0x260   : > { %v2196_v18 = vmax.f32 %v2164_v63, 0.0  ;;  %v1685_v41 = vadd.f32 %v1629_v60, %v1462_v9  ;;  %v1851_v32 = vpop.f32.mrf.mxu3  ;;  %v1408_v3 = vpop.f32.mrf.mxu1 }
 0x261   : > { %v1463_v11 = vadd.f32 %v1408_v3, %v3456_v10 }
 0x262   : > { %v2743_v47 = vpack.c.bf16 %v2196_v18, %v2195_v5  ;;  %v1907_v43 = vadd.f32 %v1851_v32, %v1685_v41 }
 0x263   : > { %v2075_v39 = vpop.f32.mrf.mxu0 }
 0x264   : > { %2791 = vst [vmem:[%s3587_s9 + $0x38] sm:$0xff] %v2743_v47   ;;  %v2129_v34 = vadd.f32 %v2073_v46, %v1907_v43 }
 0x266   : > { %v2165_v7 = vadd.f32 %v3572_v33, %v2129_v34 }
 0x267   : > { %v1631_v53 = vpop.f32.mrf.mxu2 }
 0x268   : > { %v1686_v59 = vadd.f32 %v1631_v53, %v1463_v11  ;;  %v1853_v55 = vpop.f32.mrf.mxu3  ;;  %v1411_v50 = vpop.f32.mrf.mxu1  ;;  %v2197_v54 = vmax.f32 %v2165_v7, 0.0 }
 0x269   : > { %v1464_v42 = vadd.f32 %v1411_v50, %v3463_v27 }
 0x26a   : > { %v1908_v14 = vadd.f32 %v1853_v55, %v1686_v59 }
 0x26b   : > { %v2078_v21 = vpop.f32.mrf.mxu0 }
 0x26c   : > { %v2130_v51 = vadd.f32 %v2075_v39, %v1908_v14 }
 0x26e   : > { %v2166_v52 = vadd.f32 %v3572_v33, %v2130_v51 }
 0x26f   : > { %v1634_v19 = vpop.f32.mrf.mxu2 }
 0x270   : > { %v2198_v26 = vmax.f32 %v2166_v52, 0.0  ;;  %v1687_v13 = vadd.f32 %v1634_v19, %v1464_v42  ;;  %v1856_v10 = vpop.f32.mrf.mxu3  ;;  %v1413_v20 = vpop.f32.mrf.mxu1 }
 0x271   : > { %v1465_v38 = vadd.f32 %v1413_v20, %v3472_v0 }
 0x272   : > { %v2748_v62 = vpack.c.bf16 %v2198_v26, %v2197_v54  ;;  %v1909_v1 = vadd.f32 %v1856_v10, %v1687_v13 }
 0x273   : > { %v2080_v22 = vpop.f32.mrf.mxu0 }
 0x274   : > { %2792 = vst [vmem:[%s3587_s9 + $0x40] sm:$0xff] %v2748_v62   ;;  %v2131_v6 = vadd.f32 %v2078_v21, %v1909_v1 }
 0x276   : > { %v2167_v8 = vadd.f32 %v3572_v33, %v2131_v6 }
 0x277   : > { %v1636_v35 = vpop.f32.mrf.mxu2 }
 0x278   : > { %v1688_v45 = vadd.f32 %v1636_v35, %v1465_v38  ;;  %v1858_v15 = vpop.f32.mrf.mxu3  ;;  %v1416_v40 = vpop.f32.mrf.mxu1  ;;  %v2199_v57 = vmax.f32 %v2167_v8, 0.0 }
 0x279   : > { %v1466_v37 = vadd.f32 %v1416_v40, %v3478_v24 }
 0x27a   : > { %v1910_v29 = vadd.f32 %v1858_v15, %v1688_v45 }
 0x27b   : > { %v2083_v27 = vpop.f32.mrf.mxu0 }
 0x27c   : > { %v2132_v16 = vadd.f32 %v2080_v22, %v1910_v29 }
 0x27e   : > { %v2168_v48 = vadd.f32 %v3572_v33, %v2132_v16 }
 0x27f   : > { %v1639_v58 = vpop.f32.mrf.mxu2 }
 0x280   : > { %v2200_v2 = vmax.f32 %v2168_v48, 0.0  ;;  %v1689_v46 = vadd.f32 %v1639_v58, %v1466_v37  ;;  %v1861_v0 = vpop.f32.mrf.mxu3  ;;  %v1418_v49 = vpop.f32.mrf.mxu1 }
 0x281   : > { %v1467_v60 = vadd.f32 %v1418_v49, %v3487_v28 }
 0x282   : > { %v2753_v61 = vpack.c.bf16 %v2200_v2, %v2199_v57  ;;  %v1911_v9 = vadd.f32 %v1861_v0, %v1689_v46 }
 0x283   : > { %v2085_v63 = vpop.f32.mrf.mxu0 }
 0x284   : > { %2793 = vst [vmem:[%s3587_s9 + $0x48] sm:$0xff] %v2753_v61   ;;  %v2133_v18 = vadd.f32 %v2083_v27, %v1911_v9 }
 0x286   : > { %v2169_v39 = vadd.f32 %v3572_v33, %v2133_v18 }
 0x287   : > { %v1641_v5 = vpop.f32.mrf.mxu2 }
 0x288   : > { %v1690_v41 = vadd.f32 %v1641_v5, %v1467_v60  ;;  %v1863_v32 = vpop.f32.mrf.mxu3  ;;  %v1421_v3 = vpop.f32.mrf.mxu1  ;;  %v2201_v59 = vmax.f32 %v2169_v39, 0.0 }
 0x289   : > { %v1468_v53 = vadd.f32 %v1421_v3, %v3493_v31 }
 0x28a   : > { %v1912_v47 = vadd.f32 %v1863_v32, %v1690_v41 }
 0x28b   : > { %v2088_v24 = vpop.f32.mrf.mxu0 }
 0x28c   : > { %v2134_v43 = vadd.f32 %v2085_v63, %v1912_v47 }
 0x28e   : > { %v2170_v11 = vadd.f32 %v3572_v33, %v2134_v43 }
 0x28f   : > { %v1644_v34 = vpop.f32.mrf.mxu2 }
 0x290   : > { %v2202_v55 = vmax.f32 %v2170_v11, 0.0  ;;  %v1691_v50 = vadd.f32 %v1644_v34, %v1468_v53  ;;  %v1866_v28 = vpop.f32.mrf.mxu3  ;;  %v1423_v14 = vpop.f32.mrf.mxu1 }
 0x291   : > { %v1469_v52 = vadd.f32 %v1423_v14, %v3502_v25 }
 0x292   : > { %v2758_v21 = vpack.c.bf16 %v2202_v55, %v2201_v59  ;;  %v1913_v51 = vadd.f32 %v1866_v28, %v1691_v50 }
 0x293   : > { %v2090_v7 = vpop.f32.mrf.mxu0 }
 0x294   : > { %2794 = vst [vmem:[%s3587_s9 + $0x50] sm:$0xff] %v2758_v21   ;;  %v2135_v19 = vadd.f32 %v2088_v24, %v1913_v51 }
 0x296   : > { %v2171_v20 = vadd.f32 %v3572_v33, %v2135_v19 }
 0x297   : > { %v1646_v42 = vpop.f32.mrf.mxu2 }
 0x298   : > { %v1692_v54 = vadd.f32 %v1646_v42, %v1469_v52  ;;  %v1868_v26 = vpop.f32.mrf.mxu3  ;;  %v1426_v13 = vpop.f32.mrf.mxu1  ;;  %v2203_v35 = vmax.f32 %v2171_v20, 0.0 }
 0x299   : > { %v1470_v1 = vadd.f32 %v1426_v13, %v3508_v23 }
 0x29a   : > { %v1914_v10 = vadd.f32 %v1868_v26, %v1692_v54 }
 0x29b   : > { %v2093_v31 = vpop.f32.mrf.mxu0 }
 0x29c   : > { %v2136_v62 = vadd.f32 %v2090_v7, %v1914_v10 }
 0x29e   : > { %v2172_v22 = vadd.f32 %v3572_v33, %v2136_v62 }
 0x29f   : > { %v1649_v38 = vpop.f32.mrf.mxu2 }
 0x2a0   : > { %v2204_v6 = vmax.f32 %v2172_v22, 0.0  ;;  %v1693_v45 = vadd.f32 %v1649_v38, %v1470_v1  ;;  %v1871_v25 = vpop.f32.mrf.mxu3  ;;  %v1428_v15 = vpop.f32.mrf.mxu1 }
 0x2a1   : > { %v1471_v8 = vadd.f32 %v1428_v15, %v3517_v4 }
 0x2a2   : > { %v2763_v40 = vpack.c.bf16 %v2204_v6, %v2203_v35  ;;  %v1915_v27 = vadd.f32 %v1871_v25, %v1693_v45 }
 0x2a3   : > { %v2095_v29 = vpop.f32.mrf.mxu0 }
 0x2a4   : > { %2795 = vst [vmem:[%s3587_s9 + $0x58] sm:$0xff] %v2763_v40   ;;  %v2137_v48 = vadd.f32 %v2093_v31, %v1915_v27 }
 0x2a6   : > { %v2173_v46 = vadd.f32 %v3572_v33, %v2137_v48 }
 0x2a7   : > { %v1651_v16 = vpop.f32.mrf.mxu2 }
 0x2a8   : > { %v1694_v37 = vadd.f32 %v1651_v16, %v1471_v8  ;;  %v1873_v58 = vpop.f32.mrf.mxu3  ;;  %v1431_v57 = vpop.f32.mrf.mxu1  ;;  %v2205_v9 = vmax.f32 %v2173_v46, 0.0 }
 0x2a9   : > { %v1472_v61 = vadd.f32 %v1431_v57, %v3523_v56 }
 0x2aa   : > { %v1916_v2 = vadd.f32 %v1873_v58, %v1694_v37 }
 0x2ab   : > { %v2098_v23 = vpop.f32.mrf.mxu0 }
 0x2ac   : > { %v2138_v0 = vadd.f32 %v2095_v29, %v1916_v2 }
 0x2ae   : > { %v2174_v49 = vadd.f32 %v3572_v33, %v2138_v0 }
 0x2af   : > { %v1654_v63 = vpop.f32.mrf.mxu2 }
 0x2b0   : > { %v2206_v60 = vmax.f32 %v2174_v49, 0.0  ;;  %v1695_v5 = vadd.f32 %v1654_v63, %v1472_v61  ;;  %v1876_v4 = vpop.f32.mrf.mxu3  ;;  %v1433_v18 = vpop.f32.mrf.mxu1 }
 0x2b1   : > { %v1473_v47 = vadd.f32 %v1433_v18, %v3532_v17 }
 0x2b2   : > { %v2768_v41 = vpack.c.bf16 %v2206_v60, %v2205_v9  ;;  %v1917_v3 = vadd.f32 %v1876_v4, %v1695_v5 }
 0x2b3   : > { %v2100_v32 = vpop.f32.mrf.mxu0 }
 0x2b4   : > { %2796 = vst [vmem:[%s3587_s9 + $0x60] sm:$0xff] %v2768_v41   ;;  %v2139_v39 = vadd.f32 %v2098_v23, %v1917_v3 }
 0x2b6   : > { %v2175_v56 = vadd.f32 %v3572_v33, %v2139_v39 }
 0x2b7   : > { %v1656_v24 = vpop.f32.mrf.mxu2 }
 0x2b8   : > { %v1696_v43 = vadd.f32 %v1656_v24, %v1473_v47  ;;  %v1878_v11 = vpop.f32.mrf.mxu3  ;;  %v1436_v53 = vpop.f32.mrf.mxu1  ;;  %v2207_v21 = vmax.f32 %v2175_v56, 0.0 }
 0x2b9   : > { %v1474_v28 = vadd.f32 %v1436_v53, %v3538_v44 }
 0x2ba   : > { %v1918_v34 = vadd.f32 %v1878_v11, %v1696_v43 }
 0x2bb   : > { %v2103_v55 = vpop.f32.mrf.mxu0 }
 0x2bc   : > { %v2140_v59 = vadd.f32 %v2100_v32, %v1918_v34 }
 0x2be   : > { %v2176_v50 = vadd.f32 %v3572_v33, %v2140_v59 }
 0x2bf   : > { %v1659_v14 = vpop.f32.mrf.mxu2 }
 0x2c0   : > { %v2208_v7 = vmax.f32 %v2176_v50, 0.0  ;;  %v1697_v51 = vadd.f32 %v1659_v14, %v1474_v28  ;;  %v1881_v17 = vpop.f32.mrf.mxu3  ;;  %v1438_v52 = vpop.f32.mrf.mxu1 }
 0x2c1   : > { %v1475_v54 = vadd.f32 %v1438_v52, %v3547_v36 }
 0x2c2   : > { %v2773_v42 = vpack.c.bf16 %v2208_v7, %v2207_v21  ;;  %v1919_v19 = vadd.f32 %v1881_v17, %v1697_v51 }
 0x2c3   : > { %v2105_v26 = vpop.f32.mrf.mxu0 }
 0x2c4   : > { %2797 = vst [vmem:[%s3587_s9 + $0x68] sm:$0xff] %v2773_v42   ;;  %v2141_v10 = vadd.f32 %v2103_v55, %v1919_v19 }
 0x2c6   : > { %v2177_v44 = vadd.f32 %v3572_v33, %v2141_v10 }
 0x2c7   : > { %v1661_v13 = vpop.f32.mrf.mxu2 }
 0x2c8   : > { %v1698_v31 = vadd.f32 %v1661_v13, %v1475_v54  ;;  %v1883_v20 = vpop.f32.mrf.mxu3  ;;  %v1441_v62 = vpop.f32.mrf.mxu1  ;;  %v2209_v45 = vmax.f32 %v2177_v44, 0.0 }
 0x2c9   : > { %v1476_v35 = vadd.f32 %v1441_v62, %v3553_v30 }
 0x2ca   : > { %v1920_v22 = vadd.f32 %v1883_v20, %v1698_v31 }
 0x2cb   : > { %v2108_v40 = vpop.f32.mrf.mxu0 }
 0x2cc   : > { %v2142_v1 = vadd.f32 %v2105_v26, %v1920_v22 }
 0x2ce   : > { %v2178_v38 = vadd.f32 %v3572_v33, %v2142_v1 }
 0x2cf   : > { %v1664_v6 = vpop.f32.mrf.mxu2 }
 0x2d0   : > { %v2210_v25 = vmax.f32 %v2178_v38, 0.0  ;;  %v1699_v15 = vadd.f32 %v1664_v6, %v1476_v35  ;;  %v1886_v36 = vpop.f32.mrf.mxu3  ;;  %v1443_v27 = vpop.f32.mrf.mxu1 }
 0x2d1   : > { %v1477_v16 = vadd.f32 %v1443_v27, %v3562_v12 }
 0x2d2   : > { %v2778_v29 = vpack.c.bf16 %v2210_v25, %v2209_v45  ;;  %v1921_v8 = vadd.f32 %v1886_v36, %v1699_v15 }
 0x2d3   : > { %v2110_v23 = vpop.f32.mrf.mxu0 }
 0x2d4   : > { %2798 = vst [vmem:[%s3587_s9 + $0x70] sm:$0xff] %v2778_v29   ;;  %v2143_v37 = vadd.f32 %v2108_v40, %v1921_v8 }
 0x2d6   : > { %v2179_v30 = vadd.f32 %v3572_v33, %v2143_v37 }
 0x2d7   : > { %v1666_v48 = vpop.f32.mrf.mxu2 }
 0x2d8   : > { %v1700_v58 = vadd.f32 %v1666_v48, %v1477_v16  ;;  %v1888_v57 = vpop.f32.mrf.mxu3  ;;  %v2211_v49 = vmax.f32 %v2179_v30, 0.0 }
 0x2da   : > { %v1922_v2 = vadd.f32 %v1888_v57, %v1700_v58 }
 0x2dc   : > { %v2144_v46 = vadd.f32 %v2110_v23, %v1922_v2 }
 0x2de   : > { %v2180_v0 = vadd.f32 %v3572_v33, %v2144_v46 }
 0x2e0   : > { %v2212_v61 = vmax.f32 %v2180_v0, 0.0 }
 0x2e2   : > { %v2783_v63 = vpack.c.bf16 %v2212_v61, %v2211_v49 }
 0x2e4   : > { %2799 = vst [vmem:[%s3587_s9 + $0x78] sm:$0xff] %v2783_v63  }
 0x2e5 PF: > { %s15_s12 = sadd.s32 1, %s2911_s12  }
 0x2e6   : > { %p12_p8 = scmp.ge.s32.totalorder %s15_s12, 4  }
 0x2e8   :  { %14 = sbr.rel (!%p12_p8) target bundleno = 2 (0x2), region = 81 }
 0x2ed   :  { %2299 = vsyncpa [#allocation3], 1 }
 0x2ee   :  { %2301 = vsyncpa [#allocation3 + $0x1], 1 }
 0x2ef   :  { %2302 = vsyncpa [#allocation5], 1 }

// kernel: encoder_image_full.3
= control target key start
LH: loop header
LB: loop body
LE: loop exit
PB: predicated region body
PF: predicated region fallthrough
CT: control target
= control target key end

     0   :  { %10 = vsyncpa [#allocation4], 0  ;;  %s5033_s0 = inlined_call_operand.vmem [shape: bf16[2,32768], index: 0, kind: input, shape index: {}]   ;;  %s5034_s1 = inlined_call_operand.hbm [shape: bf16[32768,256], index: 1, kind: input, shape index: {}]   ;;  %s5035_s2 = inlined_call_operand.hbm [shape: f32[1,256], index: 2, kind: input, shape index: {}]   ;;  %s5036_s3 = inlined_call_operand.hbm [shape: bf16[256,128], index: 3, kind: input, shape index: {}]   ;;  %s5037_s4 = inlined_call_operand.hbm [shape: f32[1,128], index: 4, kind: input, shape index: {}]   ;;  %s5038_s5 = inlined_call_operand.hbm [shape: f32[2,128], index: 5, kind: output, shape index: {}]  }
   0x1   :  { %12 = vsyncpa [#allocation4 + $0x1], 0 }
   0x2   :  { %13 = vsyncpa [#allocation7], 0 }
   0x3   :  { %14 = vsyncpa [#allocation10], 0 }
   0x4   :  { %15 = vsyncpa [#allocation5], 0  ;;  %s4342_s18 = smov 0   ;;  %s4344_s19 = smov 0  }
   0x5   :  { %s4346_s20 = smov 0   ;;  %s4348_s21 = smov 0  }
   0x6 LB: > { %s4361_s22 = sadd.s32 4294967295, %s4300_s21   ;;  %p67_p0 = scmp.ne.s32.totalorder %s4292_s19, %s4288_s18  ;;  %s4300_s21 = sphi %s4348_s21, %s5043_s21   ;;  %s4296_s20 = sphi %s4346_s20, %s5046_s20   ;;  %s4292_s19 = sphi %s4344_s19, %s5045_s19   ;;  %s4288_s18 = sphi %s4342_s18, %s5044_s18  }
   0x7   : > { %p68_p1 = scmp.eq.s32.totalorder %s4361_s22, 0  ;;  %p2627_p2 = scmp.ge.s32.totalorder %s4300_s21, 1 }
   0x8   : > { %p162_p3 = scmp.lt.s32.totalorder %s4300_s21, 17  ;;  %p2628_p4 = scmp.ne.s32.totalorder %s4361_s22, 0 }
   0x9   : > { %p4370_p5 = por %p68_p1, %p67_p0  ;;  %s174_s26 = sshll.u32 %s5035_s2, 4  ;;  %s175_s26 = int_to_ptr.hbm [resolvable:$true] %s174_s26 }
   0xa   : > { %p4377_p6 = pnand %p2627_p2, %p162_p3  ;;  %s4302_s28 = smov [#allocation6]  }
   0xb   : > { %s176_s29 = sshll.u32 %s4302_s28, 4  ;;  %s185_s7 = sshll.u32 %s5036_s3, 4  ;;  %s177_s29 = int_to_ptr.vmem [resolvable:$true] %s176_s29  ;;  %s186_s7 = int_to_ptr.hbm [resolvable:$true] %s185_s7 }
   0xc   : > { %p4028_p7 = pneg %p4377_p6  ;;  %s4303_s9 = smov [#allocation8]  }
   0xd   : > { %s187_s10 = sshll.u32 %s4303_s9, 4  ;;  %s4304_s11 = smov 64   ;;  %s188_s10 = int_to_ptr.vmem [resolvable:$true] %s187_s10 }
   0xe   : > { %p4388_p8 = pnand %p4028_p7, %p68_p1  ;;  %s4305_s12 = smov 4  }
   0xf   : > { %s200_s15 = sshll.u32 %s5037_s4, 4  ;;  %s4306_s16 = smov [#allocation9]   ;;  %s201_s15 = int_to_ptr.hbm [resolvable:$true] %s200_s15 }
  0x10   : > { %4031 = dma.hbm_to_vmem [thread:$0]  (!%p4388_p8), %s175_s26, 32, %s177_s29, [#allocation7]  }
  0x11   : > { %4034 = dma.hbm_to_vmem [thread:$0]  (!%p4388_p8), %s186_s7, 2048, %s188_s10, [#allocation7], %s4304_s11, %s4304_s11, %s4305_s12  }
  0x12   : > { %s202_s17 = sshll.u32 %s4306_s16, 4  ;;  %s4402_s18 = sadd.s32 1, %s4300_s21   ;;  %s203_s17 = int_to_ptr.vmem [resolvable:$true] %s202_s17 }
  0x13   : > { %4037 = dma.hbm_to_vmem [thread:$0]  (!%p4388_p8), %s201_s15, 16, %s203_s17, [#allocation10]  }
  0x14   : > { %s51_s24 = ssub.s32 %s4300_s21, %s4402_s18  ;;  %s54_s25 = sadd.s32 1, %s4296_s20 }
  0x15   : > { %p52_p9 = scmp.eq.s32.totalorder %s51_s24, 0  ;;  %p61_p10 = scmp.ne.s32.totalorder %s4296_s20, %s4292_s19 }
  0x16   : > { %p62_p11 = scmp.eq.s32.totalorder %s4300_s21, 0  ;;  %p4045_p12 = scmp.lt.s32.totalorder %s4300_s21, 16 }
  0x17   : > { %s4412_s26 = scalar_select %p52_p9, %s4296_s20, %s54_s25  }
  0x18   : > { %p63_p13 = por %p62_p11, %p61_p10  ;;  %s221_s28 = sand.u32 1, %s4296_s20  }
  0x19   : > { %s2632_s29 = sshll.u32 %s221_s28, 11  ;;  %s3737_s30 = sshll.u32 %s4300_s21, 11 }
  0x1a   : > { %s231_s8 = scalar_lea.hbm %s5034_s1, %s3737_s30  ;;  %s225_s9 = scalar_lea.vmem [#allocation3], %s2632_s29 }
  0x1b   : > { %s234_s10 = sshll.u32 %s225_s9, 4  ;;  %s232_s11 = sshll.u32 %s231_s8, 4  ;;  %s235_s10 = int_to_ptr.vmem [resolvable:$true] %s234_s10  ;;  %s233_s11 = int_to_ptr.hbm [resolvable:$true] %s232_s11 }
  0x1c   : > { %p4419_p0 = pnand %p4045_p12, %p63_p13  ;;  %s222_s13 = scalar_lea.sflag [#allocation4], %s221_s28 }
  0x1d   : > { %s4196_s14 = sshra.s32 %s233_s11, 4  ;;  %s4203_s17 = scalar_lea.hbm %s5034_s1, 32768  ;;  %s4197_s14 = int_to_ptr.hbm [resolvable:$true] %s4196_s14 }
  0x1e   : > { %s4198_s15 = scalar_lea.hbm %s4197_s14, 2048  ;;  %p4200_p3 = pneg %p4419_p0 }
  0x1f   : > { %p4199_p2 = scmp.ne.s32.totalorder %s4197_s14, %s4198_s15  ;;  %p4204_p9 = scmp.lt.s32.totalorder %s4197_s14, %s5034_s1 }
  0x20   : > { %p4205_p10 = scmp.lt.s32.totalorder %s4203_s17, %s4198_s15 }
  0x21   : > { %p4201_p7 = pnand %p4200_p3, %p4199_p2 }
  0x22   : > { %p4206_p11 = por %p4205_p10, %p4204_p9 }
  0x23   : > { %p4202_p8 = pneg %p4201_p7 }
  0x25   : > { %p4207_p12 = pnand %p4206_p11, %p4202_p8 }
  0x27   : > { %4210 = shalt.err (!%p4207_p12)
}
  0x28   : > { %s4307_s28 = smov 128   ;;  %s4308_s29 = smov 8  }
  0x29   : > { %4041 = dma.hbm_to_vmem [thread:$0]  (!%p4419_p0), %s233_s11, 32768, %s235_s10, %s222_s13, %s4307_s28, %s4307_s28, %s4308_s29  }
  0x2a   : > { %246 = sbr.rel (%p4377_p6) target bundleno = 908 (0x38c), region = 40  ;;  %s248_s30 = sand.u32 (!%p4377_p6), 1, %s4292_s19  }
  0x2b   : > { %s2637_s6 = sshll.u32 (!%p4377_p6), %s248_s30, 11  ;;  %s249_s7 = scalar_lea.sflag (!%p4377_p6), [#allocation4], %s248_s30 }
  0x2c   : > { %s4436_s8 = scalar_lea.vmem (!%p4377_p6), [#allocation3], %s2637_s6 }
  0x2f   : > { %4271 = dma.done.wait (%p4370_p5), %s249_s7, 32768  }
  0x30   : > { %4273 = vsyncadd (%p4370_p5), %s249_s7, 4294934528 }
  0x31   : > { %4275 = dma.done.wait (%p68_p1), [#allocation7], 2080  }
  0x32   : > { %4277 = vsyncadd (%p68_p1), [#allocation7], 4294965216 }
  0x33   : > { %4279 = dma.done.wait (%p68_p1), [#allocation10], 16  }
  0x34   : > { %4281 = vsyncadd (%p68_p1), [#allocation10], 4294967280  ;;  %s2641_s27 = sshll.u32 %s4361_s22, 4  ;;  %303 = sbr.rel (%p2628_p4) target bundleno = 59 (0x3b), region = 60 }
  0x35   : > { %p295_p6 = scmp.lt.s32.totalorder %s2641_s27, 255 }
  0x37   : > { %s5048_s27 = smov (!%p295_p6, %s2641_s27), 255 }
  0x38   : > { %s4454_s23 = scalar_lea.vmem %s5033_s0, %s5048_s27 }
  0x39   : > { %v4309_v0 = vmov 0.0  }
  0x3a   : > { %304 = vst [vmem:[#allocation2] sm:$0xf] %v4309_v0 }
  0x3b PF: > { %v2701_v1 = vld [vmem:[%s4436_s8 + $0x70] sm:$0xf]  ;;  %v3753_v2 = vld [vmem:[%s4436_s8 + $0x74] sm:$0xf0]  ;;  %v2693_v12 = vld [vmem:[%s4436_s8 + $0x60] sm:$0xf] }
  0x3c   : > { %v2765_v3 = vld [vmem:[%s4436_s8 + $0xf0] sm:$0xf]  ;;  %v2702_v4 = vor.u32 %v3753_v2, %v2701_v1  ;;  %v3769_v5 = vld [vmem:[%s4436_s8 + $0xf4] sm:$0xf0]  ;;  %v3751_v14 = vld [vmem:[%s4436_s8 + $0x64] sm:$0xf0] }
  0x3d   : > { %v2829_v6 = vld [vmem:[%s4436_s8 + $0x170] sm:$0xf]  ;;  %v3785_v7 = vld [vmem:[%s4436_s8 + $0x174] sm:$0xf0]  ;;  %v2766_v8 = vor.u32 %v3769_v5, %v2765_v3  ;;  %v2757_v15 = vld [vmem:[%s4436_s8 + $0xe0] sm:$0xf]  ;;  %v2694_v17 = vor.u32 %v3751_v14, %v2693_v12 }
  0x3e   : > { %v2830_v9 = vor.u32 %v3785_v7, %v2829_v6  ;;  %v2893_v10 = vld [vmem:[%s4436_s8 + $0x1f0] sm:$0xf]  ;;  %v3801_v11 = vld [vmem:[%s4436_s8 + $0x1f4] sm:$0xf0]  ;;  %1880 = vmatpush.bf16.msra.mxu0 %v2702_v4  ;;  %v3767_v16 = vld [vmem:[%s4436_s8 + $0xe4] sm:$0xf0] }
  0x3f   : > { %v2894_v13 = vor.u32 %v3801_v11, %v2893_v10  ;;  %1893 = vmatpush.bf16.msra.mxu1 %v2766_v8  ;;  %v2758_v18 = vor.u32 %v3767_v16, %v2757_v15  ;;  %v2821_v19 = vld [vmem:[%s4436_s8 + $0x160] sm:$0xf]  ;;  %v3783_v20 = vld [vmem:[%s4436_s8 + $0x164] sm:$0xf0]  ;;  %v2685_v24 = vld [vmem:[%s4436_s8 + $0x50] sm:$0xf] }
  0x40   : > { %1906 = vmatpush.bf16.msra.mxu2 %v2830_v9  ;;  %v2885_v21 = vld [vmem:[%s4436_s8 + $0x1e0] sm:$0xf]  ;;  %v2822_v22 = vor.u32 %v3783_v20, %v2821_v19  ;;  %v3799_v23 = vld [vmem:[%s4436_s8 + $0x1e4] sm:$0xf0]  ;;  %v3749_v25 = vld [vmem:[%s4436_s8 + $0x54] sm:$0xf0] }
  0x41   : > { %1919 = vmatpush.bf16.msra.mxu3 %v2894_v13  ;;  %v2886_v26 = vor.u32 %v3799_v23, %v2885_v21  ;;  %v2749_v27 = vld [vmem:[%s4436_s8 + $0xd0] sm:$0xf]  ;;  %v3765_v28 = vld [vmem:[%s4436_s8 + $0xd4] sm:$0xf0]  ;;  %v2686_v30 = vor.u32 %v3749_v25, %v2685_v24  ;;  %v2677_v36 = vld [vmem:[%s4436_s8 + $0x40] sm:$0xf] }
  0x42   : > { %v2813_v29 = vld [vmem:[%s4436_s8 + $0x150] sm:$0xf]  ;;  %1881 = vmatpush.bf16.msra.mxu0 %v2694_v17  ;;  %v3781_v31 = vld [vmem:[%s4436_s8 + $0x154] sm:$0xf0]  ;;  %v2750_v34 = vor.u32 %v3765_v28, %v2749_v27  ;;  %v3747_v37 = vld [vmem:[%s4436_s8 + $0x44] sm:$0xf0] }
  0x43   : > { %v2877_v32 = vld [vmem:[%s4436_s8 + $0x1d0] sm:$0xf]  ;;  %v3797_v33 = vld [vmem:[%s4436_s8 + $0x1d4] sm:$0xf0]  ;;  %1894 = vmatpush.bf16.msra.mxu1 %v2758_v18  ;;  %v2814_v35 = vor.u32 %v3781_v31, %v2813_v29  ;;  %v2741_v38 = vld [vmem:[%s4436_s8 + $0xc0] sm:$0xf]  ;;  %v2678_v45 = vor.u32 %v3747_v37, %v2677_v36 }
  0x44   : > { %1907 = vmatpush.bf16.msra.mxu2 %v2822_v22  ;;  %v2878_v39 = vor.u32 %v3797_v33, %v2877_v32  ;;  %v3763_v40 = vld [vmem:[%s4436_s8 + $0xc4] sm:$0xf0]  ;;  %v2805_v41 = vld [vmem:[%s4436_s8 + $0x140] sm:$0xf]  ;;  %v2669_v48 = vld [vmem:[%s4436_s8 + $0x30] sm:$0xf] }
  0x45   : > { %1920 = vmatpush.bf16.msra.mxu3 %v2886_v26  ;;  %v3779_v42 = vld [vmem:[%s4436_s8 + $0x144] sm:$0xf0]  ;;  %v2869_v43 = vld [vmem:[%s4436_s8 + $0x1c0] sm:$0xf]  ;;  %v2742_v46 = vor.u32 %v3763_v40, %v2741_v38  ;;  %v3745_v49 = vld [vmem:[%s4436_s8 + $0x34] sm:$0xf0] }
  0x46   : > { %v3795_v44 = vld [vmem:[%s4436_s8 + $0x1c4] sm:$0xf0]  ;;  %1882 = vmatpush.bf16.msra.mxu0 %v2686_v30  ;;  %v2806_v47 = vor.u32 %v3779_v42, %v2805_v41  ;;  %v2733_v50 = vld [vmem:[%s4436_s8 + $0xb0] sm:$0xf]  ;;  %v3761_v52 = vld [vmem:[%s4436_s8 + $0xb4] sm:$0xf0]  ;;  %v2670_v57 = vor.u32 %v3745_v49, %v2669_v48 }
  0x47   : > { %1895 = vmatpush.bf16.msra.mxu1 %v2750_v34  ;;  %v2870_v51 = vor.u32 %v3795_v44, %v2869_v43  ;;  %v2797_v53 = vld [vmem:[%s4436_s8 + $0x130] sm:$0xf]  ;;  %v3777_v54 = vld [vmem:[%s4436_s8 + $0x134] sm:$0xf0]  ;;  %v2734_v58 = vor.u32 %v3761_v52, %v2733_v50  ;;  %v2661_v60 = vld [vmem:[%s4436_s8 + $0x20] sm:$0xf] }
  0x48   : > { %1908 = vmatpush.bf16.msra.mxu2 %v2814_v35  ;;  %v2861_v55 = vld [vmem:[%s4436_s8 + $0x1b0] sm:$0xf]  ;;  %v3793_v56 = vld [vmem:[%s4436_s8 + $0x1b4] sm:$0xf0]  ;;  %v2798_v59 = vor.u32 %v3777_v54, %v2797_v53  ;;  %v3743_v61 = vld [vmem:[%s4436_s8 + $0x24] sm:$0xf0] }
  0x49   : > { %1921 = vmatpush.bf16.msra.mxu3 %v2878_v39  ;;  %v2725_v62 = vld [vmem:[%s4436_s8 + $0xa0] sm:$0xf]  ;;  %v2862_v63 = vor.u32 %v3793_v56, %v2861_v55  ;;  %v3759_v0 = vld [vmem:[%s4436_s8 + $0xa4] sm:$0xf0]  ;;  %v2662_v5 = vor.u32 %v3743_v61, %v2661_v60  ;;  %v2653_v8 = vld [vmem:[%s4436_s8 + $0x10] sm:$0xf] }
  0x4a   : > { %1883 = vmatpush.bf16.msra.mxu0 %v2678_v45  ;;  %v2789_v1 = vld [vmem:[%s4436_s8 + $0x120] sm:$0xf]  ;;  %v3775_v2 = vld [vmem:[%s4436_s8 + $0x124] sm:$0xf0]  ;;  %v2726_v6 = vor.u32 %v3759_v0, %v2725_v62  ;;  %v3741_v9 = vld [vmem:[%s4436_s8 + $0x14] sm:$0xf0] }
  0x4b   : > { %1896 = vmatpush.bf16.msra.mxu1 %v2742_v46  ;;  %v2853_v3 = vld [vmem:[%s4436_s8 + $0x1a0] sm:$0xf]  ;;  %v3791_v4 = vld [vmem:[%s4436_s8 + $0x1a4] sm:$0xf0]  ;;  %v2790_v7 = vor.u32 %v3775_v2, %v2789_v1  ;;  %v2717_v10 = vld [vmem:[%s4436_s8 + $0x90] sm:$0xf]  ;;  %v2654_v17 = vor.u32 %v3741_v9, %v2653_v8 }
  0x4c   : > { %1909 = vmatpush.bf16.msra.mxu2 %v2806_v47  ;;  %v2854_v11 = vor.u32 %v3791_v4, %v2853_v3  ;;  %v3757_v12 = vld [vmem:[%s4436_s8 + $0x94] sm:$0xf0]  ;;  %v2781_v13 = vld [vmem:[%s4436_s8 + $0x110] sm:$0xf]  ;;  %v2645_v18 = vld [vmem:[%s4436_s8] sm:$0xf] }
  0x4d   : > { %1922 = vmatpush.bf16.msra.mxu3 %v2870_v51  ;;  %v3773_v14 = vld [vmem:[%s4436_s8 + $0x114] sm:$0xf0]  ;;  %v2845_v15 = vld [vmem:[%s4436_s8 + $0x190] sm:$0xf]  ;;  %v3739_v19 = vld [vmem:[%s4436_s8 + $0x4] sm:$0xf0]  ;;  %v2718_v20 = vor.u32 %v3757_v12, %v2717_v10 }
  0x4e   : > { %1884 = vmatpush.bf16.msra.mxu0 %v2670_v57  ;;  %v3789_v16 = vld [vmem:[%s4436_s8 + $0x194] sm:$0xf0]  ;;  %v2782_v21 = vor.u32 %v3773_v14, %v2781_v13  ;;  %v2709_v22 = vld [vmem:[%s4436_s8 + $0x80] sm:$0xf]  ;;  %v3755_v23 = vld [vmem:[%s4436_s8 + $0x84] sm:$0xf0]  ;;  %v2646_v32 = vor.u32 %v3739_v19, %v2645_v18 }
  0x4f   : > { %1897 = vmatpush.bf16.msra.mxu1 %v2734_v58  ;;  %v2773_v24 = vld [vmem:[%s4436_s8 + $0x100] sm:$0xf]  ;;  %v2846_v25 = vor.u32 %v3789_v16, %v2845_v15  ;;  %v3771_v26 = vld [vmem:[%s4436_s8 + $0x104] sm:$0xf0]  ;;  %v2957_v29 = vld [vmem:[%s4436_s8 + $0x270] sm:$0xf]  ;;  %v2710_v36 = vor.u32 %v3755_v23, %v2709_v22 }
  0x50   : > { %1910 = vmatpush.bf16.msra.mxu2 %v2798_v59  ;;  %v2837_v27 = vld [vmem:[%s4436_s8 + $0x180] sm:$0xf]  ;;  %v3787_v28 = vld [vmem:[%s4436_s8 + $0x184] sm:$0xf0]  ;;  %v3817_v30 = vld [vmem:[%s4436_s8 + $0x274] sm:$0xf0]  ;;  %v2774_v37 = vor.u32 %v3771_v26, %v2773_v24 }
  0x51   : > { %1923 = vmatpush.bf16.msra.mxu3 %v2862_v63  ;;  %v3021_v31 = vld [vmem:[%s4436_s8 + $0x2f0] sm:$0xf]  ;;  %v3833_v33 = vld [vmem:[%s4436_s8 + $0x2f4] sm:$0xf0]  ;;  %v2838_v40 = vor.u32 %v3787_v28, %v2837_v27  ;;  %v2958_v41 = vor.u32 %v3817_v30, %v2957_v29  ;;  %v2949_v44 = vld [vmem:[%s4436_s8 + $0x260] sm:$0xf] }
  0x52   : > { %1885 = vmatpush.bf16.msra.mxu0 %v2662_v5  ;;  %v3085_v34 = vld [vmem:[%s4436_s8 + $0x370] sm:$0xf]  ;;  %v3849_v35 = vld [vmem:[%s4436_s8 + $0x374] sm:$0xf0]  ;;  %v3022_v42 = vor.u32 %v3833_v33, %v3021_v31  ;;  %v3815_v45 = vld [vmem:[%s4436_s8 + $0x264] sm:$0xf0] }
  0x53   : > { %1898 = vmatpush.bf16.msra.mxu1 %v2726_v6  ;;  %v3149_v38 = vld [vmem:[%s4436_s8 + $0x3f0] sm:$0xf]  ;;  %v3865_v39 = vld [vmem:[%s4436_s8 + $0x3f4] sm:$0xf0]  ;;  %v3086_v43 = vor.u32 %v3849_v35, %v3085_v34  ;;  %v3013_v46 = vld [vmem:[%s4436_s8 + $0x2e0] sm:$0xf]  ;;  %v2950_v53 = vor.u32 %v3815_v45, %v2949_v44 }
  0x54   : > { %1911 = vmatpush.bf16.msra.mxu2 %v2790_v7  ;;  %v3150_v47 = vor.u32 %v3865_v39, %v3149_v38  ;;  %v3831_v48 = vld [vmem:[%s4436_s8 + $0x2e4] sm:$0xf0]  ;;  %v3077_v49 = vld [vmem:[%s4436_s8 + $0x360] sm:$0xf]  ;;  %v2941_v54 = vld [vmem:[%s4436_s8 + $0x250] sm:$0xf] }
  0x55   : > { %1924 = vmatpush.bf16.msra.mxu3 %v2854_v11  ;;  %v3847_v50 = vld [vmem:[%s4436_s8 + $0x364] sm:$0xf0]  ;;  %v3141_v51 = vld [vmem:[%s4436_s8 + $0x3e0] sm:$0xf]  ;;  %v3813_v55 = vld [vmem:[%s4436_s8 + $0x254] sm:$0xf0]  ;;  %v3014_v56 = vor.u32 %v3831_v48, %v3013_v46 }
  0x56   : > { %1886 = vmatpush.bf16.msra.mxu0 %v2654_v17  ;;  %v3863_v52 = vld [vmem:[%s4436_s8 + $0x3e4] sm:$0xf0]  ;;  %v3078_v57 = vor.u32 %v3847_v50, %v3077_v49  ;;  %v3005_v58 = vld [vmem:[%s4436_s8 + $0x2d0] sm:$0xf]  ;;  %v3829_v59 = vld [vmem:[%s4436_s8 + $0x2d4] sm:$0xf0]  ;;  %v2942_v2 = vor.u32 %v3813_v55, %v2941_v54 }
  0x57   : > { %1899 = vmatpush.bf16.msra.mxu1 %v2718_v20  ;;  %v306_v60 = vld [vmem:[%s4454_s23] sm:$0xff]  ;;  %v3142_v61 = vor.u32 %v3863_v52, %v3141_v51  ;;  %v3069_v62 = vld [vmem:[%s4436_s8 + $0x350] sm:$0xf]  ;;  %v3006_v3 = vor.u32 %v3829_v59, %v3005_v58  ;;  %v2933_v5 = vld [vmem:[%s4436_s8 + $0x240] sm:$0xf]  ;;  %vm2299_vm0 = vcmask 1041408  }
  0x58   : > { %1912 = vmatpush.bf16.msra.mxu2 %v2782_v21  ;;  %v3845_v63 = vld [vmem:[%s4436_s8 + $0x354] sm:$0xf0]  ;;  %565 = vst [vmem:[#allocation1] ss:$9 sm:$0xff] %v306_v60  ;;  %v3133_v0 = vld [vmem:[%s4436_s8 + $0x3d0] sm:$0xf] }
  0x59   : > { %1925 = vmatpush.bf16.msra.mxu3 %v2846_v25  ;;  %v3861_v1 = vld [vmem:[%s4436_s8 + $0x3d4] sm:$0xf0]  ;;  %v3070_v4 = vor.u32 %v3845_v63, %v3069_v62  ;;  %v3811_v6 = vld [vmem:[%s4436_s8 + $0x244] sm:$0xf0]  ;;  %v2997_v7 = vld [vmem:[%s4436_s8 + $0x2c0] sm:$0xf] }
  0x5a   : > { %1887 = vmatpush.bf16.msra.mxu0 %v2646_v32  ;;  %v3134_v8 = vor.u32 %v3861_v1, %v3133_v0  ;;  %v3827_v9 = vld [vmem:[%s4436_s8 + $0x2c4] sm:$0xf0]  ;;  %v3061_v10 = vld [vmem:[%s4436_s8 + $0x340] sm:$0xf]  ;;  %v2925_v14 = vld [vmem:[%s4436_s8 + $0x230] sm:$0xf]  ;;  %v2934_v15 = vor.u32 %v3811_v6, %v2933_v5 }
  0x5b   : > { %1900 = vmatpush.bf16.msra.mxu1 %v2710_v36  ;;  %v3843_v11 = vld [vmem:[%s4436_s8 + $0x344] sm:$0xf0]  ;;  %v3125_v12 = vld [vmem:[%s4436_s8 + $0x3c0] sm:$0xf]  ;;  %v3809_v16 = vld [vmem:[%s4436_s8 + $0x234] sm:$0xf0]  ;;  %v2998_v19 = vor.u32 %v3827_v9, %v2997_v7 }
  0x5c   : > { %1913 = vmatpush.bf16.msra.mxu2 %v2774_v37  ;;  %v3859_v13 = vld [vmem:[%s4436_s8 + $0x3c4] sm:$0xf0]  ;;  %v2989_v17 = vld [vmem:[%s4436_s8 + $0x2b0] sm:$0xf]  ;;  %v3825_v18 = vld [vmem:[%s4436_s8 + $0x2b4] sm:$0xf0]  ;;  %v3062_v20 = vor.u32 %v3843_v11, %v3061_v10  ;;  %v2926_v30 = vor.u32 %v3809_v16, %v2925_v14 }
  0x5d   : > { %1926 = vmatpush.bf16.msra.mxu3 %v2838_v40  ;;  %v3126_v24 = vor.u32 %v3859_v13, %v3125_v12  ;;  %v3053_v25 = vld [vmem:[%s4436_s8 + $0x330] sm:$0xf]  ;;  %v3841_v26 = vld [vmem:[%s4436_s8 + $0x334] sm:$0xf0]  ;;  %v2990_v31 = vor.u32 %v3825_v18, %v2989_v17  ;;  %v2917_v33 = vld [vmem:[%s4436_s8 + $0x220] sm:$0xf] }
  0x5e   : > { %1932 = vmatpush.bf16.msrb.mxu0 %v2958_v41  ;;  %v3117_v28 = vld [vmem:[%s4436_s8 + $0x3b0] sm:$0xf]  ;;  %v3857_v29 = vld [vmem:[%s4436_s8 + $0x3b4] sm:$0xf0]  ;;  %v3054_v32 = vor.u32 %v3841_v26, %v3053_v25  ;;  %v3807_v34 = vld [vmem:[%s4436_s8 + $0x224] sm:$0xf0] }
  0x5f   : > { %1945 = vmatpush.bf16.msrb.mxu1 %v3022_v42  ;;  %v4559_v21 = vld [vmem:[#allocation1 + $0x12] sm:$0xff]  ;;  %v4561_v22 = vld [vmem:[#allocation1] sm:$0xff]  ;;  %v4568_v27 = vld [vmem:[#allocation1 + $0x9] sm:$0xff]  ;;  %v3118_v36 = vor.u32 %v3857_v29, %v3117_v28  ;;  %v2918_v42 = vor.u32 %v3807_v34, %v2917_v33  ;;  %p3667_p1 = scmp.ne.s32.totalorder %s4361_s22, 15 }
  0x60   : > { %1958 = vmatpush.bf16.msrb.mxu2 %v3086_v43  ;;  %v4563_v23 = vld [vmem:[#allocation1 + $0x1b] sm:$0xff]  ;;  %1888 = vmatmul.bf16.vlgmr.msra.gmra.mxu0 %v4561_v22  ;;  %v2981_v35 = vld [vmem:[%s4436_s8 + $0x2a0] sm:$0xf]  ;;  %v3823_v37 = vld [vmem:[%s4436_s8 + $0x2a4] sm:$0xf0] }
  0x61   : > { %1971 = vmatpush.bf16.msrb.mxu3 %v3150_v47  ;;  %1914 = vmatmul.bf16.vlgmr.msra.gmra.mxu2 %v4559_v21  ;;  %v3045_v38 = vld [vmem:[%s4436_s8 + $0x320] sm:$0xf]  ;;  %v3839_v39 = vld [vmem:[%s4436_s8 + $0x324] sm:$0xf0]  ;;  %v2909_v43 = vld [vmem:[%s4436_s8 + $0x210] sm:$0xf]  ;;  %v2982_v44 = vor.u32 %v3823_v37, %v2981_v35 }
  0x62   : > { %1933 = vmatpush.bf16.msrb.mxu0 %v2950_v53  ;;  %1927 = vmatmul.bf16.vlgmr.msra.gmra.mxu3 %v4563_v23  ;;  %v3109_v40 = vld [vmem:[%s4436_s8 + $0x3a0] sm:$0xf]  ;;  %v3855_v41 = vld [vmem:[%s4436_s8 + $0x3a4] sm:$0xf0]  ;;  %v3046_v45 = vor.u32 %v3839_v39, %v3045_v38  ;;  %v3805_v46 = vld [vmem:[%s4436_s8 + $0x214] sm:$0xf0] }
  0x63   : > { %1946 = vmatpush.bf16.msrb.mxu1 %v3014_v56  ;;  %v2973_v47 = vld [vmem:[%s4436_s8 + $0x290] sm:$0xf]  ;;  %v3821_v48 = vld [vmem:[%s4436_s8 + $0x294] sm:$0xf0]  ;;  %v3110_v49 = vor.u32 %v3855_v41, %v3109_v40  ;;  %v2901_v54 = vld [vmem:[%s4436_s8 + $0x200] sm:$0xf]  ;;  %v2910_v56 = vor.u32 %v3805_v46, %v2909_v43 }
  0x64   : > { %1959 = vmatpush.bf16.msrb.mxu2 %v3078_v57  ;;  %1901 = vmatmul.bf16.vlgmr.msra.gmra.mxu1 %v4568_v27  ;;  %v3037_v50 = vld [vmem:[%s4436_s8 + $0x310] sm:$0xf]  ;;  %v3837_v51 = vld [vmem:[%s4436_s8 + $0x314] sm:$0xf0]  ;;  %v3803_v55 = vld [vmem:[%s4436_s8 + $0x204] sm:$0xf0]  ;;  %v2974_v63 = vor.u32 %v3821_v48, %v2973_v47 }
  0x65   : > { %1972 = vmatpush.bf16.msrb.mxu3 %v3142_v61  ;;  %v3101_v52 = vld [vmem:[%s4436_s8 + $0x390] sm:$0xf]  ;;  %v3853_v53 = vld [vmem:[%s4436_s8 + $0x394] sm:$0xf0]  ;;  %v2965_v57 = vld [vmem:[%s4436_s8 + $0x280] sm:$0xf]  ;;  %v3038_v0 = vor.u32 %v3837_v51, %v3037_v50  ;;  %v2902_v10 = vor.u32 %v3803_v55, %v2901_v54 }
  0x66   : > { %1934 = vmatpush.bf16.msrb.mxu0 %v2942_v2  ;;  %v3819_v58 = vld [vmem:[%s4436_s8 + $0x284] sm:$0xf0]  ;;  %v3029_v59 = vld [vmem:[%s4436_s8 + $0x300] sm:$0xf]  ;;  %v4600_v1 = vld [vmem:[#allocation1 + $0x24] sm:$0xff] }
  0x67   : > { %1947 = vmatpush.bf16.msrb.mxu1 %v3006_v3  ;;  %v3835_v60 = vld [vmem:[%s4436_s8 + $0x304] sm:$0xf0]  ;;  %v307_v62 = vld [vmem:[%s4454_s23 + $0x8] sm:$0xff]  ;;  %v4602_v2 = vld [vmem:[#allocation1 + $0x3f] sm:$0xff]  ;;  %v2966_v14 = vor.u32 %v3819_v58, %v2965_v57 }
  0x68   : > { %1960 = vmatpush.bf16.msrb.mxu2 %v3070_v4  ;;  %v4597_v61 = vld [vmem:[#allocation1 + $0x36] sm:$0xff]  ;;  %v4604_v3 = vld [vmem:[#allocation1 + $0x2d] sm:$0xff]  ;;  %v3102_v4 = vor.u32 %v3853_v53, %v3101_v52  ;;  %v3897_v11 = vld [vmem:[%s4436_s8 + $0x4f4] sm:$0xf0] }
  0x69   : > { %1973 = vmatpush.bf16.msrb.mxu3 %v3134_v8  ;;  %v3093_v5 = vld [vmem:[%s4436_s8 + $0x380] sm:$0xf]  ;;  %v3851_v6 = vld [vmem:[%s4436_s8 + $0x384] sm:$0xf0]  ;;  %575 = vst [vmem:[#allocation1] ss:$9 sm:$0xff] %v307_v62 }
  0x6a   : > { %1935 = vmatpush.bf16.msrb.mxu0 %v2934_v15  ;;  %v3213_v7 = vld [vmem:[%s4436_s8 + $0x470] sm:$0xf]  ;;  %v3881_v8 = vld [vmem:[%s4436_s8 + $0x474] sm:$0xf0]  ;;  %v3030_v15 = vor.u32 %v3835_v60, %v3029_v59  ;;  %v3094_v18 = vor.u32 %v3851_v6, %v3093_v5  ;;  %v3205_v25 = vld [vmem:[%s4436_s8 + $0x460] sm:$0xf] }
  0x6b   : > { %1948 = vmatpush.bf16.msrb.mxu1 %v2998_v19  ;;  %v3277_v9 = vld [vmem:[%s4436_s8 + $0x4f0] sm:$0xf]  ;;  %v3913_v13 = vld [vmem:[%s4436_s8 + $0x574] sm:$0xf0]  ;;  %v3214_v19 = vor.u32 %v3881_v8, %v3213_v7  ;;  %v3879_v26 = vld [vmem:[%s4436_s8 + $0x464] sm:$0xf0] }
  0x6c   : > { %1961 = vmatpush.bf16.msrb.mxu2 %v3062_v20  ;;  %v3341_v12 = vld [vmem:[%s4436_s8 + $0x570] sm:$0xf]  ;;  %v3929_v17 = vld [vmem:[%s4436_s8 + $0x5f4] sm:$0xf0]  ;;  %v3278_v20 = vor.u32 %v3897_v11, %v3277_v9  ;;  %v3269_v28 = vld [vmem:[%s4436_s8 + $0x4e0] sm:$0xf]  ;;  %v3206_v35 = vor.u32 %v3879_v26, %v3205_v25 }
  0x6d   : > { %1974 = vmatpush.bf16.msrb.mxu3 %v3126_v24  ;;  %v3405_v16 = vld [vmem:[%s4436_s8 + $0x5f0] sm:$0xf]  ;;  %v3342_v24 = vor.u32 %v3913_v13, %v3341_v12  ;;  %v3397_v33 = vld [vmem:[%s4436_s8 + $0x5e0] sm:$0xf]  ;;  %v3927_v34 = vld [vmem:[%s4436_s8 + $0x5e4] sm:$0xf0] }
  0x6e   : > { %1936 = vmatpush.bf16.msrb.mxu0 %v2926_v30  ;;  %v3406_v29 = vor.u32 %v3929_v17, %v3405_v16  ;;  %v3895_v30 = vld [vmem:[%s4436_s8 + $0x4e4] sm:$0xf0]  ;;  %v3197_v38 = vld [vmem:[%s4436_s8 + $0x450] sm:$0xf]  ;;  %v3877_v39 = vld [vmem:[%s4436_s8 + $0x454] sm:$0xf0]  ;;  %v3398_v41 = vor.u32 %v3927_v34, %v3397_v33 }
  0x6f   : > { %1949 = vmatpush.bf16.msrb.mxu1 %v2990_v31  ;;  %v3333_v31 = vld [vmem:[%s4436_s8 + $0x560] sm:$0xf]  ;;  %v3261_v40 = vld [vmem:[%s4436_s8 + $0x4d0] sm:$0xf]  ;;  %v3925_v46 = vld [vmem:[%s4436_s8 + $0x5d4] sm:$0xf0]  ;;  %v3198_v47 = vor.u32 %v3877_v39, %v3197_v38 }
  0x70   : > { %1962 = vmatpush.bf16.msrb.mxu2 %v3054_v32  ;;  %v3911_v32 = vld [vmem:[%s4436_s8 + $0x564] sm:$0xf0]  ;;  %v3325_v43 = vld [vmem:[%s4436_s8 + $0x550] sm:$0xf]  ;;  %v3189_v50 = vld [vmem:[%s4436_s8 + $0x440] sm:$0xf] }
  0x71   : > { %1975 = vmatpush.bf16.msrb.mxu3 %v3118_v36  ;;  %v3270_v36 = vor.u32 %v3895_v30, %v3269_v28  ;;  %v3334_v37 = vor.u32 %v3911_v32, %v3333_v31  ;;  %v3875_v51 = vld [vmem:[%s4436_s8 + $0x444] sm:$0xf0]  ;;  %v3253_v52 = vld [vmem:[%s4436_s8 + $0x4c0] sm:$0xf]  ;;  %v3889_v6 = vld [vmem:[%s4436_s8 + $0x4b4] sm:$0xf0] }
  0x72   : > { %1937 = vmatpush.bf16.msrb.mxu0 %v2918_v42  ;;  %v3893_v42 = vld [vmem:[%s4436_s8 + $0x4d4] sm:$0xf0]  ;;  %v3891_v54 = vld [vmem:[%s4436_s8 + $0x4c4] sm:$0xf0]  ;;  %v3317_v55 = vld [vmem:[%s4436_s8 + $0x540] sm:$0xf]  ;;  %v3190_v59 = vor.u32 %v3875_v51, %v3189_v50 }
  0x73   : > { %1950 = vmatpush.bf16.msrb.mxu1 %v2982_v44  ;;  %v3909_v44 = vld [vmem:[%s4436_s8 + $0x554] sm:$0xf0]  ;;  %v3262_v48 = vor.u32 %v3893_v42, %v3261_v40  ;;  %v3381_v57 = vld [vmem:[%s4436_s8 + $0x5c0] sm:$0xf]  ;;  %v3923_v58 = vld [vmem:[%s4436_s8 + $0x5c4] sm:$0xf0]  ;;  %v3254_v60 = vor.u32 %v3891_v54, %v3253_v52 }
  0x74   : > { %1963 = vmatpush.bf16.msrb.mxu2 %v3046_v45  ;;  %v3389_v45 = vld [vmem:[%s4436_s8 + $0x5d0] sm:$0xf]  ;;  %v3382_v5 = vor.u32 %v3923_v58, %v3381_v57  ;;  %v3905_v8 = vld [vmem:[%s4436_s8 + $0x534] sm:$0xf0]  ;;  %v3237_v16 = vld [vmem:[%s4436_s8 + $0x4a0] sm:$0xf] }
  0x75   : > { %1976 = vmatpush.bf16.msrb.mxu3 %v3110_v49  ;;  %v3326_v49 = vor.u32 %v3909_v44, %v3325_v43  ;;  %v3390_v53 = vor.u32 %v3925_v46, %v3389_v45  ;;  %v3309_v7 = vld [vmem:[%s4436_s8 + $0x530] sm:$0xf]  ;;  %v3919_v25 = vld [vmem:[%s4436_s8 + $0x5a4] sm:$0xf0]  ;;  %v3869_v31 = vld [vmem:[%s4436_s8 + $0x414] sm:$0xf0] }
  0x76   : > { %1938 = vmatpush.bf16.msrb.mxu0 %v2910_v56  ;;  %v3907_v56 = vld [vmem:[%s4436_s8 + $0x544] sm:$0xf0]  ;;  %v3373_v9 = vld [vmem:[%s4436_s8 + $0x5b0] sm:$0xf]  ;;  %v3310_v13 = vor.u32 %v3905_v8, %v3309_v7  ;;  %v3885_v34 = vld [vmem:[%s4436_s8 + $0x494] sm:$0xf0] }
  0x77   : > { %1951 = vmatpush.bf16.msrb.mxu1 %v2974_v63  ;;  %v3318_v62 = vor.u32 %v3907_v56, %v3317_v55  ;;  %v3181_v63 = vld [vmem:[%s4436_s8 + $0x430] sm:$0xf]  ;;  %v3917_v38 = vld [vmem:[%s4436_s8 + $0x594] sm:$0xf0]  ;;  %v3157_v40 = vld [vmem:[%s4436_s8 + $0x400] sm:$0xf] }
  0x78   : > { %1964 = vmatpush.bf16.msrb.mxu2 %v3038_v0  ;;  %v3873_v0 = vld [vmem:[%s4436_s8 + $0x434] sm:$0xf0]  ;;  %v3165_v30 = vld [vmem:[%s4436_s8 + $0x410] sm:$0xf]  ;;  %v3221_v44 = vld [vmem:[%s4436_s8 + $0x480] sm:$0xf] }
  0x79   : > { %1977 = vmatpush.bf16.msrb.mxu3 %v3102_v4  ;;  %v3245_v4 = vld [vmem:[%s4436_s8 + $0x4b0] sm:$0xf]  ;;  %v3182_v11 = vor.u32 %v3873_v0, %v3181_v63  ;;  %v3166_v39 = vor.u32 %v3869_v31, %v3165_v30  ;;  %v3883_v45 = vld [vmem:[%s4436_s8 + $0x484] sm:$0xf0]  ;;  %v3285_v46 = vld [vmem:[%s4436_s8 + $0x500] sm:$0xf] }
  0x7a   : > { %1939 = vmatpush.bf16.msrb.mxu0 %v2902_v10  ;;  %v3921_v10 = vld [vmem:[%s4436_s8 + $0x5b4] sm:$0xf0]  ;;  %v3246_v12 = vor.u32 %v3889_v6, %v3245_v4  ;;  %v3229_v32 = vld [vmem:[%s4436_s8 + $0x490] sm:$0xf]  ;;  %v3915_v50 = vld [vmem:[%s4436_s8 + $0x584] sm:$0xf0]  ;;  %v3222_v58 = vor.u32 %v3883_v45, %v3221_v44 }
  0x7b   : > { %1952 = vmatpush.bf16.msrb.mxu1 %v2966_v14  ;;  %v3173_v14 = vld [vmem:[%s4436_s8 + $0x420] sm:$0xf]  ;;  %v3374_v17 = vor.u32 %v3921_v10, %v3373_v9  ;;  %v3230_v42 = vor.u32 %v3885_v34, %v3229_v32  ;;  %v3469_v51 = vld [vmem:[%s4436_s8 + $0x670] sm:$0xf]  ;;  %v3945_v52 = vld [vmem:[%s4436_s8 + $0x674] sm:$0xf0] }
  0x7c   : > { %1965 = vmatpush.bf16.msrb.mxu2 %v3030_v15  ;;  %v3871_v15 = vld [vmem:[%s4436_s8 + $0x424] sm:$0xf0]  ;;  %v3961_v55 = vld [vmem:[%s4436_s8 + $0x6f4] sm:$0xf0]  ;;  %v3597_v56 = vld [vmem:[%s4436_s8 + $0x770] sm:$0xf]  ;;  %v3470_v0 = vor.u32 %v3945_v52, %v3469_v51 }
  0x7d   : > { %1978 = vmatpush.bf16.msrb.mxu3 %v3094_v18  ;;  %1940 = vmatmul.bf16.vlgmr.msrb.gmra.mxu0 %v4600_v1  ;;  %v3887_v18 = vld [vmem:[%s4436_s8 + $0x4a4] sm:$0xf0]  ;;  %v3174_v26 = vor.u32 %v3871_v15, %v3173_v14  ;;  %v3977_v57 = vld [vmem:[%s4436_s8 + $0x774] sm:$0xf0]  ;;  %v3461_v6 = vld [vmem:[%s4436_s8 + $0x660] sm:$0xf] }
  0x7e   : > { %1984 = vmatpush.bf16.msra.mxu0 %v3214_v19  ;;  %1953 = vmatmul.bf16.vlgmr.msrb.gmra.mxu1 %v4604_v3  ;;  %v3301_v19 = vld [vmem:[%s4436_s8 + $0x520] sm:$0xf]  ;;  %v3238_v28 = vor.u32 %v3887_v18, %v3237_v16  ;;  %v3943_v7 = vld [vmem:[%s4436_s8 + $0x664] sm:$0xf0]  ;;  %v579_v18 = vld [vmem:[#allocation1 + $0x1b] sm:$0xff] }
  0x7f   : > { %1997 = vmatpush.bf16.msra.mxu1 %v3278_v20  ;;  %1966 = vmatmul.bf16.vlgmr.msrb.gmra.mxu2 %v4597_v61  ;;  %v3903_v20 = vld [vmem:[%s4436_s8 + $0x524] sm:$0xf0]  ;;  %v3525_v8 = vld [vmem:[%s4436_s8 + $0x6e0] sm:$0xf]  ;;  %v3957_v30 = vld [vmem:[%s4436_s8 + $0x6d4] sm:$0xf0] }
  0x80   : > { %2010 = vmatpush.bf16.msra.mxu2 %v3342_v24  ;;  %1979 = vmatmul.bf16.vlgmr.msrb.gmra.mxu3 %v4602_v2  ;;  %v3365_v24 = vld [vmem:[%s4436_s8 + $0x5a0] sm:$0xf]  ;;  %v3959_v10 = vld [vmem:[%s4436_s8 + $0x6e4] sm:$0xf0]  ;;  %v3581_v31 = vld [vmem:[%s4436_s8 + $0x750] sm:$0xf] }
  0x81   : > { %2023 = vmatpush.bf16.msra.mxu3 %v3406_v29  ;;  %v3302_v29 = vor.u32 %v3903_v20, %v3301_v19  ;;  %v3366_v33 = vor.u32 %v3919_v25, %v3365_v24  ;;  %v3653_v14 = vld [vmem:[%s4436_s8 + $0x7e0] sm:$0xf]  ;;  %v3991_v15 = vld [vmem:[%s4436_s8 + $0x7e4] sm:$0xf0]  ;;  %v3462_v19 = vor.u32 %v3943_v7, %v3461_v6  ;;  %v3526_v20 = vor.u32 %v3959_v10, %v3525_v8  ;;  %v3453_v25 = vld [vmem:[%s4436_s8 + $0x650] sm:$0xf] }
  0x82   : > { %1985 = vmatpush.bf16.msra.mxu0 %v3206_v35  ;;  %v3293_v35 = vld [vmem:[%s4436_s8 + $0x510] sm:$0xf]  ;;  %v578_v16 = vld [vmem:[#allocation1 + $0x12] sm:$0xff]  ;;  %v3973_v32 = vld [vmem:[%s4436_s8 + $0x754] sm:$0xf0] }
  0x83   : > { %1998 = vmatpush.bf16.msra.mxu1 %v3270_v36  ;;  %v3901_v36 = vld [vmem:[%s4436_s8 + $0x514] sm:$0xf0]  ;;  %v3971_v44 = vld [vmem:[%s4436_s8 + $0x744] sm:$0xf0]  ;;  %v3637_v45 = vld [vmem:[%s4436_s8 + $0x7c0] sm:$0xf] }
  0x84   : > { %2011 = vmatpush.bf16.msra.mxu2 %v3334_v37  ;;  %v3357_v37 = vld [vmem:[%s4436_s8 + $0x590] sm:$0xf]  ;;  %v3294_v43 = vor.u32 %v3901_v36, %v3293_v35  ;;  %v3989_v34 = vld [vmem:[%s4436_s8 + $0x7d4] sm:$0xf0]  ;;  %v3951_v6 = vld [vmem:[%s4436_s8 + $0x6a4] sm:$0xf0] }
  0x85   : > { %2024 = vmatpush.bf16.msra.mxu3 %v3398_v41  ;;  %v3867_v41 = vld [vmem:[%s4436_s8 + $0x404] sm:$0xf0]  ;;  %v3937_v51 = vld [vmem:[%s4436_s8 + $0x634] sm:$0xf0]  ;;  %v3501_v52 = vld [vmem:[%s4436_s8 + $0x6b0] sm:$0xf] }
  0x86   : > { %1986 = vmatpush.bf16.msra.mxu0 %v3198_v47  ;;  %v3358_v47 = vor.u32 %v3917_v38, %v3357_v37  ;;  %v3158_v54 = vor.u32 %v3867_v41, %v3157_v40  ;;  %v3582_v37 = vor.u32 %v3973_v32, %v3581_v31  ;;  %v3445_v38 = vld [vmem:[%s4436_s8 + $0x640] sm:$0xf]  ;;  %v3967_v8 = vld [vmem:[%s4436_s8 + $0x724] sm:$0xf0] }
  0x87   : > { %1999 = vmatpush.bf16.msra.mxu1 %v3262_v48  ;;  %v3899_v48 = vld [vmem:[%s4436_s8 + $0x504] sm:$0xf0]  ;;  %v3509_v40 = vld [vmem:[%s4436_s8 + $0x6c0] sm:$0xf] }
  0x88   : > { %2012 = vmatpush.bf16.msra.mxu2 %v3326_v49  ;;  %v3349_v49 = vld [vmem:[%s4436_s8 + $0x580] sm:$0xf]  ;;  %v3983_v10 = vld [vmem:[%s4436_s8 + $0x7a4] sm:$0xf0] }
  0x89   : > { %2025 = vmatpush.bf16.msra.mxu3 %v3390_v53  ;;  %v3533_v53 = vld [vmem:[%s4436_s8 + $0x6f0] sm:$0xf]  ;;  %v3350_v63 = vor.u32 %v3915_v50, %v3349_v49  ;;  %v3557_v7 = vld [vmem:[%s4436_s8 + $0x720] sm:$0xf] }
  0x8a   : > { %1987 = vmatpush.bf16.msra.mxu0 %v3190_v59  ;;  %v3286_v59 = vor.u32 %v3899_v48, %v3285_v46  ;;  %v3534_v4 = vor.u32 %v3961_v55, %v3533_v53  ;;  %v3987_v46 = vld [vmem:[%s4436_s8 + $0x7c4] sm:$0xf0]  ;;  %v3437_v50 = vld [vmem:[%s4436_s8 + $0x630] sm:$0xf]  ;;  %v3477_v32 = vld [vmem:[%s4436_s8 + $0x680] sm:$0xf] }
  0x8b   : > { %2000 = vmatpush.bf16.msra.mxu1 %v3254_v60  ;;  %v3661_v60 = vld [vmem:[%s4436_s8 + $0x7f0] sm:$0xf]  ;;  %v3638_v53 = vor.u32 %v3987_v46, %v3637_v45  ;;  %v2831_v45 = vld [vmem:[%s4436_s8 + $0x178] sm:$0xf0] }
  0x8c   : > { %2013 = vmatpush.bf16.msra.mxu2 %v3318_v62  ;;  %v3993_v62 = vld [vmem:[%s4436_s8 + $0x7f4] sm:$0xf0]  ;;  %v3565_v55 = vld [vmem:[%s4436_s8 + $0x730] sm:$0xf] }
  0x8d   : > { %2026 = vmatpush.bf16.msra.mxu3 %v3382_v5  ;;  %v3598_v5 = vor.u32 %v3977_v57, %v3597_v56  ;;  %v3662_v9 = vor.u32 %v3993_v62, %v3661_v60  ;;  %v3969_v56 = vld [vmem:[%s4436_s8 + $0x734] sm:$0xf0]  ;;  %v3629_v57 = vld [vmem:[%s4436_s8 + $0x7b0] sm:$0xf] }
  0x8e   : > { %1988 = vmatpush.bf16.msra.mxu0 %v3182_v11  ;;  %v3589_v11 = vld [vmem:[%s4436_s8 + $0x760] sm:$0xf]  ;;  %v3566_v62 = vor.u32 %v3969_v56, %v3565_v55  ;;  %v2695_v55 = vld [vmem:[%s4436_s8 + $0x68] sm:$0xf0]  ;;  %v3766_v56 = vld [vmem:[%s4436_s8 + $0xe4] sm:$0xf] }
  0x8f   : > { %2001 = vmatpush.bf16.msra.mxu1 %v3246_v12  ;;  %v3975_v12 = vld [vmem:[%s4436_s8 + $0x764] sm:$0xf0] }
  0x90   : > { %2014 = vmatpush.bf16.msra.mxu2 %v3310_v13  ;;  %v576_v13 = vld [vmem:[#allocation1] sm:$0xff]  ;;  %v3590_v24 = vor.u32 %v3975_v12, %v3589_v11 }
  0x91   : > { %2027 = vmatpush.bf16.msra.mxu3 %v3374_v17  ;;  %v577_v17 = vld [vmem:[#allocation1 + $0x9] sm:$0xff] }
  0x92   : > { %1989 = vmatpush.bf16.msra.mxu0 %v3174_v26  ;;  %v3941_v26 = vld [vmem:[%s4436_s8 + $0x654] sm:$0xf0] }
  0x93   : > { %2002 = vmatpush.bf16.msra.mxu1 %v3238_v28  ;;  %v3517_v28 = vld [vmem:[%s4436_s8 + $0x6d0] sm:$0xf]  ;;  %v3454_v35 = vor.u32 %v3941_v26, %v3453_v25  ;;  %v3981_v25 = vld [vmem:[%s4436_s8 + $0x794] sm:$0xf0] }
  0x94   : > { %2015 = vmatpush.bf16.msra.mxu2 %v3302_v29  ;;  %v3654_v29 = vor.u32 %v3991_v15, %v3653_v14  ;;  %v3518_v36 = vor.u32 %v3957_v30, %v3517_v28  ;;  %v3421_v14 = vld [vmem:[%s4436_s8 + $0x610] sm:$0xf]  ;;  %v3933_v15 = vld [vmem:[%s4436_s8 + $0x614] sm:$0xf0]  ;;  %v3413_v28 = vld [vmem:[%s4436_s8 + $0x600] sm:$0xf] }
  0x95   : > { %2028 = vmatpush.bf16.msra.mxu3 %v3366_v33  ;;  %v3645_v33 = vld [vmem:[%s4436_s8 + $0x7d0] sm:$0xf]  ;;  %v3422_v26 = vor.u32 %v3933_v15, %v3421_v14  ;;  %v2751_v14 = vld [vmem:[%s4436_s8 + $0xd8] sm:$0xf0]  ;;  %v3780_v15 = vld [vmem:[%s4436_s8 + $0x154] sm:$0xf] }
  0x96   : > { %1990 = vmatpush.bf16.msra.mxu0 %v3166_v39  ;;  %v3939_v39 = vld [vmem:[%s4436_s8 + $0x644] sm:$0xf0]  ;;  %v3646_v41 = vor.u32 %v3989_v34, %v3645_v33  ;;  %v3541_v34 = vld [vmem:[%s4436_s8 + $0x700] sm:$0xf] }
  0x97   : > { %2003 = vmatpush.bf16.msra.mxu1 %v3230_v42  ;;  %v3955_v42 = vld [vmem:[%s4436_s8 + $0x6c4] sm:$0xf0] }
  0x98   : > { %2016 = vmatpush.bf16.msra.mxu2 %v3294_v43  ;;  %v3573_v43 = vld [vmem:[%s4436_s8 + $0x740] sm:$0xf]  ;;  %v3510_v48 = vor.u32 %v3955_v42, %v3509_v40  ;;  %v3947_v33 = vld [vmem:[%s4436_s8 + $0x684] sm:$0xf0]  ;;  %v2703_v40 = vld [vmem:[%s4436_s8 + $0x78] sm:$0xf0] }
  0x99   : > { %2029 = vmatpush.bf16.msra.mxu3 %v3358_v47  ;;  %v3446_v47 = vor.u32 %v3939_v39, %v3445_v38  ;;  %v3574_v49 = vor.u32 %v3971_v44, %v3573_v43  ;;  %v3979_v38 = vld [vmem:[%s4436_s8 + $0x784] sm:$0xf0]  ;;  %v3752_v39 = vld [vmem:[%s4436_s8 + $0x74] sm:$0xf]  ;;  %v2767_v43 = vld [vmem:[%s4436_s8 + $0xf8] sm:$0xf0]  ;;  %v3478_v46 = vor.u32 %v3947_v33, %v3477_v32 }
  0x9a   : > { %1991 = vmatpush.bf16.msra.mxu0 %v3158_v54  ;;  %v3953_v54 = vld [vmem:[%s4436_s8 + $0x6b4] sm:$0xf0]  ;;  %v3784_v44 = vld [vmem:[%s4436_s8 + $0x174] sm:$0xf]  ;;  %v2807_v32 = vld [vmem:[%s4436_s8 + $0x148] sm:$0xf0] }
  0x9b   : > { %2004 = vmatpush.bf16.msra.mxu1 %v3222_v58  ;;  %v3985_v58 = vld [vmem:[%s4436_s8 + $0x7b4] sm:$0xf0]  ;;  %v3502_v60 = vor.u32 %v3953_v54, %v3501_v52  ;;  %v3750_v54 = vld [vmem:[%s4436_s8 + $0x64] sm:$0xf] }
  0x9c   : > { %2017 = vmatpush.bf16.msra.mxu2 %v3286_v59  ;;  %v3438_v59 = vor.u32 %v3937_v51, %v3437_v50  ;;  %v2706_v51 = vor.u32 %v3752_v39, %v2703_v40  ;;  %v3794_v33 = vld [vmem:[%s4436_s8 + $0x1c4] sm:$0xf]  ;;  %v2671_v39 = vld [vmem:[%s4436_s8 + $0x38] sm:$0xf0]  ;;  %v3760_v40 = vld [vmem:[%s4436_s8 + $0xb4] sm:$0xf] }
  0x9d   : > { %2030 = vmatpush.bf16.msra.mxu3 %v3350_v63  ;;  %1992 = vmatmul.bf16.vlgmr.msra.gmra.mxu0 %v576_v13  ;;  %v3429_v63 = vld [vmem:[%s4436_s8 + $0x620] sm:$0xf]  ;;  %v3558_v13 = vor.u32 %v3967_v8, %v3557_v7  ;;  %v2698_v7 = vor.u32 %v3750_v54, %v2695_v55  ;;  %v2727_v54 = vld [vmem:[%s4436_s8 + $0xa8] sm:$0xf0]  ;;  %v3774_v55 = vld [vmem:[%s4436_s8 + $0x124] sm:$0xf] }
  0x9e   : > { %2036 = vmatpush.bf16.msrb.mxu0 %v3470_v0  ;;  %2005 = vmatmul.bf16.vlgmr.msra.gmra.mxu1 %v577_v17  ;;  %v3935_v0 = vld [vmem:[%s4436_s8 + $0x624] sm:$0xf0] }
  0x9f   : > { %2049 = vmatpush.bf16.msrb.mxu1 %v3534_v4  ;;  %2018 = vmatmul.bf16.vlgmr.msra.gmra.mxu2 %v578_v16  ;;  %v3493_v4 = vld [vmem:[%s4436_s8 + $0x6a0] sm:$0xf]  ;;  %v3430_v11 = vor.u32 %v3935_v0, %v3429_v63  ;;  %v3485_v16 = vld [vmem:[%s4436_s8 + $0x690] sm:$0xf]  ;;  %v3798_v63 = vld [vmem:[%s4436_s8 + $0x1e4] sm:$0xf] }
  0xa0   : > { %2062 = vmatpush.bf16.msrb.mxu2 %v3598_v5  ;;  %2031 = vmatmul.bf16.vlgmr.msra.gmra.mxu3 %v579_v18  ;;  %v3630_v5 = vor.u32 %v3985_v58, %v3629_v57  ;;  %v3494_v12 = vor.u32 %v3951_v6, %v3493_v4  ;;  %v3949_v18 = vld [vmem:[%s4436_s8 + $0x694] sm:$0xf0]  ;;  %v2759_v58 = vld [vmem:[%s4436_s8 + $0xe8] sm:$0xf0] }
  0xa1   : > { %2075 = vmatpush.bf16.msrb.mxu3 %v3662_v9  ;;  %v3621_v9 = vld [vmem:[%s4436_s8 + $0x7a0] sm:$0xf]  ;;  %v3486_v30 = vor.u32 %v3949_v18, %v3485_v16  ;;  %v2887_v0 = vld [vmem:[%s4436_s8 + $0x1e8] sm:$0xf0]  ;;  %v583_v6 = vld [vmem:[#allocation1 + $0x3f] sm:$0xff]  ;;  %v2762_v8 = vor.u32 %v3766_v56, %v2759_v58 }
  0xa2   : > { %2037 = vmatpush.bf16.msrb.mxu0 %v3462_v19  ;;  %v3622_v17 = vor.u32 %v3983_v10, %v3621_v9  ;;  %v3549_v19 = vld [vmem:[%s4436_s8 + $0x710] sm:$0xf]  ;;  %v3748_v10 = vld [vmem:[%s4436_s8 + $0x54] sm:$0xf]  ;;  %v2815_v16 = vld [vmem:[%s4436_s8 + $0x158] sm:$0xf0] }
  0xa3   : > { %2050 = vmatpush.bf16.msrb.mxu1 %v3526_v20  ;;  %v3965_v20 = vld [vmem:[%s4436_s8 + $0x714] sm:$0xf0]  ;;  %v582_v4 = vld [vmem:[#allocation1 + $0x36] sm:$0xff]  ;;  %v2879_v18 = vld [vmem:[%s4436_s8 + $0x1d8] sm:$0xf0] }
  0xa4   : > { %2063 = vmatpush.bf16.msrb.mxu2 %v3590_v24  ;;  %v3613_v24 = vld [vmem:[%s4436_s8 + $0x790] sm:$0xf]  ;;  %v3550_v31 = vor.u32 %v3965_v20, %v3549_v19  ;;  %v2791_v56 = vld [vmem:[%s4436_s8 + $0x128] sm:$0xf0] }
  0xa5   : > { %2076 = vmatpush.bf16.msrb.mxu3 %v3654_v29  ;;  %v3931_v29 = vld [vmem:[%s4436_s8 + $0x604] sm:$0xf0]  ;;  %v2855_v58 = vld [vmem:[%s4436_s8 + $0x1a8] sm:$0xf0] }
  0xa6   : > { %2038 = vmatpush.bf16.msrb.mxu0 %v3454_v35  ;;  %v3614_v35 = vor.u32 %v3981_v25, %v3613_v24  ;;  %v3414_v42 = vor.u32 %v3931_v29, %v3413_v28  ;;  %v2818_v24 = vor.u32 %v3780_v15, %v2815_v16  ;;  %v3746_v25 = vld [vmem:[%s4436_s8 + $0x44] sm:$0xf] }
  0xa7   : > { %2051 = vmatpush.bf16.msrb.mxu1 %v3518_v36  ;;  %v3963_v36 = vld [vmem:[%s4436_s8 + $0x704] sm:$0xf0]  ;;  %v3762_v28 = vld [vmem:[%s4436_s8 + $0xc4] sm:$0xf] }
  0xa8   : > { %2064 = vmatpush.bf16.msrb.mxu2 %v3582_v37  ;;  %v3605_v37 = vld [vmem:[%s4436_s8 + $0x780] sm:$0xf]  ;;  %v3754_v16 = vld [vmem:[%s4436_s8 + $0x84] sm:$0xf] }
  0xa9   : > { %2077 = vmatpush.bf16.msrb.mxu3 %v3646_v41  ;;  %v3768_v41 = vld [vmem:[%s4436_s8 + $0xf4] sm:$0xf]  ;;  %v3606_v50 = vor.u32 %v3979_v38, %v3605_v37 }
  0xaa   : > { %2039 = vmatpush.bf16.msrb.mxu0 %v3446_v47  ;;  %v3542_v47 = vor.u32 %v3963_v36, %v3541_v34  ;;  %v2770_v52 = vor.u32 %v3768_v41, %v2767_v43  ;;  %v2871_v34 = vld [vmem:[%s4436_s8 + $0x1c8] sm:$0xf0]  ;;  %v3744_v38 = vld [vmem:[%s4436_s8 + $0x34] sm:$0xf] }
  0xab   : > { %2052 = vmatpush.bf16.msrb.mxu1 %v3510_v48  ;;  %v3800_v48 = vld [vmem:[%s4436_s8 + $0x1f4] sm:$0xf]  ;;  %v2874_v41 = vor.u32 %v3794_v33, %v2871_v34  ;;  %v3087_v33 = vld [vmem:[%s4436_s8 + $0x378] sm:$0xf0] }
  0xac   : > { %2065 = vmatpush.bf16.msrb.mxu2 %v3574_v49  ;;  %v2895_v49 = vld [vmem:[%s4436_s8 + $0x1f8] sm:$0xf0]  ;;  %v3776_v43 = vld [vmem:[%s4436_s8 + $0x134] sm:$0xf] }
  0xad   : > { %2078 = vmatpush.bf16.msrb.mxu3 %v3638_v53  ;;  %v2834_v53 = vor.u32 %v3784_v44, %v2831_v45  ;;  %v2898_v57 = vor.u32 %v3800_v48, %v2895_v49  ;;  %v2799_v44 = vld [vmem:[%s4436_s8 + $0x138] sm:$0xf0]  ;;  %v3792_v45 = vld [vmem:[%s4436_s8 + $0x1b4] sm:$0xf] }
  0xae   : > { %2040 = vmatpush.bf16.msrb.mxu0 %v3438_v59  ;;  %v3782_v59 = vld [vmem:[%s4436_s8 + $0x164] sm:$0xf]  ;;  %v2802_v49 = vor.u32 %v3776_v43, %v2799_v44  ;;  %v2951_v43 = vld [vmem:[%s4436_s8 + $0x268] sm:$0xf0] }
  0xaf   : > { %2053 = vmatpush.bf16.msrb.mxu1 %v3502_v60  ;;  %v2823_v60 = vld [vmem:[%s4436_s8 + $0x168] sm:$0xf0]  ;;  %v3830_v44 = vld [vmem:[%s4436_s8 + $0x2e4] sm:$0xf] }
  0xb0   : > { %2066 = vmatpush.bf16.msrb.mxu2 %v3566_v62  ;;  %v580_v62 = vld [vmem:[#allocation1 + $0x24] sm:$0xff]  ;;  %v2826_v9 = vor.u32 %v3782_v59, %v2823_v60 }
  0xb1   : > { %2079 = vmatpush.bf16.msrb.mxu3 %v3630_v5  ;;  %v581_v5 = vld [vmem:[#allocation1 + $0x2d] sm:$0xff] }
  0xb2   : > { %2041 = vmatpush.bf16.msrb.mxu0 %v3430_v11  ;;  %v2687_v11 = vld [vmem:[%s4436_s8 + $0x58] sm:$0xf0] }
  0xb3   : > { %2054 = vmatpush.bf16.msrb.mxu1 %v3494_v12  ;;  %v3764_v12 = vld [vmem:[%s4436_s8 + $0xd4] sm:$0xf]  ;;  %v2690_v19 = vor.u32 %v3748_v10, %v2687_v11  ;;  %v2847_v10 = vld [vmem:[%s4436_s8 + $0x198] sm:$0xf0] }
  0xb4   : > { %2067 = vmatpush.bf16.msrb.mxu2 %v3558_v13  ;;  %v2890_v13 = vor.u32 %v3798_v63, %v2887_v0  ;;  %v2754_v20 = vor.u32 %v3764_v12, %v2751_v14  ;;  %v3740_v63 = vld [vmem:[%s4436_s8 + $0x14] sm:$0xf]  ;;  %v2655_v0 = vld [vmem:[%s4436_s8 + $0x18] sm:$0xf0]  ;;  %v3738_v12 = vld [vmem:[%s4436_s8 + $0x4] sm:$0xf] }
  0xb5   : > { %2080 = vmatpush.bf16.msrb.mxu3 %v3622_v17  ;;  %v3796_v17 = vld [vmem:[%s4436_s8 + $0x1d4] sm:$0xf]  ;;  %v2658_v11 = vor.u32 %v3740_v63, %v2655_v0  ;;  %v3135_v63 = vld [vmem:[%s4436_s8 + $0x3d8] sm:$0xf0] }
  0xb6   : > { %2042 = vmatpush.bf16.msrb.mxu0 %v3422_v26  ;;  %v2679_v26 = vld [vmem:[%s4436_s8 + $0x48] sm:$0xf0]  ;;  %v2882_v29 = vor.u32 %v3796_v17, %v2879_v18  ;;  %v3770_v18 = vld [vmem:[%s4436_s8 + $0x104] sm:$0xf] }
  0xb7   : > { %2055 = vmatpush.bf16.msrb.mxu1 %v3486_v30  ;;  %v2743_v30 = vld [vmem:[%s4436_s8 + $0xc8] sm:$0xf0] }
  0xb8   : > { %2068 = vmatpush.bf16.msrb.mxu2 %v3550_v31  ;;  %v3778_v31 = vld [vmem:[%s4436_s8 + $0x144] sm:$0xf]  ;;  %v2746_v36 = vor.u32 %v3762_v28, %v2743_v30  ;;  %v2711_v17 = vld [vmem:[%s4436_s8 + $0x88] sm:$0xf0]  ;;  %v2959_v28 = vld [vmem:[%s4436_s8 + $0x278] sm:$0xf0] }
  0xb9   : > { %2081 = vmatpush.bf16.msrb.mxu3 %v3614_v35  ;;  %v2682_v35 = vor.u32 %v3746_v25, %v2679_v26  ;;  %v2810_v37 = vor.u32 %v3778_v31, %v2807_v32  ;;  %v2839_v25 = vld [vmem:[%s4436_s8 + $0x188] sm:$0xf0]  ;;  %v3816_v26 = vld [vmem:[%s4436_s8 + $0x274] sm:$0xf]  ;;  %v3023_v31 = vld [vmem:[%s4436_s8 + $0x2f8] sm:$0xf0]  ;;  %v2714_v34 = vor.u32 %v3754_v16, %v2711_v17 }
  0xba   : > { %2043 = vmatpush.bf16.msrb.mxu0 %v3414_v42  ;;  %v2735_v42 = vld [vmem:[%s4436_s8 + $0xb8] sm:$0xf0]  ;;  %v3848_v32 = vld [vmem:[%s4436_s8 + $0x374] sm:$0xf] }
  0xbb   : > { %2056 = vmatpush.bf16.msrb.mxu1 %v3478_v46  ;;  %v2863_v46 = vld [vmem:[%s4436_s8 + $0x1b8] sm:$0xf0]  ;;  %v2738_v48 = vor.u32 %v3760_v40, %v2735_v42  ;;  %v3814_v42 = vld [vmem:[%s4436_s8 + $0x264] sm:$0xf]  ;;  %v3824_v16 = vld [vmem:[%s4436_s8 + $0x2b4] sm:$0xf] }
  0xbc   : > { %2069 = vmatpush.bf16.msrb.mxu2 %v3542_v47  ;;  %v2674_v47 = vor.u32 %v3744_v38, %v2671_v39  ;;  %v2962_v39 = vor.u32 %v3816_v26, %v2959_v28 }
  0xbd   : > { %2082 = vmatpush.bf16.msrb.mxu3 %v3606_v50  ;;  %2044 = vmatmul.bf16.vlgmr.msrb.gmra.mxu0 %v580_v62  ;;  %v3742_v50 = vld [vmem:[%s4436_s8 + $0x24] sm:$0xf]  ;;  %v2794_v62 = vor.u32 %v3774_v55, %v2791_v56  ;;  %v2943_v55 = vld [vmem:[%s4436_s8 + $0x258] sm:$0xf0]  ;;  %v3828_v56 = vld [vmem:[%s4436_s8 + $0x2d4] sm:$0xf] }
  0xbe   : > { %2088 = vmatpush.bf16.msra.mxu0 %v2706_v51  ;;  %2057 = vmatmul.bf16.vlgmr.msrb.gmra.mxu1 %v581_v5  ;;  %v2663_v51 = vld [vmem:[%s4436_s8 + $0x28] sm:$0xf0] }
  0xbf   : > { %2101 = vmatpush.bf16.msra.mxu1 %v2770_v52  ;;  %2070 = vmatmul.bf16.vlgmr.msrb.gmra.mxu2 %v582_v4  ;;  %v3758_v52 = vld [vmem:[%s4436_s8 + $0xa4] sm:$0xf]  ;;  %v2666_v59 = vor.u32 %v3742_v50, %v2663_v51  ;;  %v3756_v4 = vld [vmem:[%s4436_s8 + $0x94] sm:$0xf]  ;;  %v3143_v50 = vld [vmem:[%s4436_s8 + $0x3e8] sm:$0xf0]  ;;  %v2954_v51 = vor.u32 %v3814_v42, %v2951_v43 }
  0xc0   : > { %2114 = vmatpush.bf16.msra.mxu2 %v2834_v53  ;;  %2083 = vmatmul.bf16.vlgmr.msrb.gmra.mxu3 %v583_v6  ;;  %v2866_v53 = vor.u32 %v3792_v45, %v2863_v46  ;;  %v2730_v60 = vor.u32 %v3758_v52, %v2727_v54  ;;  %v2719_v6 = vld [vmem:[%s4436_s8 + $0x98] sm:$0xf0]  ;;  %v3015_v46 = vld [vmem:[%s4436_s8 + $0x2e8] sm:$0xf0]  ;;  %v3812_v54 = vld [vmem:[%s4436_s8 + $0x254] sm:$0xf] }
  0xc1   : > { %2127 = vmatpush.bf16.msra.mxu3 %v2898_v57  ;;  %v3790_v57 = vld [vmem:[%s4436_s8 + $0x1a4] sm:$0xf]  ;;  %v2722_v14 = vor.u32 %v3756_v4, %v2719_v6  ;;  %v3018_v52 = vor.u32 %v3830_v44, %v3015_v46  ;;  %v2946_v0 = vor.u32 %v3812_v54, %v2943_v55  ;;  %v2935_v6 = vld [vmem:[%s4436_s8 + $0x248] sm:$0xf0]  ;;  %v3804_v43 = vld [vmem:[%s4436_s8 + $0x214] sm:$0xf] }
  0xc2   : > { %2089 = vmatpush.bf16.msra.mxu0 %v2698_v7  ;;  %v2858_v5 = vor.u32 %v3790_v57, %v2855_v58  ;;  %v3772_v7 = vld [vmem:[%s4436_s8 + $0x114] sm:$0xf]  ;;  %v3007_v58 = vld [vmem:[%s4436_s8 + $0x2d8] sm:$0xf0]  ;;  %v3802_v55 = vld [vmem:[%s4436_s8 + $0x204] sm:$0xf] }
  0xc3   : > { %2102 = vmatpush.bf16.msra.mxu1 %v2762_v8  ;;  %v2783_v8 = vld [vmem:[%s4436_s8 + $0x118] sm:$0xf0]  ;;  %v3010_v4 = vor.u32 %v3828_v56, %v3007_v58  ;;  %v2903_v56 = vld [vmem:[%s4436_s8 + $0x208] sm:$0xf0] }
  0xc4   : > { %2115 = vmatpush.bf16.msra.mxu2 %v2826_v9  ;;  %v3788_v9 = vld [vmem:[%s4436_s8 + $0x194] sm:$0xf]  ;;  %v2786_v15 = vor.u32 %v3772_v7, %v2783_v8  ;;  %v3826_v7 = vld [vmem:[%s4436_s8 + $0x2c4] sm:$0xf]  ;;  %v2999_v8 = vld [vmem:[%s4436_s8 + $0x2c8] sm:$0xf0] }
  0xc5   : > { %2128 = vmatpush.bf16.msra.mxu3 %v2890_v13  ;;  %v2647_v13 = vld [vmem:[%s4436_s8 + $0x8] sm:$0xf0]  ;;  %v2911_v44 = vld [vmem:[%s4436_s8 + $0x218] sm:$0xf0] }
  0xc6   : > { %2090 = vmatpush.bf16.msra.mxu0 %v2690_v19  ;;  %v2850_v19 = vor.u32 %v3788_v9, %v2847_v10  ;;  %v2650_v30 = vor.u32 %v3738_v12, %v2647_v13  ;;  %v3063_v9 = vld [vmem:[%s4436_s8 + $0x348] sm:$0xf0]  ;;  %v3858_v10 = vld [vmem:[%s4436_s8 + $0x3c4] sm:$0xf]  ;;  %v3002_v12 = vor.u32 %v3826_v7, %v2999_v8  ;;  %v2914_v54 = vor.u32 %v3804_v43, %v2911_v44  ;;  %v3215_v8 = vld [vmem:[%s4436_s8 + $0x478] sm:$0xf0] }
  0xc7   : > { %2103 = vmatpush.bf16.msra.mxu1 %v2754_v20  ;;  %v2775_v20 = vld [vmem:[%s4436_s8 + $0x108] sm:$0xf0]  ;;  %v3892_v43 = vld [vmem:[%s4436_s8 + $0x4d4] sm:$0xf] }
  0xc8   : > { %2116 = vmatpush.bf16.msra.mxu2 %v2818_v24  ;;  %v3786_v24 = vld [vmem:[%s4436_s8 + $0x184] sm:$0xf] }
  0xc9   : > { %2129 = vmatpush.bf16.msra.mxu3 %v2882_v29  ;;  %v3832_v29 = vld [vmem:[%s4436_s8 + $0x2f4] sm:$0xf]  ;;  %v2842_v38 = vor.u32 %v3786_v24, %v2839_v25  ;;  %v3119_v25 = vld [vmem:[%s4436_s8 + $0x3b8] sm:$0xf0] }
  0xca   : > { %2091 = vmatpush.bf16.msra.mxu0 %v2682_v35  ;;  %v2778_v35 = vor.u32 %v3770_v18, %v2775_v20  ;;  %v3026_v40 = vor.u32 %v3832_v29, %v3023_v31  ;;  %v2991_v18 = vld [vmem:[%s4436_s8 + $0x2b8] sm:$0xf0]  ;;  %v3856_v24 = vld [vmem:[%s4436_s8 + $0x3b4] sm:$0xf]  ;;  %v2919_v31 = vld [vmem:[%s4436_s8 + $0x228] sm:$0xf0] }
  0xcb   : > { %2104 = vmatpush.bf16.msra.mxu1 %v2746_v36  ;;  %v3864_v36 = vld [vmem:[%s4436_s8 + $0x3f4] sm:$0xf]  ;;  %v3055_v20 = vld [vmem:[%s4436_s8 + $0x338] sm:$0xf0]  ;;  %v2994_v28 = vor.u32 %v3824_v16, %v2991_v18 }
  0xcc   : > { %2117 = vmatpush.bf16.msra.mxu2 %v2810_v37  ;;  %v3151_v37 = vld [vmem:[%s4436_s8 + $0x3f8] sm:$0xf0]  ;;  %v3928_v16 = vld [vmem:[%s4436_s8 + $0x5f4] sm:$0xf] }
  0xcd   : > { %2130 = vmatpush.bf16.msra.mxu3 %v2874_v41  ;;  %v3090_v41 = vor.u32 %v3848_v32, %v3087_v33  ;;  %v3154_v45 = vor.u32 %v3864_v36, %v3151_v37  ;;  %v3822_v32 = vld [vmem:[%s4436_s8 + $0x2a4] sm:$0xf]  ;;  %v3122_v33 = vor.u32 %v3856_v24, %v3119_v25  ;;  %v3047_v36 = vld [vmem:[%s4436_s8 + $0x328] sm:$0xf0] }
  0xce   : > { %2092 = vmatpush.bf16.msra.mxu0 %v2674_v47  ;;  %v3846_v47 = vld [vmem:[%s4436_s8 + $0x364] sm:$0xf] }
  0xcf   : > { %2105 = vmatpush.bf16.msra.mxu1 %v2738_v48  ;;  %v3079_v48 = vld [vmem:[%s4436_s8 + $0x368] sm:$0xf0]  ;;  %v3854_v37 = vld [vmem:[%s4436_s8 + $0x3a4] sm:$0xf] }
  0xd0   : > { %2118 = vmatpush.bf16.msra.mxu2 %v2802_v49  ;;  %v3862_v49 = vld [vmem:[%s4436_s8 + $0x3e4] sm:$0xf] }
  0xd1   : > { %2131 = vmatpush.bf16.msra.mxu3 %v2866_v53  ;;  %v3082_v53 = vor.u32 %v3846_v47, %v3079_v48  ;;  %v3146_v57 = vor.u32 %v3862_v49, %v3143_v50  ;;  %v2975_v48 = vld [vmem:[%s4436_s8 + $0x298] sm:$0xf0]  ;;  %v3836_v49 = vld [vmem:[%s4436_s8 + $0x314] sm:$0xf] }
  0xd2   : > { %2093 = vmatpush.bf16.msra.mxu0 %v2666_v59  ;;  %v3844_v59 = vld [vmem:[%s4436_s8 + $0x354] sm:$0xf]  ;;  %v3039_v50 = vld [vmem:[%s4436_s8 + $0x318] sm:$0xf0] }
  0xd3   : > { %2106 = vmatpush.bf16.msra.mxu1 %v2730_v60  ;;  %v3071_v60 = vld [vmem:[%s4436_s8 + $0x358] sm:$0xf0]  ;;  %v3042_v58 = vor.u32 %v3836_v49, %v3039_v50 }
  0xd4   : > { %2119 = vmatpush.bf16.msra.mxu2 %v2794_v62  ;;  %v3860_v62 = vld [vmem:[%s4436_s8 + $0x3d4] sm:$0xf]  ;;  %v3391_v49 = vld [vmem:[%s4436_s8 + $0x5d8] sm:$0xf0] }
  0xd5   : > { %2132 = vmatpush.bf16.msra.mxu3 %v2858_v5  ;;  %v3074_v5 = vor.u32 %v3844_v59, %v3071_v60  ;;  %v3818_v59 = vld [vmem:[%s4436_s8 + $0x284] sm:$0xf]  ;;  %v2967_v60 = vld [vmem:[%s4436_s8 + $0x288] sm:$0xf0] }
  0xd6   : > { %2094 = vmatpush.bf16.msra.mxu0 %v2658_v11 }
  0xd7   : > { %2107 = vmatpush.bf16.msra.mxu1 %v2722_v14  ;;  %v3808_v14 = vld [vmem:[%s4436_s8 + $0x234] sm:$0xf] }
  0xd8   : > { %2120 = vmatpush.bf16.msra.mxu2 %v2786_v15  ;;  %v2927_v15 = vld [vmem:[%s4436_s8 + $0x238] sm:$0xf0] }
  0xd9   : > { %2133 = vmatpush.bf16.msra.mxu3 %v2850_v19  ;;  %v3840_v19 = vld [vmem:[%s4436_s8 + $0x334] sm:$0xf]  ;;  %v2930_v26 = vor.u32 %v3808_v14, %v2927_v15  ;;  %v2970_v14 = vor.u32 %v3818_v59, %v2967_v60 }
  0xda   : > { %2095 = vmatpush.bf16.msra.mxu0 %v2650_v30  ;;  %v3058_v29 = vor.u32 %v3840_v19, %v3055_v20  ;;  %v3806_v30 = vld [vmem:[%s4436_s8 + $0x224] sm:$0xf] }
  0xdb   : > { %2108 = vmatpush.bf16.msra.mxu1 %v2714_v34  ;;  %v2983_v34 = vld [vmem:[%s4436_s8 + $0x2a8] sm:$0xf0] }
  0xdc   : > { %2121 = vmatpush.bf16.msra.mxu2 %v2778_v35  ;;  %v3838_v35 = vld [vmem:[%s4436_s8 + $0x324] sm:$0xf] }
  0xdd   : > { %2134 = vmatpush.bf16.msra.mxu3 %v2842_v38  ;;  %2096 = vmatmul.bf16.vlgmr.msra.gmra.mxu0 %v4561_v22  ;;  %v3138_v22 = vor.u32 %v3860_v62, %v3135_v63  ;;  %v3111_v38 = vld [vmem:[%s4436_s8 + $0x3a8] sm:$0xf0]  ;;  %v3050_v42 = vor.u32 %v3838_v35, %v3047_v36  ;;  %v3834_v62 = vld [vmem:[%s4436_s8 + $0x304] sm:$0xf] }
  0xde   : > { %2140 = vmatpush.bf16.msrb.mxu0 %v2962_v39  ;;  %2109 = vmatmul.bf16.vlgmr.msra.gmra.mxu1 %v4568_v27  ;;  %v3127_v27 = vld [vmem:[%s4436_s8 + $0x3c8] sm:$0xf0]  ;;  %v2922_v39 = vor.u32 %v3806_v30, %v2919_v31  ;;  %v3114_v47 = vor.u32 %v3854_v37, %v3111_v38 }
  0xdf   : > { %2153 = vmatpush.bf16.msrb.mxu1 %v3026_v40  ;;  %2122 = vmatmul.bf16.vlgmr.msra.gmra.mxu2 %v4559_v21  ;;  %v3810_v21 = vld [vmem:[%s4436_s8 + $0x244] sm:$0xf]  ;;  %v3130_v17 = vor.u32 %v3858_v10, %v3127_v27  ;;  %v1889_v40 = vpop.f32.mrf.mxu0  ;;  %v3279_v10 = vld [vmem:[%s4436_s8 + $0x4f8] sm:$0xf0]  ;;  %v3912_v27 = vld [vmem:[%s4436_s8 + $0x574] sm:$0xf] }
  0xe0   : > { %2166 = vmatpush.bf16.msrb.mxu2 %v3090_v41  ;;  %2135 = vmatmul.bf16.vlgmr.msra.gmra.mxu3 %v4563_v23  ;;  %v3842_v23 = vld [vmem:[%s4436_s8 + $0x344] sm:$0xf]  ;;  %v2938_v11 = vor.u32 %v3810_v21, %v2935_v6  ;;  %v2986_v41 = vor.u32 %v3822_v32, %v2983_v34  ;;  %v3095_v21 = vld [vmem:[%s4436_s8 + $0x388] sm:$0xf0] }
  0xe1   : > { %2179 = vmatpush.bf16.msrb.mxu3 %v3154_v45  ;;  %v3066_v13 = vor.u32 %v3842_v23, %v3063_v9  ;;  %v3820_v45 = vld [vmem:[%s4436_s8 + $0x294] sm:$0xf]  ;;  %v1902_v46 = vpop.f32.mrf.mxu1  ;;  %v2906_v9 = vor.u32 %v3802_v55, %v2903_v56  ;;  %v3271_v31 = vld [vmem:[%s4436_s8 + $0x4e8] sm:$0xf0]  ;;  %v3910_v32 = vld [vmem:[%s4436_s8 + $0x564] sm:$0xf] }
  0xe2   : > { %2141 = vmatpush.bf16.msrb.mxu0 %v2954_v51  ;;  %v1903_v51 = vadd.f32 %v1902_v46, %v1889_v40  ;;  %v3896_v23 = vld [vmem:[%s4436_s8 + $0x4f4] sm:$0xf]  ;;  %v3926_v34 = vld [vmem:[%s4436_s8 + $0x5e4] sm:$0xf]  ;;  %v3399_v35 = vld [vmem:[%s4436_s8 + $0x5e8] sm:$0xf0] }
  0xe3   : > { %2154 = vmatpush.bf16.msrb.mxu1 %v3018_v52  ;;  %v3852_v52 = vld [vmem:[%s4436_s8 + $0x394] sm:$0xf]  ;;  %v3282_v24 = vor.u32 %v3896_v23, %v3279_v10  ;;  %v3402_v44 = vor.u32 %v3926_v34, %v3399_v35  ;;  %v3906_v55 = vld [vmem:[%s4436_s8 + $0x544] sm:$0xf]  ;;  %v3319_v56 = vld [vmem:[%s4436_s8 + $0x548] sm:$0xf0] }
  0xe4   : > { %2167 = vmatpush.bf16.msrb.mxu2 %v3082_v53  ;;  %v3103_v53 = vld [vmem:[%s4436_s8 + $0x398] sm:$0xf0]  ;;  %v1915_v63 = vpop.f32.mrf.mxu2  ;;  %v3908_v46 = vld [vmem:[%s4436_s8 + $0x554] sm:$0xf] }
  0xe5   : > { %2180 = vmatpush.bf16.msrb.mxu3 %v3146_v57  ;;  %v2978_v57 = vor.u32 %v3820_v45, %v2975_v48  ;;  %v1916_v6 = vadd.f32 %v1915_v63, %v1903_v51  ;;  %v1928_v7 = vpop.f32.mrf.mxu3  ;;  %v3263_v45 = vld [vmem:[%s4436_s8 + $0x4d8] sm:$0xf0]  ;;  %v3924_v48 = vld [vmem:[%s4436_s8 + $0x5d4] sm:$0xf] }
  0xe6   : > { %2142 = vmatpush.bf16.msrb.mxu0 %v2946_v0  ;;  %v3106_v0 = vor.u32 %v3852_v52, %v3103_v53  ;;  %v3874_v52 = vld [vmem:[%s4436_s8 + $0x444] sm:$0xf]  ;;  %v3191_v53 = vld [vmem:[%s4436_s8 + $0x448] sm:$0xf0]  ;;  %v3872_v63 = vld [vmem:[%s4436_s8 + $0x434] sm:$0xf] }
  0xe7   : > { %2155 = vmatpush.bf16.msrb.mxu1 %v3010_v4  ;;  %v3031_v4 = vld [vmem:[%s4436_s8 + $0x308] sm:$0xf0]  ;;  %v3920_v23 = vld [vmem:[%s4436_s8 + $0x5b4] sm:$0xf]  ;;  %v3167_v35 = vld [vmem:[%s4436_s8 + $0x418] sm:$0xf0] }
  0xe8   : > { %2168 = vmatpush.bf16.msrb.mxu2 %v3074_v5  ;;  %v3850_v5 = vld [vmem:[%s4436_s8 + $0x384] sm:$0xf]  ;;  %v3034_v15 = vor.u32 %v3834_v62, %v3031_v4  ;;  %v3322_v62 = vor.u32 %v3906_v55, %v3319_v56  ;;  %v3888_v4 = vld [vmem:[%s4436_s8 + $0x4b4] sm:$0xf]  ;;  %v3471_v56 = vld [vmem:[%s4436_s8 + $0x678] sm:$0xf0] }
  0xe9   : > { %2181 = vmatpush.bf16.msrb.mxu3 %v3138_v22  ;;  %v3880_v22 = vld [vmem:[%s4436_s8 + $0x474] sm:$0xf]  ;;  %v1904_v18 = vpop.f32.mrf.mxu1  ;;  %v3098_v19 = vor.u32 %v3850_v5, %v3095_v21 }
  0xea   : > { %2143 = vmatpush.bf16.msrb.mxu0 %v2938_v11  ;;  %v3343_v11 = vld [vmem:[%s4436_s8 + $0x578] sm:$0xf0]  ;;  %v3218_v20 = vor.u32 %v3880_v22, %v3215_v8  ;;  %v3904_v22 = vld [vmem:[%s4436_s8 + $0x534] sm:$0xf]  ;;  %v3239_v18 = vld [vmem:[%s4436_s8 + $0x4a8] sm:$0xf0] }
  0xeb   : > { %2156 = vmatpush.bf16.msrb.mxu1 %v3002_v12  ;;  %v4878_v12 = vadd.f32 %v1928_v7, %v1916_v6  ;;  %v3346_v25 = vor.u32 %v3912_v27, %v3343_v11  ;;  %v3247_v7 = vld [vmem:[%s4436_s8 + $0x4b8] sm:$0xf0]  ;;  %v3868_v34 = vld [vmem:[%s4436_s8 + $0x414] sm:$0xf] }
  0xec   : > { %2169 = vmatpush.bf16.msrb.mxu2 %v3066_v13  ;;  %v1891_v13 = vpop.f32.mrf.mxu0  ;;  %v1917_v36 = vpop.f32.mrf.mxu2  ;;  %v3311_v8 = vld [vmem:[%s4436_s8 + $0x538] sm:$0xf0]  ;;  %v3250_v11 = vor.u32 %v3888_v4, %v3247_v7  ;;  %v3944_v55 = vld [vmem:[%s4436_s8 + $0x674] sm:$0xf] }
  0xed   : > { %2182 = vmatpush.bf16.msrb.mxu3 %v3130_v17  ;;  %v3407_v17 = vld [vmem:[%s4436_s8 + $0x5f8] sm:$0xf0]  ;;  %v1930_v38 = vpop.f32.mrf.mxu3  ;;  %v3870_v13 = vld [vmem:[%s4436_s8 + $0x424] sm:$0xf]  ;;  %v3884_v36 = vld [vmem:[%s4436_s8 + $0x494] sm:$0xf] }
  0xee   : > { %2144 = vmatpush.bf16.msrb.mxu0 %v2930_v26  ;;  %v3878_v26 = vld [vmem:[%s4436_s8 + $0x464] sm:$0xf]  ;;  %v3410_v30 = vor.u32 %v3928_v16, %v3407_v17  ;;  %v3663_v4 = vld [vmem:[%s4436_s8 + $0x7f8] sm:$0xf0] }
  0xef   : > { %2157 = vmatpush.bf16.msrb.mxu1 %v2994_v28  ;;  %v3207_v28 = vld [vmem:[%s4436_s8 + $0x468] sm:$0xf0] }
  0xf0   : > { %2170 = vmatpush.bf16.msrb.mxu2 %v3058_v29  ;;  %v3894_v29 = vld [vmem:[%s4436_s8 + $0x4e4] sm:$0xf]  ;;  %v3210_v37 = vor.u32 %v3878_v26, %v3207_v28  ;;  %v3367_v28 = vld [vmem:[%s4436_s8 + $0x5a8] sm:$0xf0] }
  0xf1   : > { %2183 = vmatpush.bf16.msrb.mxu3 %v3122_v33  ;;  %v3335_v33 = vld [vmem:[%s4436_s8 + $0x568] sm:$0xf0]  ;;  %v3918_v26 = vld [vmem:[%s4436_s8 + $0x5a4] sm:$0xf] }
  0xf2   : > { %2145 = vmatpush.bf16.msrb.mxu0 %v2922_v39  ;;  %v3274_v39 = vor.u32 %v3894_v29, %v3271_v31  ;;  %v3338_v40 = vor.u32 %v3910_v32, %v3335_v33  ;;  %v3370_v38 = vor.u32 %v3918_v26, %v3367_v28  ;;  %v3972_v26 = vld [vmem:[%s4436_s8 + $0x754] sm:$0xf]  ;;  %v3583_v28 = vld [vmem:[%s4436_s8 + $0x758] sm:$0xf0] }
  0xf3   : > { %2158 = vmatpush.bf16.msrb.mxu1 %v2986_v41  ;;  %v3876_v41 = vld [vmem:[%s4436_s8 + $0x454] sm:$0xf] }
  0xf4   : > { %2171 = vmatpush.bf16.msrb.mxu2 %v3050_v42  ;;  %v3199_v42 = vld [vmem:[%s4436_s8 + $0x458] sm:$0xf0] }
  0xf5   : > { %2184 = vmatpush.bf16.msrb.mxu3 %v3114_v47  ;;  %v3327_v47 = vld [vmem:[%s4436_s8 + $0x558] sm:$0xf0]  ;;  %v3202_v50 = vor.u32 %v3876_v41, %v3199_v42  ;;  %v3916_v42 = vld [vmem:[%s4436_s8 + $0x594] sm:$0xf] }
  0xf6   : > { %2146 = vmatpush.bf16.msrb.mxu0 %v2914_v54  ;;  %v3330_v51 = vor.u32 %v3908_v46, %v3327_v47  ;;  %v3255_v54 = vld [vmem:[%s4436_s8 + $0x4c8] sm:$0xf0]  ;;  %v3295_v41 = vld [vmem:[%s4436_s8 + $0x518] sm:$0xf0] }
  0xf7   : > { %2159 = vmatpush.bf16.msrb.mxu1 %v2978_v57  ;;  %v3922_v57 = vld [vmem:[%s4436_s8 + $0x5c4] sm:$0xf]  ;;  %v3159_v46 = vld [vmem:[%s4436_s8 + $0x408] sm:$0xf0] }
  0xf8   : > { %2172 = vmatpush.bf16.msrb.mxu2 %v3042_v58  ;;  %v3383_v58 = vld [vmem:[%s4436_s8 + $0x5c8] sm:$0xf0] }
  0xf9   : > { %2185 = vmatpush.bf16.msrb.mxu3 %v3106_v0  ;;  %v3183_v0 = vld [vmem:[%s4436_s8 + $0x438] sm:$0xf0]  ;;  %v3386_v6 = vor.u32 %v3922_v57, %v3383_v58  ;;  %v3960_v57 = vld [vmem:[%s4436_s8 + $0x6f4] sm:$0xf] }
  0xfa   : > { %2147 = vmatpush.bf16.msrb.mxu0 %v2906_v9  ;;  %v1941_v59 = vpop.f32.mrf.mxu0  ;;  %v3375_v9 = vld [vmem:[%s4436_s8 + $0x5b8] sm:$0xf0]  ;;  %v3186_v27 = vor.u32 %v3872_v63, %v3183_v0  ;;  %v3992_v0 = vld [vmem:[%s4436_s8 + $0x7f4] sm:$0xf] }
  0xfb   : > { %2160 = vmatpush.bf16.msrb.mxu1 %v2970_v14  ;;  %v1942_v5 = vadd.f32 %v1941_v59, %v4878_v12  ;;  %v1954_v21 = vpop.f32.mrf.mxu1  ;;  %v3314_v12 = vor.u32 %v3904_v22, %v3311_v8  ;;  %v3175_v14 = vld [vmem:[%s4436_s8 + $0x428] sm:$0xf0]  ;;  %v3378_v17 = vor.u32 %v3920_v23, %v3375_v9  ;;  %v3976_v59 = vld [vmem:[%s4436_s8 + $0x774] sm:$0xf]  ;;  %v3942_v22 = vld [vmem:[%s4436_s8 + $0x664] sm:$0xf]  ;;  %v3666_v9 = vor.u32 %v3992_v0, %v3663_v4 }
  0xfc   : > { %2173 = vmatpush.bf16.msrb.mxu2 %v3034_v15  ;;  %v3886_v15 = vld [vmem:[%s4436_s8 + $0x4a4] sm:$0xf]  ;;  %v3178_v29 = vor.u32 %v3870_v13, %v3175_v14  ;;  %v3463_v8 = vld [vmem:[%s4436_s8 + $0x668] sm:$0xf0] }
  0xfd   : > { %2186 = vmatpush.bf16.msrb.mxu3 %v3098_v19  ;;  %2148 = vmatmul.bf16.vlgmr.msrb.gmra.mxu0 %v4600_v1  ;;  %v3890_v1 = vld [vmem:[%s4436_s8 + $0x4c4] sm:$0xf]  ;;  %v1955_v10 = vadd.f32 %v1954_v21, %v1942_v5  ;;  %v3242_v32 = vor.u32 %v3886_v15, %v3239_v18  ;;  %v3474_v21 = vor.u32 %v3944_v55, %v3471_v56  ;;  %v3655_v13 = vld [vmem:[%s4436_s8 + $0x7e8] sm:$0xf0]  ;;  %v3455_v18 = vld [vmem:[%s4436_s8 + $0x658] sm:$0xf0] }
  0xfe   : > { %2192 = vmatpush.bf16.msra.mxu0 %v3218_v20  ;;  %2161 = vmatmul.bf16.vlgmr.msrb.gmra.mxu1 %v4604_v3  ;;  %v3194_v3 = vor.u32 %v3874_v52, %v3191_v53  ;;  %v3258_v60 = vor.u32 %v3890_v1, %v3255_v54  ;;  %v3902_v19 = vld [vmem:[%s4436_s8 + $0x524] sm:$0xf]  ;;  %v3303_v20 = vld [vmem:[%s4436_s8 + $0x528] sm:$0xf0]  ;;  %v3466_v14 = vor.u32 %v3942_v22, %v3463_v8  ;;  %v3503_v55 = vld [vmem:[%s4436_s8 + $0x6b8] sm:$0xf0] }
  0xff   : > { %2205 = vmatpush.bf16.msra.mxu1 %v3282_v24  ;;  %2174 = vmatmul.bf16.vlgmr.msrb.gmra.mxu2 %v4597_v61  ;;  %v3266_v61 = vor.u32 %v3892_v43, %v3263_v45  ;;  %v3306_v33 = vor.u32 %v3902_v19, %v3303_v20  ;;  %v3359_v43 = vld [vmem:[%s4436_s8 + $0x598] sm:$0xf0]  ;;  %v3866_v45 = vld [vmem:[%s4436_s8 + $0x404] sm:$0xf]  ;;  %v3287_v53 = vld [vmem:[%s4436_s8 + $0x508] sm:$0xf0] }
 0x100   : > { %2218 = vmatpush.bf16.msra.mxu2 %v3346_v25  ;;  %2187 = vmatmul.bf16.vlgmr.msrb.gmra.mxu3 %v4602_v2  ;;  %v3394_v2 = vor.u32 %v3924_v48, %v3391_v49  ;;  %v3882_v49 = vld [vmem:[%s4436_s8 + $0x484] sm:$0xf]  ;;  %v3362_v52 = vor.u32 %v3916_v42, %v3359_v43  ;;  %v3162_v58 = vor.u32 %v3866_v45, %v3159_v46  ;;  %v3956_v19 = vld [vmem:[%s4436_s8 + $0x6d4] sm:$0xf]  ;;  %v3511_v42 = vld [vmem:[%s4436_s8 + $0x6c8] sm:$0xf0] }
 0x101   : > { %2231 = vmatpush.bf16.msra.mxu3 %v3410_v30  ;;  %v3914_v1 = vld [vmem:[%s4436_s8 + $0x584] sm:$0xf]  ;;  %v4093_v20 = vld [vmem:[#allocation1] sm:$0xff] }
 0x102   : > { %2193 = vmatpush.bf16.msra.mxu0 %v3210_v37  ;;  %v1967_v16 = vpop.f32.mrf.mxu2  ;;  %v1943_v31 = vpop.f32.mrf.mxu0  ;;  %v3958_v23 = vld [vmem:[%s4436_s8 + $0x6e4] sm:$0xf]  ;;  %v3968_v56 = vld [vmem:[%s4436_s8 + $0x734] sm:$0xf] }
 0x103   : > { %2206 = vmatpush.bf16.msra.mxu1 %v3274_v39  ;;  %v1968_v24 = vadd.f32 %v1967_v16, %v1955_v10  ;;  %v1980_v25 = vpop.f32.mrf.mxu3  ;;  %v1956_v37 = vpop.f32.mrf.mxu1  ;;  %v3231_v39 = vld [vmem:[%s4436_s8 + $0x498] sm:$0xf0]  ;;  %v3527_v10 = vld [vmem:[%s4436_s8 + $0x6e8] sm:$0xf0]  ;;  %v3970_v43 = vld [vmem:[%s4436_s8 + $0x744] sm:$0xf] }
 0x104   : > { %2219 = vmatpush.bf16.msra.mxu2 %v3338_v40  ;;  %v3900_v40 = vld [vmem:[%s4436_s8 + $0x514] sm:$0xf]  ;;  %v3234_v47 = vor.u32 %v3884_v36, %v3231_v39  ;;  %v3530_v15 = vor.u32 %v3958_v23, %v3527_v10  ;;  %v4095_v31 = vld [vmem:[#allocation1 + $0x9] sm:$0xff]  ;;  %v3586_v37 = vor.u32 %v3972_v26, %v3583_v28  ;;  %v3447_v39 = vld [vmem:[%s4436_s8 + $0x648] sm:$0xf0] }
 0x105   : > { %2232 = vmatpush.bf16.msra.mxu3 %v3402_v44  ;;  %v4927_v30 = vadd.f32 %v1980_v25, %v1968_v24  ;;  %v3170_v44 = vor.u32 %v3868_v34, %v3167_v35  ;;  %v3298_v48 = vor.u32 %v3900_v40, %v3295_v41  ;;  %v3519_v25 = vld [vmem:[%s4436_s8 + $0x6d8] sm:$0xf0]  ;;  %v4096_v34 = vld [vmem:[#allocation1 + $0x1b] sm:$0xff]  ;;  %v3954_v40 = vld [vmem:[%s4436_s8 + $0x6c4] sm:$0xf] }
 0x106   : > { %2194 = vmatpush.bf16.msra.mxu0 %v3202_v50  ;;  %v3223_v50 = vld [vmem:[%s4436_s8 + $0x488] sm:$0xf0]  ;;  %v3522_v36 = vor.u32 %v3956_v19, %v3519_v25  ;;  %v3986_v46 = vld [vmem:[%s4436_s8 + $0x7c4] sm:$0xf]  ;;  %v3487_v19 = vld [vmem:[%s4436_s8 + $0x698] sm:$0xf0] }
 0x107   : > { %2207 = vmatpush.bf16.msra.mxu1 %v3266_v61  ;;  %v3898_v61 = vld [vmem:[%s4436_s8 + $0x504] sm:$0xf]  ;;  %v3980_v25 = vld [vmem:[%s4436_s8 + $0x794] sm:$0xf]  ;;  %v3615_v26 = vld [vmem:[%s4436_s8 + $0x798] sm:$0xf0] }
 0x108   : > { %2220 = vmatpush.bf16.msra.mxu2 %v3330_v51  ;;  %v3290_v63 = vor.u32 %v3898_v61, %v3287_v53  ;;  %v3514_v61 = vor.u32 %v3954_v40, %v3511_v42  ;;  %v3439_v53 = vld [vmem:[%s4436_s8 + $0x638] sm:$0xf0]  ;;  %v3950_v0 = vld [vmem:[%s4436_s8 + $0x6a4] sm:$0xf] }
 0x109   : > { %2233 = vmatpush.bf16.msra.mxu3 %v3394_v2  ;;  %v3351_v2 = vld [vmem:[%s4436_s8 + $0x588] sm:$0xf0]  ;;  %v3982_v23 = vld [vmem:[%s4436_s8 + $0x7a4] sm:$0xf] }
 0x10a   : > { %2195 = vmatpush.bf16.msra.mxu0 %v3194_v3  ;;  %v1969_v51 = vpop.f32.mrf.mxu2  ;;  %v3535_v3 = vld [vmem:[%s4436_s8 + $0x6f8] sm:$0xf0]  ;;  %v3354_v5 = vor.u32 %v3914_v1, %v3351_v2  ;;  %v3952_v1 = vld [vmem:[%s4436_s8 + $0x6b4] sm:$0xf]  ;;  %v3978_v40 = vld [vmem:[%s4436_s8 + $0x784] sm:$0xf] }
 0x10b   : > { %2208 = vmatpush.bf16.msra.mxu1 %v3258_v60  ;;  %v1982_v54 = vpop.f32.mrf.mxu3  ;;  %v3599_v60 = vld [vmem:[%s4436_s8 + $0x778] sm:$0xf0] }
 0x10c   : > { %2221 = vmatpush.bf16.msra.mxu2 %v3322_v62  ;;  %v3226_v62 = vor.u32 %v3882_v49, %v3223_v50  ;;  %v3602_v7 = vor.u32 %v3976_v59, %v3599_v60  ;;  %v3506_v59 = vor.u32 %v3952_v1, %v3503_v55 }
 0x10d   : > { %2234 = vmatpush.bf16.msra.mxu3 %v3386_v6  ;;  %v3538_v6 = vor.u32 %v3960_v57, %v3535_v3  ;;  %v3984_v57 = vld [vmem:[%s4436_s8 + $0x7b4] sm:$0xf] }
 0x10e   : > { %2196 = vmatpush.bf16.msra.mxu0 %v3186_v27  ;;  %v3974_v27 = vld [vmem:[%s4436_s8 + $0x764] sm:$0xf] }
 0x10f   : > { %2209 = vmatpush.bf16.msra.mxu1 %v3250_v11  ;;  %v3591_v11 = vld [vmem:[%s4436_s8 + $0x768] sm:$0xf0] }
 0x110   : > { %2222 = vmatpush.bf16.msra.mxu2 %v3314_v12  ;;  %v3990_v12 = vld [vmem:[%s4436_s8 + $0x7e4] sm:$0xf]  ;;  %v3594_v16 = vor.u32 %v3974_v27, %v3591_v11 }
 0x111   : > { %2235 = vmatpush.bf16.msra.mxu3 %v3378_v17  ;;  %v3940_v17 = vld [vmem:[%s4436_s8 + $0x654] sm:$0xf]  ;;  %v3658_v24 = vor.u32 %v3990_v12, %v3655_v13 }
 0x112   : > { %2197 = vmatpush.bf16.msra.mxu0 %v3178_v29  ;;  %v4094_v29 = vld [vmem:[#allocation1 + $0x12] sm:$0xff]  ;;  %v3458_v35 = vor.u32 %v3940_v17, %v3455_v18  ;;  %v3948_v17 = vld [vmem:[%s4436_s8 + $0x694] sm:$0xf] }
 0x113   : > { %2210 = vmatpush.bf16.msra.mxu1 %v3242_v32  ;;  %v3988_v32 = vld [vmem:[%s4436_s8 + $0x7d4] sm:$0xf] }
 0x114   : > { %2223 = vmatpush.bf16.msra.mxu2 %v3306_v33  ;;  %v3647_v33 = vld [vmem:[%s4436_s8 + $0x7d8] sm:$0xf0] }
 0x115   : > { %2236 = vmatpush.bf16.msra.mxu3 %v3370_v38  ;;  %v3938_v38 = vld [vmem:[%s4436_s8 + $0x644] sm:$0xf]  ;;  %v3650_v41 = vor.u32 %v3988_v32, %v3647_v33  ;;  %v3415_v33 = vld [vmem:[%s4436_s8 + $0x608] sm:$0xf0] }
 0x116   : > { %2198 = vmatpush.bf16.msra.mxu0 %v3170_v44  ;;  %v3575_v44 = vld [vmem:[%s4436_s8 + $0x748] sm:$0xf0]  ;;  %v3450_v49 = vor.u32 %v3938_v38, %v3447_v39  ;;  %v3930_v32 = vld [vmem:[%s4436_s8 + $0x604] sm:$0xf] }
 0x117   : > { %2211 = vmatpush.bf16.msra.mxu1 %v3234_v47  ;;  %v3639_v47 = vld [vmem:[%s4436_s8 + $0x7c8] sm:$0xf0]  ;;  %v3578_v51 = vor.u32 %v3970_v43, %v3575_v44  ;;  %v3418_v43 = vor.u32 %v3930_v32, %v3415_v33 }
 0x118   : > { %2224 = vmatpush.bf16.msra.mxu2 %v3298_v48  ;;  %v3642_v2 = vor.u32 %v3986_v46, %v3639_v47  ;;  %v3543_v38 = vld [vmem:[%s4436_s8 + $0x708] sm:$0xf0]  ;;  %v4097_v47 = vld [vmem:[#allocation1 + $0x24] sm:$0xff] }
 0x119   : > { %2237 = vmatpush.bf16.msra.mxu3 %v3362_v52  ;;  %v3936_v52 = vld [vmem:[%s4436_s8 + $0x634] sm:$0xf] }
 0x11a   : > { %2199 = vmatpush.bf16.msra.mxu0 %v3162_v58  ;;  %v1993_v45 = vpop.f32.mrf.mxu0  ;;  %v3631_v58 = vld [vmem:[%s4436_s8 + $0x7b8] sm:$0xf0]  ;;  %v3442_v3 = vor.u32 %v3936_v52, %v3439_v53 }
 0x11b   : > { %2212 = vmatpush.bf16.msra.mxu1 %v3226_v62  ;;  %v1994_v48 = vadd.f32 %v1993_v45, %v4927_v30  ;;  %v2006_v50 = vpop.f32.mrf.mxu1  ;;  %v3567_v30 = vld [vmem:[%s4436_s8 + $0x738] sm:$0xf0]  ;;  %v3934_v62 = vld [vmem:[%s4436_s8 + $0x624] sm:$0xf]  ;;  %v3634_v4 = vor.u32 %v3984_v57, %v3631_v58 }
 0x11c   : > { %2225 = vmatpush.bf16.msra.mxu2 %v3290_v63  ;;  %v3570_v60 = vor.u32 %v3968_v56, %v3567_v30  ;;  %v3431_v63 = vld [vmem:[%s4436_s8 + $0x628] sm:$0xf0] }
 0x11d   : > { %2238 = vmatpush.bf16.msra.mxu3 %v3354_v5  ;;  %2200 = vmatmul.bf16.vlgmr.msra.gmra.mxu0 %v4093_v20  ;;  %v2007_v54 = vadd.f32 %v2006_v50, %v1994_v48  ;;  %v3434_v27 = vor.u32 %v3934_v62, %v3431_v63  ;;  %v3964_v20 = vld [vmem:[%s4436_s8 + $0x714] sm:$0xf]  ;;  %v4098_v48 = vld [vmem:[#allocation1 + $0x2d] sm:$0xff] }
 0x11e   : > { %2244 = vmatpush.bf16.msrb.mxu0 %v3474_v21  ;;  %2213 = vmatmul.bf16.vlgmr.msra.gmra.mxu1 %v4095_v31  ;;  %v3495_v21 = vld [vmem:[%s4436_s8 + $0x6a8] sm:$0xf0]  ;;  %v4100_v50 = vld [vmem:[#allocation1 + $0x3f] sm:$0xff] }
 0x11f   : > { %2257 = vmatpush.bf16.msrb.mxu1 %v3538_v6  ;;  %2226 = vmatmul.bf16.vlgmr.msra.gmra.mxu2 %v4094_v29  ;;  %v3966_v6 = vld [vmem:[%s4436_s8 + $0x724] sm:$0xf]  ;;  %v3498_v13 = vor.u32 %v3950_v0, %v3495_v21  ;;  %v3490_v29 = vor.u32 %v3948_v17, %v3487_v19 }
 0x120   : > { %2270 = vmatpush.bf16.msrb.mxu2 %v3602_v7  ;;  %2239 = vmatmul.bf16.vlgmr.msra.gmra.mxu3 %v4096_v34  ;;  %v3559_v7 = vld [vmem:[%s4436_s8 + $0x728] sm:$0xf0]  ;;  %v3946_v34 = vld [vmem:[%s4436_s8 + $0x684] sm:$0xf] }
 0x121   : > { %2283 = vmatpush.bf16.msrb.mxu3 %v3666_v9  ;;  %v3623_v9 = vld [vmem:[%s4436_s8 + $0x7a8] sm:$0xf0] }
 0x122   : > { %2245 = vmatpush.bf16.msrb.mxu0 %v3466_v14  ;;  %v2019_v5 = vpop.f32.mrf.mxu2  ;;  %v1995_v10 = vpop.f32.mrf.mxu0  ;;  %v3562_v14 = vor.u32 %v3966_v6, %v3559_v7  ;;  %v3626_v18 = vor.u32 %v3982_v23, %v3623_v9 }
 0x123   : > { %2258 = vmatpush.bf16.msrb.mxu1 %v3530_v15  ;;  %v2020_v22 = vadd.f32 %v2019_v5, %v2007_v54  ;;  %v2032_v8 = vpop.f32.mrf.mxu3  ;;  %v2008_v11 = vpop.f32.mrf.mxu1  ;;  %v3932_v15 = vld [vmem:[%s4436_s8 + $0x614] sm:$0xf] }
 0x124   : > { %2271 = vmatpush.bf16.msrb.mxu2 %v3594_v16  ;;  %v3423_v16 = vld [vmem:[%s4436_s8 + $0x618] sm:$0xf0] }
 0x125   : > { %2284 = vmatpush.bf16.msrb.mxu3 %v3658_v24  ;;  %v2033_v12 = vadd.f32 %v2032_v8, %v2020_v22  ;;  %v3551_v24 = vld [vmem:[%s4436_s8 + $0x718] sm:$0xf0]  ;;  %v3426_v28 = vor.u32 %v3932_v15, %v3423_v16 }
 0x126   : > { %2246 = vmatpush.bf16.msrb.mxu0 %v3458_v35  ;;  %v3554_v31 = vor.u32 %v3964_v20, %v3551_v24  ;;  %v3618_v35 = vor.u32 %v3980_v25, %v3615_v26 }
 0x127   : > { %2259 = vmatpush.bf16.msrb.mxu1 %v3522_v36  ;;  %v3479_v36 = vld [vmem:[%s4436_s8 + $0x688] sm:$0xf0] }
 0x128   : > { %2272 = vmatpush.bf16.msrb.mxu2 %v3586_v37  ;;  %v3962_v37 = vld [vmem:[%s4436_s8 + $0x704] sm:$0xf]  ;;  %v3482_v44 = vor.u32 %v3946_v34, %v3479_v36 }
 0x129   : > { %2285 = vmatpush.bf16.msrb.mxu3 %v3650_v41  ;;  %v3607_v41 = vld [vmem:[%s4436_s8 + $0x788] sm:$0xf0]  ;;  %v3546_v45 = vor.u32 %v3962_v37, %v3543_v38 }
 0x12a   : > { %2247 = vmatpush.bf16.msrb.mxu0 %v3450_v49  ;;  %v2021_v39 = vpop.f32.mrf.mxu2  ;;  %v3610_v46 = vor.u32 %v3978_v40, %v3607_v41  ;;  %v4099_v49 = vld [vmem:[#allocation1 + $0x36] sm:$0xff] }
 0x12b   : > { %2260 = vmatpush.bf16.msrb.mxu1 %v3514_v61  ;;  %v2034_v42 = vpop.f32.mrf.mxu3 }
 0x12c   : > { %2273 = vmatpush.bf16.msrb.mxu2 %v3578_v51 }
 0x12d   : > { %2286 = vmatpush.bf16.msrb.mxu3 %v3642_v2 }
 0x12e   : > { %2248 = vmatpush.bf16.msrb.mxu0 %v3442_v3 }
 0x12f   : > { %2261 = vmatpush.bf16.msrb.mxu1 %v3506_v59 }
 0x130   : > { %2274 = vmatpush.bf16.msrb.mxu2 %v3570_v60 }
 0x131   : > { %2287 = vmatpush.bf16.msrb.mxu3 %v3634_v4 }
 0x132   : > { %2249 = vmatpush.bf16.msrb.mxu0 %v3434_v27 }
 0x133   : > { %2262 = vmatpush.bf16.msrb.mxu1 %v3498_v13 }
 0x134   : > { %2275 = vmatpush.bf16.msrb.mxu2 %v3562_v14 }
 0x135   : > { %2288 = vmatpush.bf16.msrb.mxu3 %v3626_v18 }
 0x136   : > { %2250 = vmatpush.bf16.msrb.mxu0 %v3426_v28 }
 0x137   : > { %2263 = vmatpush.bf16.msrb.mxu1 %v3490_v29 }
 0x138   : > { %2276 = vmatpush.bf16.msrb.mxu2 %v3554_v31 }
 0x139   : > { %2289 = vmatpush.bf16.msrb.mxu3 %v3618_v35 }
 0x13a   : > { %2251 = vmatpush.bf16.msrb.mxu0 %v3418_v43  ;;  %v2045_v61 = vpop.f32.mrf.mxu0 }
 0x13b   : > { %2264 = vmatpush.bf16.msrb.mxu1 %v3482_v44  ;;  %v2046_v51 = vadd.f32 %v2045_v61, %v2033_v12  ;;  %v2058_v52 = vpop.f32.mrf.mxu1  ;;  %v305_v44 = vld [vmem:[#allocation2] sm:$0xf] }
 0x13c   : > { %2277 = vmatpush.bf16.msrb.mxu2 %v3546_v45 }
 0x13d   : > { %2290 = vmatpush.bf16.msrb.mxu3 %v3610_v46  ;;  %2252 = vmatmul.bf16.vlgmr.msrb.gmra.mxu0 %v4097_v47  ;;  %v2059_v53 = vadd.f32 %v2058_v52, %v2046_v51 }
 0x13e   : > { %2265 = vmatmul.bf16.vlgmr.msrb.gmra.mxu1 %v4098_v48 }
 0x13f   : > { %2278 = vmatmul.bf16.vlgmr.msrb.gmra.mxu2 %v4099_v49 }
 0x140   : > { %2291 = vmatmul.bf16.vlgmr.msrb.gmra.mxu3 %v4100_v50 }
 0x142   : > { %v2071_v1 = vpop.f32.mrf.mxu2  ;;  %v2047_v55 = vpop.f32.mrf.mxu0 }
 0x143   : > { %v2072_v2 = vadd.f32 %v2071_v1, %v2059_v53  ;;  %v2084_v54 = vpop.f32.mrf.mxu3  ;;  %v2060_v56 = vpop.f32.mrf.mxu1 }
 0x145   : > { %v2085_v30 = vadd.f32 %v2084_v54, %v2072_v2 }
 0x14a   : > { %v2073_v57 = vpop.f32.mrf.mxu2 }
 0x14b   : > { %v2086_v58 = vpop.f32.mrf.mxu3 }
 0x15a   : > { %v2097_v3 = vpop.f32.mrf.mxu0 }
 0x15b   : > { %v2110_v59 = vpop.f32.mrf.mxu1 }
 0x15c   : > { %v2111_v60 = vadd.f32 %v2110_v59, %v2097_v3 }
 0x162   : > { %v2123_v62 = vpop.f32.mrf.mxu2  ;;  %v2099_v5 = vpop.f32.mrf.mxu0 }
 0x163   : > { %v2124_v63 = vadd.f32 %v2123_v62, %v2111_v60  ;;  %v2136_v0 = vpop.f32.mrf.mxu3  ;;  %v2112_v21 = vpop.f32.mrf.mxu1 }
 0x165   : > { %v2137_v4 = vadd.f32 %v2136_v0, %v2124_v63 }
 0x16a   : > { %v2125_v6 = vpop.f32.mrf.mxu2 }
 0x16b   : > { %v2138_v7 = vpop.f32.mrf.mxu3 }
 0x17a   : > { %v2149_v22 = vpop.f32.mrf.mxu0 }
 0x17b   : > { %v2162_v8 = vpop.f32.mrf.mxu1  ;;  %v2150_v15 = vadd.f32 %v2149_v22, %v2137_v4 }
 0x17d   : > { %v2163_v19 = vadd.f32 %v2162_v8, %v2150_v15 }
 0x182   : > { %v2175_v23 = vpop.f32.mrf.mxu2  ;;  %v2151_v10 = vpop.f32.mrf.mxu0 }
 0x183   : > { %v2188_v9 = vpop.f32.mrf.mxu3  ;;  %v2164_v27 = vpop.f32.mrf.mxu1  ;;  %v2176_v24 = vadd.f32 %v2175_v23, %v2163_v19 }
 0x185   : > { %v2189_v28 = vadd.f32 %v2188_v9, %v2176_v24 }
 0x18a   : > { %v2177_v11 = vpop.f32.mrf.mxu2 }
 0x18b   : > { %v2190_v12 = vpop.f32.mrf.mxu3 }
 0x19a   : > { %v2201_v13 = vpop.f32.mrf.mxu0 }
 0x19b   : > { %v2214_v14 = vpop.f32.mrf.mxu1  ;;  %v2202_v29 = vadd.f32 %v2201_v13, %v2189_v28 }
 0x19d   : > { %v2215_v31 = vadd.f32 %v2214_v14, %v2202_v29 }
 0x1a2   : > { %v2227_v16 = vpop.f32.mrf.mxu2  ;;  %v2203_v18 = vpop.f32.mrf.mxu0 }
 0x1a3   : > { %v2240_v17 = vpop.f32.mrf.mxu3  ;;  %v2216_v20 = vpop.f32.mrf.mxu1  ;;  %v2228_v32 = vadd.f32 %v2227_v16, %v2215_v31 }
 0x1a5   : > { %v2241_v33 = vadd.f32 %v2240_v17, %v2228_v32 }
 0x1aa   : > { %v2229_v25 = vpop.f32.mrf.mxu2 }
 0x1ab   : > { %v2242_v26 = vpop.f32.mrf.mxu3 }
 0x1ba   : > { %v2253_v34 = vpop.f32.mrf.mxu0 }
 0x1bb   : > { %v2266_v35 = vpop.f32.mrf.mxu1  ;;  %v2254_v36 = vadd.f32 %v2253_v34, %v2241_v33 }
 0x1bd   : > { %v2267_v37 = vadd.f32 %v2266_v35, %v2254_v36 }
 0x1c2   : > { %v2279_v38 = vpop.f32.mrf.mxu2  ;;  %v2255_v41 = vpop.f32.mrf.mxu0 }
 0x1c3   : > { %v2280_v39 = vadd.f32 %v2279_v38, %v2267_v37  ;;  %v2292_v40 = vpop.f32.mrf.mxu3  ;;  %v2268_v42 = vpop.f32.mrf.mxu1 }
 0x1c5   : > { %v2293_v43 = vadd.f32 %v2292_v40, %v2280_v39 }
 0x1c7   : > { %v2298_v45 = vrot.slane %v2293_v43, 6 }
 0x1c8   : > { %2307 = sbr.rel (%p3667_p1) target bundleno = 903 (0x387), region = 64 }
 0x1c9   : > { %v2300_v46 = vsel %vm2299_vm0, %v2085_v30, %v2298_v45 }
 0x1ca   : > { %v2302_v47 = vadd.f32 %v2300_v46, %v305_v44  ;;  %v2281_v48 = vpop.f32.mrf.mxu2 }
 0x1cb   : > { %v2294_v49 = vpop.f32.mrf.mxu3 }
 0x1cc   : > { %2303 = vst [vmem:[#allocation2] sm:$0xf] %v2302_v47 }
 0x1cd   : > { %v2309_v50 = vld [vmem:[#allocation6] sm:$0x3]  ;;  %v4000_v62 = vld [vmem:[#allocation8 + $0x30] sm:$0xff]  ;;  %v3999_v0 = vld [vmem:[#allocation8 + $0x28] sm:$0xff]  ;;  %v4310_v15 = vmov 269488144  }
 0x1ce   : > { %v2311_v61 = vperm.slane %v2309_v50, 0  ;;  %v2312_v51 = vperm.slane %v2309_v50, 1  ;;  %v4001_v59 = vld [vmem:[#allocation8 + $0x38] sm:$0xff]  ;;  %v4008_v63 = vld [vmem:[#allocation8 + $0x70] sm:$0xff]  ;;  %v4007_v4 = vld [vmem:[#allocation8 + $0x68] sm:$0xff]  ;;  %v2342_v16 = vunpack.c.l.s4 %v4310_v15 }
 0x1cf   : > { %v4009_v60 = vld [vmem:[#allocation8 + $0x78] sm:$0xff]  ;;  %2487 = vmatpush.bf16.msra.mxu0 %v4001_v59  ;;  %v3998_v5 = vld [vmem:[#allocation8 + $0x20] sm:$0xff]  ;;  %v3996_v22 = vld [vmem:[#allocation8 + $0x10] sm:$0xff] }
 0x1d0   : > { %v2313_v53 = vrot.slane %v2312_v51, 6  ;;  %2500 = vmatpush.bf16.msra.mxu1 %v4009_v60  ;;  %v4006_v21 = vld [vmem:[#allocation8 + $0x60] sm:$0xff]  ;;  %v3997_v6 = vld [vmem:[#allocation8 + $0x18] sm:$0xff]  ;;  %v4004_v8 = vld [vmem:[#allocation8 + $0x50] sm:$0xff]  ;;  %v2343_v19 = vunpack.c.0.s8 %v2342_v16 }
 0x1d1   : > { %v4005_v7 = vld [vmem:[#allocation8 + $0x58] sm:$0xff]  ;;  %v3995_v23 = vld [vmem:[#allocation8 + $0x8] sm:$0xff]  ;;  %v3994_v10 = vld [vmem:[#allocation8] sm:$0xff] }
 0x1d2   : > { %v2314_v1 = vsel %vm2299_vm0, %v2311_v61, %v2313_v53  ;;  %v4003_v9 = vld [vmem:[#allocation8 + $0x48] sm:$0xff]  ;;  %v4002_v27 = vld [vmem:[#allocation8 + $0x40] sm:$0xff] }
 0x1d3   : > { %v2308_v52 = vld [vmem:[#allocation2] sm:$0xf]  ;;  %2488 = vmatpush.bf16.msra.mxu0 %v4000_v62  ;;  %v4101_v33 = vld [vmem:[#allocation9] ss:$0 sm:$0xff] }
 0x1d4   : > { %v2316_v2 = vadd.f32 %v2314_v1, %v2308_v52  ;;  %2501 = vmatpush.bf16.msra.mxu1 %v4008_v63 }
 0x1d6   : > { %v2317_v54 = vmax.f32 %v2316_v2, 0.0 }
 0x1d7   : > { %2489 = vmatpush.bf16.msra.mxu0 %v3999_v0 }
 0x1d8   : > { %v2318_v55 = vmul.f32 %v2317_v54, %v2317_v54  ;;  %2502 = vmatpush.bf16.msra.mxu1 %v4007_v4 }
 0x1da   : > { %2320 = vst [vmem:[#allocation1] ss:$4 sm:$0xff] %v2318_v55 }
 0x1db   : > { %2490 = vmatpush.bf16.msra.mxu0 %v3998_v5 }
 0x1dc   : > { %2503 = vmatpush.bf16.msra.mxu1 %v4006_v21 }
 0x1df   : > { %2491 = vmatpush.bf16.msra.mxu0 %v3997_v6 }
 0x1e0   : > { %2504 = vmatpush.bf16.msra.mxu1 %v4005_v7 }
 0x1e1   : > { %v2321_v56 = vld.sshfl [vmem:[#allocation1] sm:$0xff pattern:$0x73625140]  ;;  %v2322_v30 = vld.sshfl [vmem:[#allocation1 + $0x8] sm:$0xff pattern:$0x73625140] }
 0x1e2   : > { %v2325_v57 = vsel %vm2299_vm0, %v2321_v56, 0.0  ;;  %v2326_v58 = vsel %vm2299_vm0, %v2322_v30, 0.0 }
 0x1e3   : > { %v2327_v3 = vadd.f32 %v2326_v58, %v2325_v57  ;;  %2492 = vmatpush.bf16.msra.mxu0 %v3996_v22 }
 0x1e4   : > { %2505 = vmatpush.bf16.msra.mxu1 %v4004_v8 }
 0x1e5   : > { %2328 = vadd.xlane.f32.xlu0 %v2327_v3 }
 0x1e7   : > { %2493 = vmatpush.bf16.msra.mxu0 %v3995_v23 }
 0x1e8   : > { %2506 = vmatpush.bf16.msra.mxu1 %v4003_v9 }
 0x1eb   : > { %2494 = vmatpush.bf16.msra.mxu0 %v3994_v10 }
 0x1ec   : > { %2507 = vmatpush.bf16.msra.mxu1 %v4002_v27 }
 0x258   : > { %v2329_v11 = vpop.xlane.xlu0 %2328 }
 0x259   : > { %4102 = vrsqrt.f32 %v2329_v11  ;;  %vm2336_vm2 = vweird.f32 %v2329_v11 }
 0x25f   : > { %v4103_v12 = vpop.eup %4102 }
 0x260   : > { %v2331_v13 = vmul.f32 %v4103_v12, %v2329_v11  ;;  %vm2337_vm1 = vweird.f32 %v4103_v12 }
 0x261   : > { %vm2338_vm3 = vmor %vm2336_vm2, %vm2337_vm1 }
 0x262   : > { %v2332_v14 = vmul.f32 %v4103_v12, %v2331_v13 }
 0x264   : > { %v2333_v17 = vmul.f32 0.5, %v2332_v14 }
 0x266   : > { %v2334_v18 = vsub.f32 1.5, %v2333_v17 }
 0x268   : > { %v2335_v20 = vmul.f32 %v4103_v12, %v2334_v18 }
 0x26a   : > { %v2339_v24 = vsel %vm2338_vm3, %v4103_v12, %v2335_v20 }
 0x26b   : > { %v2344_v25 = vperm.slane %v2339_v24, %v2343_v19 }
 0x26d   : > { %v2346_v26 = vmul.f32 %v2344_v25, %v2317_v54 }
 0x26f   : > { %2348 = vst [vmem:[#allocation1] ss:$4 sm:$0xff] %v2346_v26 }
 0x276   : > { %v2349_v28 = vld.sshfl [vmem:[#allocation1] sm:$0xff pattern:$0x73625140]  ;;  %v2350_v29 = vld.sshfl [vmem:[#allocation1 + $0x8] sm:$0xff pattern:$0x73625140] }
 0x277   : > { %v2353_v31 = vpack.c.bf16 %v2349_v28, %v2349_v28  ;;  %v2354_v32 = vpack.c.bf16 %v2350_v29, %v2350_v29 }
 0x279   : > { %2495 = vmatmul.bf16.vlgmr.msra.gmra.mxu0 %v2353_v31  ;;  %2508 = vmatmul.bf16.vlgmr.msra.gmra.mxu1 %v2354_v32 }
 0x2f6   : > { %v2496_v34 = vpop.f32.mrf.mxu0  ;;  %v2509_v35 = vpop.f32.mrf.mxu1 }
 0x2f7   : > { %v2497_v36 = vadd.f32 %v4101_v33, %v2496_v34 }
 0x2f9   : > { %v2510_v37 = vadd.f32 %v2509_v35, %v2497_v36 }
 0x2fb   : > { %v2513_v38 = vmul.f32 %v2510_v37, %v2510_v37 }
 0x2fd   : > { %v2514_v39 = vsel %vm2299_vm0, %v2513_v38, 0.0 }
 0x2fe   : > { %v2498_v40 = vpop.f32.mrf.mxu0  ;;  %v2511_v41 = vpop.f32.mrf.mxu1  ;;  %2515 = vadd.xlane.f32.xlu0 %v2514_v39 }
 0x371   : > { %v2516_v42 = vpop.xlane.xlu0 %2515 }
 0x372   : > { %4104 = vrsqrt.f32 %v2516_v42  ;;  %vm2523_vm5 = vweird.f32 %v2516_v42 }
 0x378   : > { %v4105_v43 = vpop.eup %4104 }
 0x379   : > { %v2518_v44 = vmul.f32 %v4105_v43, %v2516_v42  ;;  %vm2524_vm4 = vweird.f32 %v4105_v43 }
 0x37a   : > { %vm2525_vm6 = vmor %vm2523_vm5, %vm2524_vm4 }
 0x37b   : > { %v2519_v45 = vmul.f32 %v4105_v43, %v2518_v44 }
 0x37d   : > { %v2520_v46 = vmul.f32 0.5, %v2519_v45 }
 0x37f   : > { %v2521_v47 = vsub.f32 1.5, %v2520_v46 }
 0x381   : > { %v2522_v48 = vmul.f32 %v4105_v43, %v2521_v47 }
 0x383   : > { %v2526_v49 = vsel %vm2525_vm6, %v4105_v43, %v2522_v48 }
 0x384   : > { %v2527_v50 = vmul.f32 %v2526_v49, %v2510_v37 }
 0x386   : > { %2528 = vst [vmem:[#allocation11] sm:$0x3] %v2527_v50 }
 0x387 PF: > { %p4049_p4 = scmp.eq.s32.totalorder %s4361_s22, 15  ;;  %s4311_s11 = smov [#allocation11]  }
 0x388   : > { %s2535_s12 = sshll.u32 %s4311_s11, 4  ;;  %s2537_s15 = sshll.u32 %s5038_s5, 4  ;;  %s2536_s12 = int_to_ptr.vmem [resolvable:$true] %s2535_s12  ;;  %s2538_s15 = int_to_ptr.hbm [resolvable:$true] %s2537_s15 }
 0x389   : > { %4025 = dma.vmem_to_hbm [thread:$0]  (%p4049_p4), %s2536_s12, 32, %s2538_s15, [#allocation5]  }
 0x38a   : > { %4283 = dma.done.wait (%p4049_p4), [#allocation5], 32  }
 0x38b   : > { %4285 = vsyncadd (%p4049_p4), [#allocation5], 4294967264 }
 0x38c PF: > { %s5043_s21 = smov %s4402_s18  ;;  %p18_p5 = scmp.ge.s32.totalorder %s4402_s18, 18  }
 0x38d   : > { %s5044_s18 = smov %s4292_s19  ;;  %s5045_s19 = smov %s4296_s20 }
 0x38e   : > { %s5046_s20 = smov %s4412_s26  ;;  %20 = sbr.rel (!%p18_p5) target bundleno = 6 (0x6), region = 100 }
 0x393   :  { %2551 = vsyncpa [#allocation4], 1 }
 0x394   :  { %2553 = vsyncpa [#allocation4 + $0x1], 1 }
 0x395   :  { %2554 = vsyncpa [#allocation7], 1 }
 0x396   :  { %2555 = vsyncpa [#allocation10], 1 }
 0x397   :  { %2556 = vsyncpa [#allocation5], 1 }
 0x398   :  { %2558 = vsyncpa [#allocation5 + $0x1], 1 }

</bundles_post_ra>
